<compile_context>
chip_gen: v5e
topology: v5e:2x2
jax: 0.10.0
libtpu: 0.0.40
codegen_flags: <defaults>
</compile_context>

<pallas_src>
import functools

import jax
import jax.numpy as jnp
from jax import lax
from jax.experimental import pallas as pl
from jax.experimental.pallas import tpu as pltpu

K = 5           # depthwise kernel size
PAD = 2         # depthwise 'same' padding
LPAD = 8        # left padding of the scratch: keeps the interior bulk store aligned
BN_EPS = 1e-5   # nn.BatchNorm2d default eps
F32 = jnp.float32


# ---------------------------------------------------------------------------
# In-kernel helpers
# ---------------------------------------------------------------------------
def _zero_halo(ref, H, W, c):
    """Zero only the halo strips of a (H+2*PAD, W+LPAD+PAD, c) padded scratch.

    The interior [PAD:PAD+H, LPAD:LPAD+W, :] is fully rewritten each grid step, so
    a full memset would be wasted VPU/store work.
    """
    Hp = H + 2 * PAD
    Wp = W + LPAD + PAD
    c0 = LPAD - PAD
    ref[:PAD] = jnp.zeros((PAD, Wp, c), F32)                 # top halo rows
    ref[PAD + H:] = jnp.zeros((PAD, Wp, c), F32)             # bottom halo rows
    ref[:, c0:LPAD, :] = jnp.zeros((Hp, PAD, c), F32)        # left halo columns
    ref[:, LPAD + W:, :] = jnp.zeros((Hp, PAD, c), F32)      # right halo columns


# ---------------------------------------------------------------------------
# Fused kernels
# ---------------------------------------------------------------------------
def _fused_kernel_s1(x_ref, w1_ref, b1_ref, wdw_ref, bdw_ref, w2e_ref, b2e_ref,
                     e1s_ref, o_ref, xp_ref, *, H, W, bf, RB):
    """stride=1 block: out = shuffle(concat([x1, branch2(x2)])) in one kernel.

    x_ref  : (1, H*W, 2*bf) flattened NHWC pixels.
    w1_ref : (bf, bf)   pw1 weight (acts on x2 only, BN1 scale folded in).
    wdw_ref: (K*K,1,bf) depthwise weights (BN2 scale folded in).
    w2e_ref: (bf, 2*bf) pw2 weight expanded to the shuffled (odd) output channels.
    e1s_ref: (bf, 2*bf) selection routing x1 to the even output channels.
    """
    c0 = LPAD - PAD
    _zero_halo(xp_ref, H, W, bf)

    # branch2 pw1 (1x1 conv + folded BN + ReLU) on x2 only -- no zero-padded weights.
    x2 = x_ref[0, :, bf:]                                          # (H*W, bf)
    y1 = jnp.maximum(jnp.dot(x2, w1_ref[...], preferred_element_type=F32)
                     + b1_ref[...], 0.0)

    # Bulk spatialization: one aligned store instead of H per-row masked stores.
    xp_ref[PAD:PAD + H, LPAD:LPAD + W, :] = y1.reshape(H, W, bf)

    # 5x5 depthwise + folded BN + pw2 + x1 passthrough, RB output rows per step.
    nrb = H // RB

    def row_block(rb, carry):
        r0 = rb * RB
        acc = jnp.zeros((RB, W, bf), F32)
        for kh in range(K):                                        # 25-tap inner loop
            for kw in range(K):
                acc = acc + (xp_ref[pl.ds(r0 + kh, RB), c0 + kw:c0 + kw + W, :]
                             * wdw_ref[kh * K + kw])
        dw = (acc + bdw_ref[...]).reshape(RB * W, bf)              # straight to MXU
        y2 = jnp.maximum(jnp.dot(dw, w2e_ref[...], preferred_element_type=F32)
                         + b2e_ref[...], 0.0)                      # odd channels
        m0 = pl.multiple_of(r0 * W, RB * W)
        x1 = x_ref[0, pl.ds(m0, RB * W), :bf]
        skip = jnp.dot(x1, e1s_ref[...], preferred_element_type=F32)  # even channels
        o_ref[0, pl.ds(m0, RB * W), :] = (y2 + skip).astype(o_ref.dtype)
        return carry

    lax.fori_loop(0, nrb, row_block, 0)


def _fused_kernel_s2(x_ref, w21_ref, b21_ref, wdw1_ref, bdw1_ref, wdw2_ref, bdw2_ref,
                     selg_ref, w1e_ref, w2e_ref, bcat_ref,
                     o_ref, xp1_ref, xp2_ref, dwp1_ref, dwp2_ref,
                     *, H, W, Ho, Wo, s, inp, bf):
    """stride>=2 block: out = shuffle(concat([branch1(x), branch2(x)])) in one kernel."""
    c0 = LPAD - PAD
    _zero_halo(xp1_ref, H, W, inp)
    _zero_halo(xp2_ref, H, W, bf)

    # branch2 pw1 (1x1 conv + folded BN + ReLU) as one whole-image MXU matmul.
    x2d = x_ref[0]                                                 # (H*W, inp)
    y1 = jnp.maximum(jnp.dot(x2d, w21_ref[...], preferred_element_type=F32)
                     + b21_ref[...], 0.0)                          # (H*W, bf)

    # Bulk spatialization of the raw input (branch1) and the pw1 output (branch2).
    xp1_ref[PAD:PAD + H, LPAD:LPAD + W, :] = x2d.reshape(H, W, inp)
    xp2_ref[PAD:PAD + H, LPAD:LPAD + W, :] = y1.reshape(H, W, bf)

    # Strided-in-H 5x5 depthwise for both branches: only the needed output rows are
    # produced (full W width); one output row per fori_loop step bounds live ranges.
    def dw_row(ho, carry):
        h0 = s * ho
        r1 = jnp.zeros((W, inp), F32)
        r2 = jnp.zeros((W, bf), F32)
        for kh in range(K):                                        # 25-tap inner loop
            for kw in range(K):
                i = kh * K + kw
                r1 = r1 + xp1_ref[h0 + kh, c0 + kw:c0 + kw + W, :] * wdw1_ref[i]
                r2 = r2 + xp2_ref[h0 + kh, c0 + kw:c0 + kw + W, :] * wdw2_ref[i]
        dwp1_ref[ho] = r1 + bdw1_ref[...]
        dwp2_ref[ho] = r2 + bdw2_ref[...]
        return carry

    lax.fori_loop(0, Ho, dw_row, 0)

    # W-direction subsample for all rows at once: one batched block-diagonal 0/1
    # selection matmul per branch (replaces 2*Ho tiny per-row matmuls).
    dws1 = jnp.dot(selg_ref[...], dwp1_ref[...].reshape(Ho * W, inp),
                   preferred_element_type=F32)                     # (Mo, inp)
    dws2 = jnp.dot(selg_ref[...], dwp2_ref[...].reshape(Ho * W, bf),
                   preferred_element_type=F32)                     # (Mo, bf)

    # Final 1x1 convs; weights are pre-expanded to the shuffled channel positions
    # (branch1 -> even, branch2 -> odd), so one add gives the shuffled output.
    out = (jnp.dot(dws1, w1e_ref[...], preferred_element_type=F32)
           + jnp.dot(dws2, w2e_ref[...], preferred_element_type=F32)
           + bcat_ref[...])
    o_ref[0] = jnp.maximum(out, 0.0).astype(o_ref.dtype)


# ---------------------------------------------------------------------------
# pallas_call wrappers
# ---------------------------------------------------------------------------
def _full_specs(arrs):
    specs = []
    for a in arrs:
        nd = a.ndim
        specs.append(pl.BlockSpec(a.shape, lambda n, _nd=nd: (0,) * _nd))
    return specs


def _compiler_params():
    # 32 MiB scoped VMEM is safe on every generation (v7x has only 64 MiB physical);
    # whole-image-per-step blocks are tiny at ShuffleNet resolutions.
    return pltpu.CompilerParams(
        dimension_semantics=("parallel",),           # batch axis -> megacore / 2-TC
        vmem_limit_bytes=32 * 1024 * 1024)


def _call_fused_s1(x2d, consts, *, N, H, W, bf):
    HW = H * W
    oup = 2 * bf
    Wp = W + LPAD + PAD
    RB = 8 if H % 8 == 0 else H                      # sublane-aligned row blocks
    kernel = functools.partial(_fused_kernel_s1, H=H, W=W, bf=bf, RB=RB)
    in_specs = [pl.BlockSpec((1, HW, oup), lambda n: (n, 0, 0))] + _full_specs(consts)
    return pl.pallas_call(
        kernel,
        out_shape=jax.ShapeDtypeStruct((N, HW, oup), x2d.dtype),
        grid_spec=pltpu.PrefetchScalarGridSpec(
            num_scalar_prefetch=0,
            grid=(N,),
            in_specs=in_specs,
            out_specs=pl.BlockSpec((1, HW, oup), lambda n: (n, 0, 0)),
            scratch_shapes=[
                pltpu.VMEM((H + 2 * PAD, Wp, bf), F32),   # padded pw1 output (halo)
            ]),
        compiler_params=_compiler_params(),
    )(x2d, *consts)


def _call_fused_s2(x2d, consts, *, N, H, W, inp, bf, stride):
    Ho = (H - 1) // stride + 1
    Wo = (W - 1) // stride + 1
    HW = H * W
    Mo = Ho * Wo
    oup = 2 * bf
    Wp = W + LPAD + PAD
    kernel = functools.partial(_fused_kernel_s2, H=H, W=W, Ho=Ho, Wo=Wo,
                               s=stride, inp=inp, bf=bf)
    in_specs = [pl.BlockSpec((1, HW, inp), lambda n: (n, 0, 0))] + _full_specs(consts)
    out = pl.pallas_call(
        kernel,
        out_shape=jax.ShapeDtypeStruct((N, Mo, oup), x2d.dtype),
        grid_spec=pltpu.PrefetchScalarGridSpec(
            num_scalar_prefetch=0,
            grid=(N,),
            in_specs=in_specs,
            out_specs=pl.BlockSpec((1, Mo, oup), lambda n: (n, 0, 0)),
            scratch_shapes=[
                pltpu.VMEM((H + 2 * PAD, Wp, inp), F32),  # padded raw input (branch1)
                pltpu.VMEM((H + 2 * PAD, Wp, bf), F32),   # padded pw1 output (branch2)
                pltpu.VMEM((Ho, W, inp), F32),            # full-W dw rows (branch1)
                pltpu.VMEM((Ho, W, bf), F32),             # full-W dw rows (branch2)
            ]),
        compiler_params=_compiler_params(),
    )(x2d, *consts)
    return out, Ho, Wo


# ---------------------------------------------------------------------------
# Parameter preparation (fold BN scales into weights; fold channel_shuffle into the
# final 1x1 weights: branch1/x1 -> even output channels, branch2 -> odd)
# ---------------------------------------------------------------------------
def _prep_consts_s1(params, inp):
    p = params["branch2"]
    bf = inp // 2
    oup = 2 * bf
    w1 = p["pw1_w"] * p["bn1_scale"][None, :]                       # (bf, bf)
    b1 = p["bn1_bias"].reshape(1, bf)
    wdw = (p["dw_w"][:, :, 0, :] * p["bn2_scale"][None, None, :]).reshape(K * K, 1, bf)
    bdw = p["bn2_bias"].reshape(1, bf)
    w2e = jnp.zeros((bf, oup), F32).at[:, 1::2].set(p["pw2_w"] * p["bn3_scale"][None, :])
    b2e = jnp.zeros((1, oup), F32).at[0, 1::2].set(p["bn3_bias"])
    e1s = jnp.zeros((bf, oup), F32).at[jnp.arange(bf), 2 * jnp.arange(bf)].set(1.0)
    return [w1, b1, wdw, bdw, w2e, b2e, e1s]


def _prep_consts_s2(params, inp, H, W, stride):
    p1, p2 = params["branch1"], params["branch2"]
    bf = p1["pw_w"].shape[1]
    oup = 2 * bf
    Ho = (H - 1) // stride + 1
    Wo = (W - 1) // stride + 1
    Mo = Ho * Wo
    # branch2: 1x1(+bn1, ReLU) -> dw(+bn2) -> 1x1(+bn3, ReLU), routed to odd channels.
    w21 = p2["pw1_w"] * p2["bn1_scale"][None, :]
    b21 = p2["bn1_bias"].reshape(1, bf)
    wdw2 = (p2["dw_w"][:, :, 0, :] * p2["bn2_scale"][None, None, :]).reshape(K * K, 1, bf)
    bdw2 = p2["bn2_bias"].reshape(1, bf)
    w2e = jnp.zeros((bf, oup), F32).at[:, 1::2].set(p2["pw2_w"] * p2["bn3_scale"][None, :])
    # branch1: dw(+bn1) -> 1x1(+bn2, ReLU), routed to the even (shuffled) channels.
    wdw1 = (p1["dw_w"][:, :, 0, :] * p1["bn1_scale"][None, None, :]).reshape(K * K, 1, inp)
    bdw1 = p1["bn1_bias"].reshape(1, inp)
    w1e = jnp.zeros((inp, oup), F32).at[:, 0::2].set(p1["pw_w"] * p1["bn2_scale"][None, :])
    bcat = (jnp.zeros((1, oup), F32)
            .at[0, 0::2].set(p1["bn2_bias"])
            .at[0, 1::2].set(p2["bn3_bias"]))
    # One-hot W-subsample: output pixel (ho, wo) <- full-width dw row ho, column s*wo.
    r = jnp.arange(Mo)
    selg = jnp.zeros((Mo, Ho * W), F32).at[r, (r // Wo) * W + stride * (r % Wo)].set(1.0)
    return [w21, b21, wdw1, bdw1, wdw2, bdw2, selg, w1e, w2e, bcat], bf


# ---------------------------------------------------------------------------
# Public module forward (NCHW in / NCHW out, like PyTorch)
# ---------------------------------------------------------------------------
def inverted_residual(x_nchw, params, stride):
    N, Cin, H, W = x_nchw.shape
    # NCHW -> NHWC is a real XLA transpose copy outside the kernel; the subsequent
    # flatten to (N, H*W, C) is free.  Kernels work channels-on-lanes.
    x2d = jnp.transpose(x_nchw, (0, 2, 3, 1)).reshape(N, H * W, Cin)
    if stride == 1:
        bf = Cin // 2
        consts = _prep_consts_s1(params, Cin)
        out2d = _call_fused_s1(x2d, consts, N=N, H=H, W=W, bf=bf)
        Ho, Wo = H, W
    else:
        consts, bf = _prep_consts_s2(params, Cin, H, W, stride)
        out2d, Ho, Wo = _call_fused_s2(x2d, consts, N=N, H=H, W=W,
                                       inp=Cin, bf=bf, stride=stride)
    out = out2d.reshape(N, Ho, Wo, 2 * bf)      # already channel-shuffled
    return jnp.transpose(out, (0, 3, 1, 2))     # NHWC -> NCHW


# ---------------------------------------------------------------------------
# Deterministic parameter init (folded eval-mode BatchNorm)
# ---------------------------------------------------------------------------
def _fold_bn(gamma, beta, mean, var):
    scale = gamma / jnp.sqrt(var + BN_EPS)
    return scale, beta - mean * scale


def _bn_init(key, c):
    k1, k2, k3, k4 = jax.random.split(key, 4)
    gamma = jax.random.uniform(k1, (c,), jnp.float32, 0.5, 1.5)
    beta = 0.1 * jax.random.normal(k2, (c,), jnp.float32)
    mean = 0.1 * jax.random.normal(k3, (c,), jnp.float32)
    var = jax.random.uniform(k4, (c,), jnp.float32, 0.5, 1.5)
    return _fold_bn(gamma, beta, mean, var)


def init_params(key, inp, oup, stride):
    bf = oup // 2
    assert stride != 1 or inp == bf * 2
    keys = iter(jax.random.split(key, 16))
    params = {}
    if stride > 1:
        b1 = {}
        b1["dw_w"] = 0.2 * jax.random.normal(next(keys), (K, K, 1, inp), jnp.float32)
        b1["bn1_scale"], b1["bn1_bias"] = _bn_init(next(keys), inp)
        b1["pw_w"] = 0.2 * jax.random.normal(next(keys), (inp, bf), jnp.float32)
        b1["bn2_scale"], b1["bn2_bias"] = _bn_init(next(keys), bf)
        params["branch1"] = b1
    cin2 = inp if stride > 1 else bf
    b2 = {}
    b2["pw1_w"] = 0.2 * jax.random.normal(next(keys), (cin2, bf), jnp.float32)
    b2["bn1_scale"], b2["bn1_bias"] = _bn_init(next(keys), bf)
    b2["dw_w"] = 0.2 * jax.random.normal(next(keys), (K, K, 1, bf), jnp.float32)
    b2["bn2_scale"], b2["bn2_bias"] = _bn_init(next(keys), bf)
    b2["pw2_w"] = 0.2 * jax.random.normal(next(keys), (bf, bf), jnp.float32)
    b2["bn3_scale"], b2["bn3_bias"] = _bn_init(next(keys), bf)
    params["branch2"] = b2
    return params


# ---------------------------------------------------------------------------
# Pure-JAX reference (numerical sanity check of the fused Pallas kernels)
# ---------------------------------------------------------------------------
def _channel_shuffle_nhwc(x, groups):
    N, H, W, C = x.shape
    x = x.reshape(N, H, W, groups, C // groups)
    x = jnp.transpose(x, (0, 1, 2, 4, 3))
    return x.reshape(N, H, W, C)


def _ref_dw(x, w, scale, bias, stride):
    y = lax.conv_general_dilated(
        x, w, window_strides=(stride, stride), padding=((PAD, PAD), (PAD, PAD)),
        dimension_numbers=("NHWC", "HWIO", "NHWC"),
        feature_group_count=x.shape[-1])
    return y * scale + bias


def _ref_pw(x, w, scale, bias, relu):
    y = jnp.einsum("nhwc,cd->nhwd", x, w,
                   precision=lax.Precision.HIGHEST) * scale + bias
    return jnp.maximum(y, 0.0) if relu else y


def reference_forward(x_nchw, params, stride):
    x = jnp.transpose(x_nchw, (0, 2, 3, 1))

    def br2(z, p):
        z = _ref_pw(z, p["pw1_w"], p["bn1_scale"], p["bn1_bias"], True)
        z = _ref_dw(z, p["dw_w"], p["bn2_scale"], p["bn2_bias"], stride)
        z = _ref_pw(z, p["pw2_w"], p["bn3_scale"], p["bn3_bias"], True)
        return z

    if stride == 1:
        C = x.shape[-1]
        out = jnp.concatenate(
            [x[..., : C // 2], br2(x[..., C // 2:], params["branch2"])], axis=-1)
    else:
        p1 = params["branch1"]
        b1 = _ref_dw(x, p1["dw_w"], p1["bn1_scale"], p1["bn1_bias"], stride)
        b1 = _ref_pw(b1, p1["pw_w"], p1["bn2_scale"], p1["bn2_bias"], True)
        out = jnp.concatenate([b1, br2(x, params["branch2"])], axis=-1)
    out = _channel_shuffle_nhwc(out, 2)
    return jnp.transpose(out, (0, 3, 1, 2))


if __name__ == "__main__":
    key = jax.random.PRNGKey(0)
    kx, kp1, kp2 = jax.random.split(key, 3)

    # stride=1 block (requires inp == oup): batch=2, channels=4, spatial=16
    x = jax.random.normal(kx, (2, 4, 16, 16), jnp.float32)
    params1 = init_params(kp1, inp=4, oup=4, stride=1)
    out1 = jax.block_until_ready(inverted_residual(x, params1, stride=1))
    ref1 = reference_forward(x, params1, 1)
    assert out1.shape == (2, 4, 16, 16)
    assert bool(jnp.allclose(out1, ref1, atol=2e-2, rtol=2e-2))

    # stride=2 downsampling block: inp=4 -> oup=8, spatial 16 -> 8
    params2 = init_params(kp2, inp=4, oup=8, stride=2)
    out2 = jax.block_until_ready(inverted_residual(x, params2, stride=2))
    ref2 = reference_forward(x, params2, 2)
    assert out2.shape == (2, 8, 8, 8)
    assert bool(jnp.allclose(out2, ref2, atol=2e-2, rtol=2e-2))

    print("KERNEL_OK")
</pallas_src>

<mosaic_0001>
module attributes {stable_mosaic.version = 11 : i64} {
  func.func @_fused_kernel_s1(%arg0: i32, %arg1: memref<1x256x4xf32, #tpu.memory_space<vmem>>, %arg2: memref<2x2xf32, #tpu.memory_space<vmem>>, %arg3: memref<1x2xf32, #tpu.memory_space<vmem>>, %arg4: memref<25x1x2xf32, #tpu.memory_space<vmem>>, %arg5: memref<1x2xf32, #tpu.memory_space<vmem>>, %arg6: memref<2x4xf32, #tpu.memory_space<vmem>>, %arg7: memref<1x4xf32, #tpu.memory_space<vmem>>, %arg8: memref<2x4xf32, #tpu.memory_space<vmem>>, %arg9: memref<1x256x4xf32, #tpu.memory_space<vmem>>, %arg10: memref<20x26x2xf32, #tpu.memory_space<vmem>>) attributes {dimension_semantics = [#tpu.dimension_semantics<parallel>], iteration_bounds = array<i64: 2>, scalar_prefetch = 0 : i64, scratch_operands = 1 : i64, tpu.core_type = #tpu.core_type<tc>, window_params = [{transform_indices = @transform_0, window_bounds = array<i64: 1, 256, 4>}, {pipeline_mode = #tpu.pipeline_mode<synchronous>, transform_indices = @transform_1, window_bounds = array<i64: 2, 2>}, {pipeline_mode = #tpu.pipeline_mode<synchronous>, transform_indices = @transform_2, window_bounds = array<i64: 1, 2>}, {pipeline_mode = #tpu.pipeline_mode<synchronous>, transform_indices = @transform_3, window_bounds = array<i64: 25, 1, 2>}, {pipeline_mode = #tpu.pipeline_mode<synchronous>, transform_indices = @transform_4, window_bounds = array<i64: 1, 2>}, {pipeline_mode = #tpu.pipeline_mode<synchronous>, transform_indices = @transform_5, window_bounds = array<i64: 2, 4>}, {pipeline_mode = #tpu.pipeline_mode<synchronous>, transform_indices = @transform_6, window_bounds = array<i64: 1, 4>}, {pipeline_mode = #tpu.pipeline_mode<synchronous>, transform_indices = @transform_7, window_bounds = array<i64: 2, 4>}, {transform_indices = @transform_8, window_bounds = array<i64: 1, 256, 4>}]} {
    %cst = arith.constant 0.000000e+00 : f32
    %0 = vector.broadcast %cst : f32 to vector<2x26x2xf32>
    %c0 = arith.constant 0 : index
    %c0_0 = arith.constant 0 : index
    %c0_1 = arith.constant 0 : index
    %1 = vector.load %arg10[%c0, %c0_0, %c0_1] : memref<20x26x2xf32, #tpu.memory_space<vmem>>, vector<2x26x2xf32>
    tpu.vector_store %arg10[%c0, %c0_0, %c0_1], %0 {strides = array<i32>} : memref<20x26x2xf32, #tpu.memory_space<vmem>>, vector<2x26x2xf32>,
    %cst_2 = arith.constant 0.000000e+00 : f32
    %2 = vector.broadcast %cst_2 : f32 to vector<2x26x2xf32>
    %c18 = arith.constant 18 : index
    %c0_3 = arith.constant 0 : index
    %c0_4 = arith.constant 0 : index
    %3 = vector.load %arg10[%c18, %c0_3, %c0_4] : memref<20x26x2xf32, #tpu.memory_space<vmem>>, vector<2x26x2xf32>
    tpu.vector_store %arg10[%c18, %c0_3, %c0_4], %2 {strides = array<i32>} : memref<20x26x2xf32, #tpu.memory_space<vmem>>, vector<2x26x2xf32>,
    %cst_5 = arith.constant 0.000000e+00 : f32
    %4 = vector.broadcast %cst_5 : f32 to vector<20x2x2xf32>
    %c0_6 = arith.constant 0 : index
    %c6 = arith.constant 6 : index
    %c0_7 = arith.constant 0 : index
    %5 = vector.load %arg10[%c0_6, %c6, %c0_7] : memref<20x26x2xf32, #tpu.memory_space<vmem>>, vector<20x2x2xf32>
    tpu.vector_store %arg10[%c0_6, %c6, %c0_7], %4 {strides = array<i32>} : memref<20x26x2xf32, #tpu.memory_space<vmem>>, vector<20x2x2xf32>,
    %cst_8 = arith.constant 0.000000e+00 : f32
    %6 = vector.broadcast %cst_8 : f32 to vector<20x2x2xf32>
    %c0_9 = arith.constant 0 : index
    %c24 = arith.constant 24 : index
    %c0_10 = arith.constant 0 : index
    %7 = vector.load %arg10[%c0_9, %c24, %c0_10] : memref<20x26x2xf32, #tpu.memory_space<vmem>>, vector<20x2x2xf32>
    tpu.vector_store %arg10[%c0_9, %c24, %c0_10], %6 {strides = array<i32>} : memref<20x26x2xf32, #tpu.memory_space<vmem>>, vector<20x2x2xf32>,
    %c0_11 = arith.constant 0 : index
    %c0_12 = arith.constant 0 : index
    %c2 = arith.constant 2 : index
    %8 = vector.load %arg1[%c0_11, %c0_12, %c2] : memref<1x256x4xf32, #tpu.memory_space<vmem>>, vector<1x256x2xf32>
    %9 = vector.shape_cast %8 : vector<1x256x2xf32> to vector<256x2xf32>
    %c0_13 = arith.constant 0 : index
    %c0_14 = arith.constant 0 : index
    %10 = vector.load %arg2[%c0_13, %c0_14] : memref<2x2xf32, #tpu.memory_space<vmem>>, vector<2x2xf32>
    %cst_15 = arith.constant dense<0.000000e+00> : vector<256x2xf32>
    %11 = tpu.matmul %9, %10, %cst_15 {dimension_numbers = #tpu.dot_dimension_numbers<[1], [0], [0], [1], [0, 0, 1, 1], [], []>} : vector<256x2xf32>, vector<2x2xf32>, vector<256x2xf32> -> vector<256x2xf32>
    %c0_16 = arith.constant 0 : index
    %c0_17 = arith.constant 0 : index
    %12 = vector.load %arg3[%c0_16, %c0_17] : memref<1x2xf32, #tpu.memory_space<vmem>>, vector<1x2xf32>
    %13 = vector.broadcast %12 : vector<1x2xf32> to vector<256x2xf32>
    %14 = arith.addf %11, %13 : vector<256x2xf32>
    %cst_18 = arith.constant 0.000000e+00 : f32
    %15 = vector.broadcast %cst_18 : f32 to vector<256x2xf32>
    %16 = arith.maximumf %14, %15 : vector<256x2xf32>
    %17 = vector.shape_cast %16 : vector<256x2xf32> to vector<16x16x2xf32>
    %c2_19 = arith.constant 2 : index
    %c8 = arith.constant 8 : index
    %c0_20 = arith.constant 0 : index
    %18 = vector.load %arg10[%c2_19, %c8, %c0_20] : memref<20x26x2xf32, #tpu.memory_space<vmem>>, vector<16x16x2xf32>
    tpu.vector_store %arg10[%c2_19, %c8, %c0_20], %17 {strides = array<i32>} : memref<20x26x2xf32, #tpu.memory_space<vmem>>, vector<16x16x2xf32>,
    %c0_i32 = arith.constant 0 : i32
    %c2_i32 = arith.constant 2 : i32
    %19 = arith.addi %c0_i32, %c2_i32 : i32
    %c1_i32 = arith.constant 1 : i32
    scf.for %arg11 = %c0_i32 to %19 step %c1_i32  : i32 {
      %c8_i32 = arith.constant 8 : i32
      %20 = arith.muli %arg11, %c8_i32 : i32
      %cst_22 = arith.constant 0.000000e+00 : f32
      %21 = vector.broadcast %cst_22 : f32 to vector<8x16x2xf32>
      %c0_i32_23 = arith.constant 0 : i32
      %22 = arith.addi %20, %c0_i32_23 : i32
      %23 = arith.index_cast %22 : i32 to index
      %c6_24 = arith.constant 6 : index
      %c0_25 = arith.constant 0 : index
      %24 = vector.load %arg10[%23, %c6_24, %c0_25] : memref<20x26x2xf32, #tpu.memory_space<vmem>>, vector<8x16x2xf32>
      %c0_26 = arith.constant 0 : index
      %c0_27 = arith.constant 0 : index
      %c0_28 = arith.constant 0 : index
      %25 = vector.load %arg4[%c0_26, %c0_27, %c0_28] : memref<25x1x2xf32, #tpu.memory_space<vmem>>, vector<1x1x2xf32>
      %26 = vector.shape_cast %25 : vector<1x1x2xf32> to vector<1x2xf32>
      %27 = vector.shape_cast %26 : vector<1x2xf32> to vector<1x1x2xf32>
      %28 = vector.broadcast %27 : vector<1x1x2xf32> to vector<8x16x2xf32>
      %29 = arith.mulf %24, %28 : vector<8x16x2xf32>
      %30 = arith.addf %21, %29 : vector<8x16x2xf32>
      %c0_i32_29 = arith.constant 0 : i32
      %31 = arith.addi %20, %c0_i32_29 : i32
      %32 = arith.index_cast %31 : i32 to index
      %c7 = arith.constant 7 : index
      %c0_30 = arith.constant 0 : index
      %33 = vector.load %arg10[%32, %c7, %c0_30] : memref<20x26x2xf32, #tpu.memory_space<vmem>>, vector<8x16x2xf32>
      %c1 = arith.constant 1 : index
      %c0_31 = arith.constant 0 : index
      %c0_32 = arith.constant 0 : index
      %34 = vector.load %arg4[%c1, %c0_31, %c0_32] : memref<25x1x2xf32, #tpu.memory_space<vmem>>, vector<1x1x2xf32>
      %35 = vector.shape_cast %34 : vector<1x1x2xf32> to vector<1x2xf32>
      %36 = vector.shape_cast %35 : vector<1x2xf32> to vector<1x1x2xf32>
      %37 = vector.broadcast %36 : vector<1x1x2xf32> to vector<8x16x2xf32>
      %38 = arith.mulf %33, %37 : vector<8x16x2xf32>
      %39 = arith.addf %30, %38 : vector<8x16x2xf32>
      %c0_i32_33 = arith.constant 0 : i32
      %40 = arith.addi %20, %c0_i32_33 : i32
      %41 = arith.index_cast %40 : i32 to index
      %c8_34 = arith.constant 8 : index
      %c0_35 = arith.constant 0 : index
      %42 = vector.load %arg10[%41, %c8_34, %c0_35] : memref<20x26x2xf32, #tpu.memory_space<vmem>>, vector<8x16x2xf32>
      %c2_36 = arith.constant 2 : index
      %c0_37 = arith.constant 0 : index
      %c0_38 = arith.constant 0 : index
      %43 = vector.load %arg4[%c2_36, %c0_37, %c0_38] : memref<25x1x2xf32, #tpu.memory_space<vmem>>, vector<1x1x2xf32>
      %44 = vector.shape_cast %43 : vector<1x1x2xf32> to vector<1x2xf32>
      %45 = vector.shape_cast %44 : vector<1x2xf32> to vector<1x1x2xf32>
      %46 = vector.broadcast %45 : vector<1x1x2xf32> to vector<8x16x2xf32>
      %47 = arith.mulf %42, %46 : vector<8x16x2xf32>
      %48 = arith.addf %39, %47 : vector<8x16x2xf32>
      %c0_i32_39 = arith.constant 0 : i32
      %49 = arith.addi %20, %c0_i32_39 : i32
      %50 = arith.index_cast %49 : i32 to index
      %c9 = arith.constant 9 : index
      %c0_40 = arith.constant 0 : index
      %51 = vector.load %arg10[%50, %c9, %c0_40] : memref<20x26x2xf32, #tpu.memory_space<vmem>>, vector<8x16x2xf32>
      %c3 = arith.constant 3 : index
      %c0_41 = arith.constant 0 : index
      %c0_42 = arith.constant 0 : index
      %52 = vector.load %arg4[%c3, %c0_41, %c0_42] : memref<25x1x2xf32, #tpu.memory_space<vmem>>, vector<1x1x2xf32>
      %53 = vector.shape_cast %52 : vector<1x1x2xf32> to vector<1x2xf32>
      %54 = vector.shape_cast %53 : vector<1x2xf32> to vector<1x1x2xf32>
      %55 = vector.broadcast %54 : vector<1x1x2xf32> to vector<8x16x2xf32>
      %56 = arith.mulf %51, %55 : vector<8x16x2xf32>
      %57 = arith.addf %48, %56 : vector<8x16x2xf32>
      %c0_i32_43 = arith.constant 0 : i32
      %58 = arith.addi %20, %c0_i32_43 : i32
      %59 = arith.index_cast %58 : i32 to index
      %c10 = arith.constant 10 : index
      %c0_44 = arith.constant 0 : index
      %60 = vector.load %arg10[%59, %c10, %c0_44] : memref<20x26x2xf32, #tpu.memory_space<vmem>>, vector<8x16x2xf32>
      %c4 = arith.constant 4 : index
      %c0_45 = arith.constant 0 : index
      %c0_46 = arith.constant 0 : index
      %61 = vector.load %arg4[%c4, %c0_45, %c0_46] : memref<25x1x2xf32, #tpu.memory_space<vmem>>, vector<1x1x2xf32>
      %62 = vector.shape_cast %61 : vector<1x1x2xf32> to vector<1x2xf32>
      %63 = vector.shape_cast %62 : vector<1x2xf32> to vector<1x1x2xf32>
      %64 = vector.broadcast %63 : vector<1x1x2xf32> to vector<8x16x2xf32>
      %65 = arith.mulf %60, %64 : vector<8x16x2xf32>
      %66 = arith.addf %57, %65 : vector<8x16x2xf32>
      %c1_i32_47 = arith.constant 1 : i32
      %67 = arith.addi %20, %c1_i32_47 : i32
      %68 = arith.index_cast %67 : i32 to index
      %c6_48 = arith.constant 6 : index
      %c0_49 = arith.constant 0 : index
      %69 = vector.load %arg10[%68, %c6_48, %c0_49] : memref<20x26x2xf32, #tpu.memory_space<vmem>>, vector<8x16x2xf32>
      %c5 = arith.constant 5 : index
      %c0_50 = arith.constant 0 : index
      %c0_51 = arith.constant 0 : index
      %70 = vector.load %arg4[%c5, %c0_50, %c0_51] : memref<25x1x2xf32, #tpu.memory_space<vmem>>, vector<1x1x2xf32>
      %71 = vector.shape_cast %70 : vector<1x1x2xf32> to vector<1x2xf32>
      %72 = vector.shape_cast %71 : vector<1x2xf32> to vector<1x1x2xf32>
      %73 = vector.broadcast %72 : vector<1x1x2xf32> to vector<8x16x2xf32>
      %74 = arith.mulf %69, %73 : vector<8x16x2xf32>
      %75 = arith.addf %66, %74 : vector<8x16x2xf32>
      %c1_i32_52 = arith.constant 1 : i32
      %76 = arith.addi %20, %c1_i32_52 : i32
      %77 = arith.index_cast %76 : i32 to index
      %c7_53 = arith.constant 7 : index
      %c0_54 = arith.constant 0 : index
      %78 = vector.load %arg10[%77, %c7_53, %c0_54] : memref<20x26x2xf32, #tpu.memory_space<vmem>>, vector<8x16x2xf32>
      %c6_55 = arith.constant 6 : index
      %c0_56 = arith.constant 0 : index
      %c0_57 = arith.constant 0 : index
      %79 = vector.load %arg4[%c6_55, %c0_56, %c0_57] : memref<25x1x2xf32, #tpu.memory_space<vmem>>, vector<1x1x2xf32>
      %80 = vector.shape_cast %79 : vector<1x1x2xf32> to vector<1x2xf32>
      %81 = vector.shape_cast %80 : vector<1x2xf32> to vector<1x1x2xf32>
      %82 = vector.broadcast %81 : vector<1x1x2xf32> to vector<8x16x2xf32>
      %83 = arith.mulf %78, %82 : vector<8x16x2xf32>
      %84 = arith.addf %75, %83 : vector<8x16x2xf32>
      %c1_i32_58 = arith.constant 1 : i32
      %85 = arith.addi %20, %c1_i32_58 : i32
      %86 = arith.index_cast %85 : i32 to index
      %c8_59 = arith.constant 8 : index
      %c0_60 = arith.constant 0 : index
      %87 = vector.load %arg10[%86, %c8_59, %c0_60] : memref<20x26x2xf32, #tpu.memory_space<vmem>>, vector<8x16x2xf32>
      %c7_61 = arith.constant 7 : index
      %c0_62 = arith.constant 0 : index
      %c0_63 = arith.constant 0 : index
      %88 = vector.load %arg4[%c7_61, %c0_62, %c0_63] : memref<25x1x2xf32, #tpu.memory_space<vmem>>, vector<1x1x2xf32>
      %89 = vector.shape_cast %88 : vector<1x1x2xf32> to vector<1x2xf32>
      %90 = vector.shape_cast %89 : vector<1x2xf32> to vector<1x1x2xf32>
      %91 = vector.broadcast %90 : vector<1x1x2xf32> to vector<8x16x2xf32>
      %92 = arith.mulf %87, %91 : vector<8x16x2xf32>
      %93 = arith.addf %84, %92 : vector<8x16x2xf32>
      %c1_i32_64 = arith.constant 1 : i32
      %94 = arith.addi %20, %c1_i32_64 : i32
      %95 = arith.index_cast %94 : i32 to index
      %c9_65 = arith.constant 9 : index
      %c0_66 = arith.constant 0 : index
      %96 = vector.load %arg10[%95, %c9_65, %c0_66] : memref<20x26x2xf32, #tpu.memory_space<vmem>>, vector<8x16x2xf32>
      %c8_67 = arith.constant 8 : index
      %c0_68 = arith.constant 0 : index
      %c0_69 = arith.constant 0 : index
      %97 = vector.load %arg4[%c8_67, %c0_68, %c0_69] : memref<25x1x2xf32, #tpu.memory_space<vmem>>, vector<1x1x2xf32>
      %98 = vector.shape_cast %97 : vector<1x1x2xf32> to vector<1x2xf32>
      %99 = vector.shape_cast %98 : vector<1x2xf32> to vector<1x1x2xf32>
      %100 = vector.broadcast %99 : vector<1x1x2xf32> to vector<8x16x2xf32>
      %101 = arith.mulf %96, %100 : vector<8x16x2xf32>
      %102 = arith.addf %93, %101 : vector<8x16x2xf32>
      %c1_i32_70 = arith.constant 1 : i32
      %103 = arith.addi %20, %c1_i32_70 : i32
      %104 = arith.index_cast %103 : i32 to index
      %c10_71 = arith.constant 10 : index
      %c0_72 = arith.constant 0 : index
      %105 = vector.load %arg10[%104, %c10_71, %c0_72] : memref<20x26x2xf32, #tpu.memory_space<vmem>>, vector<8x16x2xf32>
      %c9_73 = arith.constant 9 : index
      %c0_74 = arith.constant 0 : index
      %c0_75 = arith.constant 0 : index
      %106 = vector.load %arg4[%c9_73, %c0_74, %c0_75] : memref<25x1x2xf32, #tpu.memory_space<vmem>>, vector<1x1x2xf32>
      %107 = vector.shape_cast %106 : vector<1x1x2xf32> to vector<1x2xf32>
      %108 = vector.shape_cast %107 : vector<1x2xf32> to vector<1x1x2xf32>
      %109 = vector.broadcast %108 : vector<1x1x2xf32> to vector<8x16x2xf32>
      %110 = arith.mulf %105, %109 : vector<8x16x2xf32>
      %111 = arith.addf %102, %110 : vector<8x16x2xf32>
      %c2_i32_76 = arith.constant 2 : i32
      %112 = arith.addi %20, %c2_i32_76 : i32
      %113 = arith.index_cast %112 : i32 to index
      %c6_77 = arith.constant 6 : index
      %c0_78 = arith.constant 0 : index
      %114 = vector.load %arg10[%113, %c6_77, %c0_78] : memref<20x26x2xf32, #tpu.memory_space<vmem>>, vector<8x16x2xf32>
      %c10_79 = arith.constant 10 : index
      %c0_80 = arith.constant 0 : index
      %c0_81 = arith.constant 0 : index
      %115 = vector.load %arg4[%c10_79, %c0_80, %c0_81] : memref<25x1x2xf32, #tpu.memory_space<vmem>>, vector<1x1x2xf32>
      %116 = vector.shape_cast %115 : vector<1x1x2xf32> to vector<1x2xf32>
      %117 = vector.shape_cast %116 : vector<1x2xf32> to vector<1x1x2xf32>
      %118 = vector.broadcast %117 : vector<1x1x2xf32> to vector<8x16x2xf32>
      %119 = arith.mulf %114, %118 : vector<8x16x2xf32>
      %120 = arith.addf %111, %119 : vector<8x16x2xf32>
      %c2_i32_82 = arith.constant 2 : i32
      %121 = arith.addi %20, %c2_i32_82 : i32
      %122 = arith.index_cast %121 : i32 to index
      %c7_83 = arith.constant 7 : index
      %c0_84 = arith.constant 0 : index
      %123 = vector.load %arg10[%122, %c7_83, %c0_84] : memref<20x26x2xf32, #tpu.memory_space<vmem>>, vector<8x16x2xf32>
      %c11 = arith.constant 11 : index
      %c0_85 = arith.constant 0 : index
      %c0_86 = arith.constant 0 : index
      %124 = vector.load %arg4[%c11, %c0_85, %c0_86] : memref<25x1x2xf32, #tpu.memory_space<vmem>>, vector<1x1x2xf32>
      %125 = vector.shape_cast %124 : vector<1x1x2xf32> to vector<1x2xf32>
      %126 = vector.shape_cast %125 : vector<1x2xf32> to vector<1x1x2xf32>
      %127 = vector.broadcast %126 : vector<1x1x2xf32> to vector<8x16x2xf32>
      %128 = arith.mulf %123, %127 : vector<8x16x2xf32>
      %129 = arith.addf %120, %128 : vector<8x16x2xf32>
      %c2_i32_87 = arith.constant 2 : i32
      %130 = arith.addi %20, %c2_i32_87 : i32
      %131 = arith.index_cast %130 : i32 to index
      %c8_88 = arith.constant 8 : index
      %c0_89 = arith.constant 0 : index
      %132 = vector.load %arg10[%131, %c8_88, %c0_89] : memref<20x26x2xf32, #tpu.memory_space<vmem>>, vector<8x16x2xf32>
      %c12 = arith.constant 12 : index
      %c0_90 = arith.constant 0 : index
      %c0_91 = arith.constant 0 : index
      %133 = vector.load %arg4[%c12, %c0_90, %c0_91] : memref<25x1x2xf32, #tpu.memory_space<vmem>>, vector<1x1x2xf32>
      %134 = vector.shape_cast %133 : vector<1x1x2xf32> to vector<1x2xf32>
      %135 = vector.shape_cast %134 : vector<1x2xf32> to vector<1x1x2xf32>
      %136 = vector.broadcast %135 : vector<1x1x2xf32> to vector<8x16x2xf32>
      %137 = arith.mulf %132, %136 : vector<8x16x2xf32>
      %138 = arith.addf %129, %137 : vector<8x16x2xf32>
      %c2_i32_92 = arith.constant 2 : i32
      %139 = arith.addi %20, %c2_i32_92 : i32
      %140 = arith.index_cast %139 : i32 to index
      %c9_93 = arith.constant 9 : index
      %c0_94 = arith.constant 0 : index
      %141 = vector.load %arg10[%140, %c9_93, %c0_94] : memref<20x26x2xf32, #tpu.memory_space<vmem>>, vector<8x16x2xf32>
      %c13 = arith.constant 13 : index
      %c0_95 = arith.constant 0 : index
      %c0_96 = arith.constant 0 : index
      %142 = vector.load %arg4[%c13, %c0_95, %c0_96] : memref<25x1x2xf32, #tpu.memory_space<vmem>>, vector<1x1x2xf32>
      %143 = vector.shape_cast %142 : vector<1x1x2xf32> to vector<1x2xf32>
      %144 = vector.shape_cast %143 : vector<1x2xf32> to vector<1x1x2xf32>
      %145 = vector.broadcast %144 : vector<1x1x2xf32> to vector<8x16x2xf32>
      %146 = arith.mulf %141, %145 : vector<8x16x2xf32>
      %147 = arith.addf %138, %146 : vector<8x16x2xf32>
      %c2_i32_97 = arith.constant 2 : i32
      %148 = arith.addi %20, %c2_i32_97 : i32
      %149 = arith.index_cast %148 : i32 to index
      %c10_98 = arith.constant 10 : index
      %c0_99 = arith.constant 0 : index
      %150 = vector.load %arg10[%149, %c10_98, %c0_99] : memref<20x26x2xf32, #tpu.memory_space<vmem>>, vector<8x16x2xf32>
      %c14 = arith.constant 14 : index
      %c0_100 = arith.constant 0 : index
      %c0_101 = arith.constant 0 : index
      %151 = vector.load %arg4[%c14, %c0_100, %c0_101] : memref<25x1x2xf32, #tpu.memory_space<vmem>>, vector<1x1x2xf32>
      %152 = vector.shape_cast %151 : vector<1x1x2xf32> to vector<1x2xf32>
      %153 = vector.shape_cast %152 : vector<1x2xf32> to vector<1x1x2xf32>
      %154 = vector.broadcast %153 : vector<1x1x2xf32> to vector<8x16x2xf32>
      %155 = arith.mulf %150, %154 : vector<8x16x2xf32>
      %156 = arith.addf %147, %155 : vector<8x16x2xf32>
      %c3_i32 = arith.constant 3 : i32
      %157 = arith.addi %20, %c3_i32 : i32
      %158 = arith.index_cast %157 : i32 to index
      %c6_102 = arith.constant 6 : index
      %c0_103 = arith.constant 0 : index
      %159 = vector.load %arg10[%158, %c6_102, %c0_103] : memref<20x26x2xf32, #tpu.memory_space<vmem>>, vector<8x16x2xf32>
      %c15 = arith.constant 15 : index
      %c0_104 = arith.constant 0 : index
      %c0_105 = arith.constant 0 : index
      %160 = vector.load %arg4[%c15, %c0_104, %c0_105] : memref<25x1x2xf32, #tpu.memory_space<vmem>>, vector<1x1x2xf32>
      %161 = vector.shape_cast %160 : vector<1x1x2xf32> to vector<1x2xf32>
      %162 = vector.shape_cast %161 : vector<1x2xf32> to vector<1x1x2xf32>
      %163 = vector.broadcast %162 : vector<1x1x2xf32> to vector<8x16x2xf32>
      %164 = arith.mulf %159, %163 : vector<8x16x2xf32>
      %165 = arith.addf %156, %164 : vector<8x16x2xf32>
      %c3_i32_106 = arith.constant 3 : i32
      %166 = arith.addi %20, %c3_i32_106 : i32
      %167 = arith.index_cast %166 : i32 to index
      %c7_107 = arith.constant 7 : index
      %c0_108 = arith.constant 0 : index
      %168 = vector.load %arg10[%167, %c7_107, %c0_108] : memref<20x26x2xf32, #tpu.memory_space<vmem>>, vector<8x16x2xf32>
      %c16 = arith.constant 16 : index
      %c0_109 = arith.constant 0 : index
      %c0_110 = arith.constant 0 : index
      %169 = vector.load %arg4[%c16, %c0_109, %c0_110] : memref<25x1x2xf32, #tpu.memory_space<vmem>>, vector<1x1x2xf32>
      %170 = vector.shape_cast %169 : vector<1x1x2xf32> to vector<1x2xf32>
      %171 = vector.shape_cast %170 : vector<1x2xf32> to vector<1x1x2xf32>
      %172 = vector.broadcast %171 : vector<1x1x2xf32> to vector<8x16x2xf32>
      %173 = arith.mulf %168, %172 : vector<8x16x2xf32>
      %174 = arith.addf %165, %173 : vector<8x16x2xf32>
      %c3_i32_111 = arith.constant 3 : i32
      %175 = arith.addi %20, %c3_i32_111 : i32
      %176 = arith.index_cast %175 : i32 to index
      %c8_112 = arith.constant 8 : index
      %c0_113 = arith.constant 0 : index
      %177 = vector.load %arg10[%176, %c8_112, %c0_113] : memref<20x26x2xf32, #tpu.memory_space<vmem>>, vector<8x16x2xf32>
      %c17 = arith.constant 17 : index
      %c0_114 = arith.constant 0 : index
      %c0_115 = arith.constant 0 : index
      %178 = vector.load %arg4[%c17, %c0_114, %c0_115] : memref<25x1x2xf32, #tpu.memory_space<vmem>>, vector<1x1x2xf32>
      %179 = vector.shape_cast %178 : vector<1x1x2xf32> to vector<1x2xf32>
      %180 = vector.shape_cast %179 : vector<1x2xf32> to vector<1x1x2xf32>
      %181 = vector.broadcast %180 : vector<1x1x2xf32> to vector<8x16x2xf32>
      %182 = arith.mulf %177, %181 : vector<8x16x2xf32>
      %183 = arith.addf %174, %182 : vector<8x16x2xf32>
      %c3_i32_116 = arith.constant 3 : i32
      %184 = arith.addi %20, %c3_i32_116 : i32
      %185 = arith.index_cast %184 : i32 to index
      %c9_117 = arith.constant 9 : index
      %c0_118 = arith.constant 0 : index
      %186 = vector.load %arg10[%185, %c9_117, %c0_118] : memref<20x26x2xf32, #tpu.memory_space<vmem>>, vector<8x16x2xf32>
      %c18_119 = arith.constant 18 : index
      %c0_120 = arith.constant 0 : index
      %c0_121 = arith.constant 0 : index
      %187 = vector.load %arg4[%c18_119, %c0_120, %c0_121] : memref<25x1x2xf32, #tpu.memory_space<vmem>>, vector<1x1x2xf32>
      %188 = vector.shape_cast %187 : vector<1x1x2xf32> to vector<1x2xf32>
      %189 = vector.shape_cast %188 : vector<1x2xf32> to vector<1x1x2xf32>
      %190 = vector.broadcast %189 : vector<1x1x2xf32> to vector<8x16x2xf32>
      %191 = arith.mulf %186, %190 : vector<8x16x2xf32>
      %192 = arith.addf %183, %191 : vector<8x16x2xf32>
      %c3_i32_122 = arith.constant 3 : i32
      %193 = arith.addi %20, %c3_i32_122 : i32
      %194 = arith.index_cast %193 : i32 to index
      %c10_123 = arith.constant 10 : index
      %c0_124 = arith.constant 0 : index
      %195 = vector.load %arg10[%194, %c10_123, %c0_124] : memref<20x26x2xf32, #tpu.memory_space<vmem>>, vector<8x16x2xf32>
      %c19 = arith.constant 19 : index
      %c0_125 = arith.constant 0 : index
      %c0_126 = arith.constant 0 : index
      %196 = vector.load %arg4[%c19, %c0_125, %c0_126] : memref<25x1x2xf32, #tpu.memory_space<vmem>>, vector<1x1x2xf32>
      %197 = vector.shape_cast %196 : vector<1x1x2xf32> to vector<1x2xf32>
      %198 = vector.shape_cast %197 : vector<1x2xf32> to vector<1x1x2xf32>
      %199 = vector.broadcast %198 : vector<1x1x2xf32> to vector<8x16x2xf32>
      %200 = arith.mulf %195, %199 : vector<8x16x2xf32>
      %201 = arith.addf %192, %200 : vector<8x16x2xf32>
      %c4_i32 = arith.constant 4 : i32
      %202 = arith.addi %20, %c4_i32 : i32
      %203 = arith.index_cast %202 : i32 to index
      %c6_127 = arith.constant 6 : index
      %c0_128 = arith.constant 0 : index
      %204 = vector.load %arg10[%203, %c6_127, %c0_128] : memref<20x26x2xf32, #tpu.memory_space<vmem>>, vector<8x16x2xf32>
      %c20 = arith.constant 20 : index
      %c0_129 = arith.constant 0 : index
      %c0_130 = arith.constant 0 : index
      %205 = vector.load %arg4[%c20, %c0_129, %c0_130] : memref<25x1x2xf32, #tpu.memory_space<vmem>>, vector<1x1x2xf32>
      %206 = vector.shape_cast %205 : vector<1x1x2xf32> to vector<1x2xf32>
      %207 = vector.shape_cast %206 : vector<1x2xf32> to vector<1x1x2xf32>
      %208 = vector.broadcast %207 : vector<1x1x2xf32> to vector<8x16x2xf32>
      %209 = arith.mulf %204, %208 : vector<8x16x2xf32>
      %210 = arith.addf %201, %209 : vector<8x16x2xf32>
      %c4_i32_131 = arith.constant 4 : i32
      %211 = arith.addi %20, %c4_i32_131 : i32
      %212 = arith.index_cast %211 : i32 to index
      %c7_132 = arith.constant 7 : index
      %c0_133 = arith.constant 0 : index
      %213 = vector.load %arg10[%212, %c7_132, %c0_133] : memref<20x26x2xf32, #tpu.memory_space<vmem>>, vector<8x16x2xf32>
      %c21 = arith.constant 21 : index
      %c0_134 = arith.constant 0 : index
      %c0_135 = arith.constant 0 : index
      %214 = vector.load %arg4[%c21, %c0_134, %c0_135] : memref<25x1x2xf32, #tpu.memory_space<vmem>>, vector<1x1x2xf32>
      %215 = vector.shape_cast %214 : vector<1x1x2xf32> to vector<1x2xf32>
      %216 = vector.shape_cast %215 : vector<1x2xf32> to vector<1x1x2xf32>
      %217 = vector.broadcast %216 : vector<1x1x2xf32> to vector<8x16x2xf32>
      %218 = arith.mulf %213, %217 : vector<8x16x2xf32>
      %219 = arith.addf %210, %218 : vector<8x16x2xf32>
      %c4_i32_136 = arith.constant 4 : i32
      %220 = arith.addi %20, %c4_i32_136 : i32
      %221 = arith.index_cast %220 : i32 to index
      %c8_137 = arith.constant 8 : index
      %c0_138 = arith.constant 0 : index
      %222 = vector.load %arg10[%221, %c8_137, %c0_138] : memref<20x26x2xf32, #tpu.memory_space<vmem>>, vector<8x16x2xf32>
      %c22 = arith.constant 22 : index
      %c0_139 = arith.constant 0 : index
      %c0_140 = arith.constant 0 : index
      %223 = vector.load %arg4[%c22, %c0_139, %c0_140] : memref<25x1x2xf32, #tpu.memory_space<vmem>>, vector<1x1x2xf32>
      %224 = vector.shape_cast %223 : vector<1x1x2xf32> to vector<1x2xf32>
      %225 = vector.shape_cast %224 : vector<1x2xf32> to vector<1x1x2xf32>
      %226 = vector.broadcast %225 : vector<1x1x2xf32> to vector<8x16x2xf32>
      %227 = arith.mulf %222, %226 : vector<8x16x2xf32>
      %228 = arith.addf %219, %227 : vector<8x16x2xf32>
      %c4_i32_141 = arith.constant 4 : i32
      %229 = arith.addi %20, %c4_i32_141 : i32
      %230 = arith.index_cast %229 : i32 to index
      %c9_142 = arith.constant 9 : index
      %c0_143 = arith.constant 0 : index
      %231 = vector.load %arg10[%230, %c9_142, %c0_143] : memref<20x26x2xf32, #tpu.memory_space<vmem>>, vector<8x16x2xf32>
      %c23 = arith.constant 23 : index
      %c0_144 = arith.constant 0 : index
      %c0_145 = arith.constant 0 : index
      %232 = vector.load %arg4[%c23, %c0_144, %c0_145] : memref<25x1x2xf32, #tpu.memory_space<vmem>>, vector<1x1x2xf32>
      %233 = vector.shape_cast %232 : vector<1x1x2xf32> to vector<1x2xf32>
      %234 = vector.shape_cast %233 : vector<1x2xf32> to vector<1x1x2xf32>
      %235 = vector.broadcast %234 : vector<1x1x2xf32> to vector<8x16x2xf32>
      %236 = arith.mulf %231, %235 : vector<8x16x2xf32>
      %237 = arith.addf %228, %236 : vector<8x16x2xf32>
      %c4_i32_146 = arith.constant 4 : i32
      %238 = arith.addi %20, %c4_i32_146 : i32
      %239 = arith.index_cast %238 : i32 to index
      %c10_147 = arith.constant 10 : index
      %c0_148 = arith.constant 0 : index
      %240 = vector.load %arg10[%239, %c10_147, %c0_148] : memref<20x26x2xf32, #tpu.memory_space<vmem>>, vector<8x16x2xf32>
      %c24_149 = arith.constant 24 : index
      %c0_150 = arith.constant 0 : index
      %c0_151 = arith.constant 0 : index
      %241 = vector.load %arg4[%c24_149, %c0_150, %c0_151] : memref<25x1x2xf32, #tpu.memory_space<vmem>>, vector<1x1x2xf32>
      %242 = vector.shape_cast %241 : vector<1x1x2xf32> to vector<1x2xf32>
      %243 = vector.shape_cast %242 : vector<1x2xf32> to vector<1x1x2xf32>
      %244 = vector.broadcast %243 : vector<1x1x2xf32> to vector<8x16x2xf32>
      %245 = arith.mulf %240, %244 : vector<8x16x2xf32>
      %246 = arith.addf %237, %245 : vector<8x16x2xf32>
      %c0_152 = arith.constant 0 : index
      %c0_153 = arith.constant 0 : index
      %247 = vector.load %arg5[%c0_152, %c0_153] : memref<1x2xf32, #tpu.memory_space<vmem>>, vector<1x2xf32>
      %248 = vector.shape_cast %247 : vector<1x2xf32> to vector<1x1x2xf32>
      %249 = vector.broadcast %248 : vector<1x1x2xf32> to vector<8x16x2xf32>
      %250 = arith.addf %246, %249 : vector<8x16x2xf32>
      %251 = vector.shape_cast %250 : vector<8x16x2xf32> to vector<128x2xf32>
      %c0_154 = arith.constant 0 : index
      %c0_155 = arith.constant 0 : index
      %252 = vector.load %arg6[%c0_154, %c0_155] : memref<2x4xf32, #tpu.memory_space<vmem>>, vector<2x4xf32>
      %cst_156 = arith.constant dense<0.000000e+00> : vector<128x4xf32>
      %253 = tpu.matmul %251, %252, %cst_156 {dimension_numbers = #tpu.dot_dimension_numbers<[1], [0], [0], [1], [0, 0, 1, 1], [], []>} : vector<128x2xf32>, vector<2x4xf32>, vector<128x4xf32> -> vector<128x4xf32>
      %c0_157 = arith.constant 0 : index
      %c0_158 = arith.constant 0 : index
      %254 = vector.load %arg7[%c0_157, %c0_158] : memref<1x4xf32, #tpu.memory_space<vmem>>, vector<1x4xf32>
      %255 = vector.broadcast %254 : vector<1x4xf32> to vector<128x4xf32>
      %256 = arith.addf %253, %255 : vector<128x4xf32>
      %cst_159 = arith.constant 0.000000e+00 : f32
      %257 = vector.broadcast %cst_159 : f32 to vector<128x4xf32>
      %258 = arith.maximumf %256, %257 : vector<128x4xf32>
      %c16_i32 = arith.constant 16 : i32
      %259 = arith.muli %20, %c16_i32 : i32
      %260 = tpu.assume_multiple %259, 128 : i32
      %c0_160 = arith.constant 0 : index
      %261 = arith.index_cast %260 : i32 to index
      %c0_161 = arith.constant 0 : index
      %262 = vector.load %arg1[%c0_160, %261, %c0_161] : memref<1x256x4xf32, #tpu.memory_space<vmem>>, vector<1x128x2xf32>
      %263 = vector.shape_cast %262 : vector<1x128x2xf32> to vector<128x2xf32>
      %c0_162 = arith.constant 0 : index
      %c0_163 = arith.constant 0 : index
      %264 = vector.load %arg8[%c0_162, %c0_163] : memref<2x4xf32, #tpu.memory_space<vmem>>, vector<2x4xf32>
      %cst_164 = arith.constant dense<0.000000e+00> : vector<128x4xf32>
      %265 = tpu.matmul %263, %264, %cst_164 {dimension_numbers = #tpu.dot_dimension_numbers<[1], [0], [0], [1], [0, 0, 1, 1], [], []>} : vector<128x2xf32>, vector<2x4xf32>, vector<128x4xf32> -> vector<128x4xf32>
      %266 = arith.addf %258, %265 : vector<128x4xf32>
      %c0_165 = arith.constant 0 : index
      %267 = arith.index_cast %260 : i32 to index
      %c0_166 = arith.constant 0 : index
      %268 = vector.load %arg9[%c0_165, %267, %c0_166] : memref<1x256x4xf32, #tpu.memory_space<vmem>>, vector<1x128x4xf32>
      %269 = vector.shape_cast %268 : vector<1x128x4xf32> to vector<128x4xf32>
      %270 = vector.shape_cast %266 : vector<128x4xf32> to vector<1x128x4xf32>
      tpu.vector_store %arg9[%c0_165, %267, %c0_166], %270 {strides = array<i32>} : memref<1x256x4xf32, #tpu.memory_space<vmem>>, vector<1x128x4xf32>,
    }
    %c2_i32_21 = arith.constant 2 : i32
    return
  }
  func.func @transform_0(%arg0: i32) -> (i32, i32, i32) {
    %c0_i32 = arith.constant 0 : i32
    %c0_i32_0 = arith.constant 0 : i32
    %c0_i32_1 = arith.constant 0 : i32
    return %arg0, %c0_i32, %c0_i32_0 : i32, i32, i32
  }
  func.func @transform_1(%arg0: i32) -> (i32, i32) {
    %c0_i32 = arith.constant 0 : i32
    %c0_i32_0 = arith.constant 0 : i32
    %c0_i32_1 = arith.constant 0 : i32
    return %c0_i32, %c0_i32_0 : i32, i32
  }
  func.func @transform_2(%arg0: i32) -> (i32, i32) {
    %c0_i32 = arith.constant 0 : i32
    %c0_i32_0 = arith.constant 0 : i32
    %c0_i32_1 = arith.constant 0 : i32
    return %c0_i32, %c0_i32_0 : i32, i32
  }
  func.func @transform_3(%arg0: i32) -> (i32, i32, i32) {
    %c0_i32 = arith.constant 0 : i32
    %c0_i32_0 = arith.constant 0 : i32
    %c0_i32_1 = arith.constant 0 : i32
    %c0_i32_2 = arith.constant 0 : i32
    return %c0_i32, %c0_i32_0, %c0_i32_1 : i32, i32, i32
  }
  func.func @transform_4(%arg0: i32) -> (i32, i32) {
    %c0_i32 = arith.constant 0 : i32
    %c0_i32_0 = arith.constant 0 : i32
    %c0_i32_1 = arith.constant 0 : i32
    return %c0_i32, %c0_i32_0 : i32, i32
  }
  func.func @transform_5(%arg0: i32) -> (i32, i32) {
    %c0_i32 = arith.constant 0 : i32
    %c0_i32_0 = arith.constant 0 : i32
    %c0_i32_1 = arith.constant 0 : i32
    return %c0_i32, %c0_i32_0 : i32, i32
  }
  func.func @transform_6(%arg0: i32) -> (i32, i32) {
    %c0_i32 = arith.constant 0 : i32
    %c0_i32_0 = arith.constant 0 : i32
    %c0_i32_1 = arith.constant 0 : i32
    return %c0_i32, %c0_i32_0 : i32, i32
  }
  func.func @transform_7(%arg0: i32) -> (i32, i32) {
    %c0_i32 = arith.constant 0 : i32
    %c0_i32_0 = arith.constant 0 : i32
    %c0_i32_1 = arith.constant 0 : i32
    return %c0_i32, %c0_i32_0 : i32, i32
  }
  func.func @transform_8(%arg0: i32) -> (i32, i32, i32) {
    %c0_i32 = arith.constant 0 : i32
    %c0_i32_0 = arith.constant 0 : i32
    %c0_i32_1 = arith.constant 0 : i32
    return %arg0, %c0_i32, %c0_i32_0 : i32, i32, i32
  }
}

</mosaic_0001>

<bundles_post_ra>
// kernel: tpu_custom_call.1
= control target key start
LH: loop header
LB: loop body
LE: loop exit
PB: predicated region body
PF: predicated region fallthrough
CT: control target
= control target key end

     0   :  { %s3077_s27 = smov 0   ;;  %s5169_s0 = inlined_call_operand.vmem [shape: f32[2,256,4], index: 0, kind: input, shape index: {}]   ;;  %s5170_s1 = inlined_call_operand.vmem [shape: f32[2,2], index: 1, kind: input, shape index: {}]   ;;  %s5171_s2 = inlined_call_operand.vmem [shape: f32[1,2], index: 2, kind: input, shape index: {}]   ;;  %s5172_s3 = inlined_call_operand.vmem [shape: f32[25,1,2], index: 3, kind: input, shape index: {}]   ;;  %s5173_s4 = inlined_call_operand.vmem [shape: f32[1,2], index: 4, kind: input, shape index: {}]   ;;  %s5174_s5 = inlined_call_operand.vmem [shape: f32[2,4], index: 5, kind: input, shape index: {}]   ;;  %s5175_s6 = inlined_call_operand.vmem [shape: f32[1,4], index: 6, kind: input, shape index: {}]   ;;  %s5176_s7 = inlined_call_operand.vmem [shape: f32[2,4], index: 7, kind: input, shape index: {}]   ;;  %s5177_s8 = inlined_call_operand.vmem [shape: f32[2,256,4], index: 8, kind: output, shape index: {}]  }
   0x1 LB: > { %s2497_s28 = sadd.s32 4294967295, %s3024_s27   ;;  %p2501_p0 = scmp.ge.s32.totalorder %s3024_s27, 1  ;;  %s3024_s27 = sphi %s3077_s27, %s18_s27  }
   0x2   : > { %p262_p1 = scmp.lt.s32.totalorder %s3024_s27, 3 }
   0x4   : > { %p263_p2 = pnand %p2501_p0, %p262_p1 }
   0x5   : > { %p296_p3 = scmp.lt.s32.totalorder (!%p263_p2), %s2497_s28, 1  ;;  %s3030_s14 = smov (!%p263_p2), 126  }
   0x6   : > { %266 = sbr.rel (%p263_p2) target bundleno = 747 (0x2eb), region = 52  ;;  %s3379_s19 = smov (!%p263_p2), 0  }
   0xb   : > { %s5659_s28 = smov (!%p296_p3, %s2497_s28), 1  ;;  %vm310_vm0 = vcmask 9216   ;;  %v3031_v21 = vmov 0.0   ;;  %v397_v25 = vld [vmem:[%s5170_s1] sm:$0x3]  ;;  %vm562_vm1 = vcmask 1041408  }
   0xc   : > { %s2930_s29 = sshll.u32 %s5659_s28, 8  ;;  %311 = vst.msk [vmem:[#allocation2 + $0x18] sm:$0x3] %vm310_vm0, %v3031_v21  ;;  %2506 = vmatpush.msk.msra.mxu0 %vm562_vm1, %v397_v25  ;;  %2938 = vmatpush.msk.msra.mxu2 %vm562_vm1, %v397_v25  ;;  %vm306_vm2 = vcmask 15360  }
   0xd   : > { %s3088_s10 = scalar_lea.vmem %s5169_s0, %s2930_s29  ;;  %s3093_s13 = scalar_lea.vmem %s5177_s8, %s2930_s29  ;;  %315 = vst.msk [vmem:[#allocation2 + $0x38] sm:$0x3] %vm310_vm0, %v3031_v21  ;;  %2937 = vmatpush.msk.msra.mxu1 %vm562_vm1, %v397_v25  ;;  %2939 = vmatpush.msk.msra.mxu3 %vm562_vm1, %v397_v25 }
   0xe   : > { %v381_v0 = vld [vmem:[%s3088_s10 + $0x80] sm:$0xff]  ;;  %v382_v2 = vld [vmem:[%s3088_s10 + $0x88] sm:$0xff]  ;;  %v383_v8 = vld [vmem:[%s3088_s10 + $0x90] sm:$0xff]  ;;  %320 = vst.msk [vmem:[#allocation2 + $0x258] sm:$0x3] %vm310_vm0, %v3031_v21 }
   0xf   : > { %v365_v1 = vld [vmem:[%s3088_s10] sm:$0xff]  ;;  %466 = vrot.lane.b32.xlu0 %v381_v0, %s3030_s14  ;;  %468 = vrot.lane.b32.xlu2 %v382_v2, %s3030_s14  ;;  %v390_v5 = vld [vmem:[%s3088_s10 + $0xc8] sm:$0xff]  ;;  %324 = vst.msk [vmem:[#allocation2 + $0x278] sm:$0x3] %vm310_vm0, %v3031_v21 }
  0x10   : > { %434 = vrot.lane.b32.xlu1 %v365_v1, %s3030_s14  ;;  %v389_v3 = vld [vmem:[%s3088_s10 + $0xc0] sm:$0xff]  ;;  %v366_v6 = vld [vmem:[%s3088_s10 + $0x8] sm:$0xff]  ;;  %v391_v9 = vld [vmem:[%s3088_s10 + $0xd0] sm:$0xff]  ;;  %327 = vst.msk [vmem:[#allocation2 + $0x46] sm:$0x3] %vm310_vm0, %v3031_v21 }
  0x11   : > { %v373_v4 = vld [vmem:[%s3088_s10 + $0x40] sm:$0xff]  ;;  %v374_v7 = vld [vmem:[%s3088_s10 + $0x48] sm:$0xff]  ;;  %v367_v10 = vld [vmem:[%s3088_s10 + $0x10] sm:$0xff]  ;;  %328 = vst.msk [vmem:[#allocation2 + $0x66] sm:$0x3] %vm310_vm0, %v3031_v21 }
  0x12   : > { %v375_v11 = vld [vmem:[%s3088_s10 + $0x50] sm:$0xff]  ;;  %v384_v12 = vld [vmem:[%s3088_s10 + $0x98] sm:$0xff]  ;;  %v385_v16 = vld [vmem:[%s3088_s10 + $0xa0] sm:$0xff]  ;;  %329 = vst.msk [vmem:[#allocation2 + $0x86] sm:$0x3] %vm310_vm0, %v3031_v21 }
  0x13   : > { %v392_v13 = vld [vmem:[%s3088_s10 + $0xd8] sm:$0xff]  ;;  %v393_v17 = vld [vmem:[%s3088_s10 + $0xe0] sm:$0xff]  ;;  %v386_v20 = vld [vmem:[%s3088_s10 + $0xa8] sm:$0xff]  ;;  %330 = vst.msk [vmem:[#allocation2 + $0xa6] sm:$0x3] %vm310_vm0, %v3031_v21 }
  0x14   : > { %v368_v14 = vld [vmem:[%s3088_s10 + $0x18] sm:$0xff]  ;;  %v369_v18 = vld [vmem:[%s3088_s10 + $0x20] sm:$0xff]  ;;  %v394_v22 = vld [vmem:[%s3088_s10 + $0xe8] sm:$0xff]  ;;  %331 = vst.msk [vmem:[#allocation2 + $0xc6] sm:$0x3] %vm310_vm0, %v3031_v21 }
  0x15   : > { %v376_v15 = vld [vmem:[%s3088_s10 + $0x58] sm:$0xff]  ;;  %v377_v19 = vld [vmem:[%s3088_s10 + $0x60] sm:$0xff]  ;;  %v370_v23 = vld [vmem:[%s3088_s10 + $0x28] sm:$0xff]  ;;  %332 = vst.msk [vmem:[#allocation2 + $0xe6] sm:$0x3] %vm310_vm0, %v3031_v21 }
  0x16   : > { %v378_v24 = vld [vmem:[%s3088_s10 + $0x68] sm:$0xff]  ;;  %333 = vst.msk [vmem:[#allocation2 + $0x106] sm:$0x3] %vm310_vm0, %v3031_v21  ;;  %v387_v26 = vld [vmem:[%s3088_s10 + $0xb0] sm:$0xff]  ;;  %v388_v30 = vld [vmem:[%s3088_s10 + $0xb8] sm:$0xff] }
  0x17   : > { %482 = vrot.lane.b32.xlu0 %v389_v3, %s3030_s14  ;;  %484 = vrot.lane.b32.xlu2 %v390_v5, %s3030_s14  ;;  %334 = vst.msk [vmem:[#allocation2 + $0x126] sm:$0x3] %vm310_vm0, %v3031_v21  ;;  %v395_v27 = vld [vmem:[%s3088_s10 + $0xf0] sm:$0xff]  ;;  %v396_v31 = vld [vmem:[%s3088_s10 + $0xf8] sm:$0xff] }
  0x18   : > { %450 = vrot.lane.b32.xlu1 %v373_v4, %s3030_s14  ;;  %335 = vst.msk [vmem:[#allocation2 + $0x146] sm:$0x3] %vm310_vm0, %v3031_v21  ;;  %v371_v28 = vld [vmem:[%s3088_s10 + $0x30] sm:$0xff]  ;;  %v372_v32 = vld [vmem:[%s3088_s10 + $0x38] sm:$0xff]  ;;  %v3313_v2 = vld [vmem:[%s5171_s2] ss:$0 sm:$0xff] }
  0x19   : > { %336 = vst.msk [vmem:[#allocation2 + $0x166] sm:$0x3] %vm310_vm0, %v3031_v21  ;;  %v379_v29 = vld [vmem:[%s3088_s10 + $0x70] sm:$0xff]  ;;  %v380_v33 = vld [vmem:[%s3088_s10 + $0x78] sm:$0xff] }
  0x1a   : > { %337 = vst.msk [vmem:[#allocation2 + $0x186] sm:$0x3] %vm310_vm0, %v3031_v21 }
  0x1b   : > { %338 = vst.msk [vmem:[#allocation2 + $0x1a6] sm:$0x3] %vm310_vm0, %v3031_v21 }
  0x1c   : > { %339 = vst.msk [vmem:[#allocation2 + $0x1c6] sm:$0x3] %vm310_vm0, %v3031_v21 }
  0x1d   : > { %340 = vst.msk [vmem:[#allocation2 + $0x1e6] sm:$0x3] %vm310_vm0, %v3031_v21 }
  0x1e   : > { %341 = vst.msk [vmem:[#allocation2 + $0x206] sm:$0x3] %vm310_vm0, %v3031_v21 }
  0x1f   : > { %436 = vrot.lane.b32.xlu0 %v366_v6, %s3030_s14  ;;  %470 = vrot.lane.b32.xlu2 %v383_v8, %s3030_s14  ;;  %342 = vst.msk [vmem:[#allocation2 + $0x226] sm:$0x3] %vm310_vm0, %v3031_v21 }
  0x20   : > { %452 = vrot.lane.b32.xlu1 %v374_v7, %s3030_s14  ;;  %345 = vst.msk [vmem:[#allocation2 + $0x18] sm:$0x3] %vm310_vm0, %v3031_v21 }
  0x21   : > { %346 = vst.msk [vmem:[#allocation2 + $0x38] sm:$0x3] %vm310_vm0, %v3031_v21 }
  0x22   : > { %347 = vst.msk [vmem:[#allocation2 + $0x58] sm:$0x3] %vm310_vm0, %v3031_v21 }
  0x23   : > { %348 = vst.msk [vmem:[#allocation2 + $0x78] sm:$0x3] %vm310_vm0, %v3031_v21 }
  0x24   : > { %349 = vst.msk [vmem:[#allocation2 + $0x98] sm:$0x3] %vm310_vm0, %v3031_v21 }
  0x25   : > { %350 = vst.msk [vmem:[#allocation2 + $0xb8] sm:$0x3] %vm310_vm0, %v3031_v21 }
  0x26   : > { %351 = vst.msk [vmem:[#allocation2 + $0xd8] sm:$0x3] %vm310_vm0, %v3031_v21 }
  0x27   : > { %486 = vrot.lane.b32.xlu0 %v391_v9, %s3030_s14  ;;  %454 = vrot.lane.b32.xlu2 %v375_v11, %s3030_s14  ;;  %352 = vst.msk [vmem:[#allocation2 + $0xf8] sm:$0x3] %vm310_vm0, %v3031_v21 }
  0x28   : > { %438 = vrot.lane.b32.xlu1 %v367_v10, %s3030_s14  ;;  %353 = vst.msk [vmem:[#allocation2 + $0x118] sm:$0x3] %vm310_vm0, %v3031_v21 }
  0x29   : > { %354 = vst.msk [vmem:[#allocation2 + $0x138] sm:$0x3] %vm310_vm0, %v3031_v21 }
  0x2a   : > { %355 = vst.msk [vmem:[#allocation2 + $0x158] sm:$0x3] %vm310_vm0, %v3031_v21 }
  0x2b   : > { %356 = vst.msk [vmem:[#allocation2 + $0x178] sm:$0x3] %vm310_vm0, %v3031_v21 }
  0x2c   : > { %357 = vst.msk [vmem:[#allocation2 + $0x198] sm:$0x3] %vm310_vm0, %v3031_v21 }
  0x2d   : > { %358 = vst.msk [vmem:[#allocation2 + $0x1b8] sm:$0x3] %vm310_vm0, %v3031_v21 }
  0x2e   : > { %359 = vst.msk [vmem:[#allocation2 + $0x1d8] sm:$0x3] %vm310_vm0, %v3031_v21 }
  0x2f   : > { %472 = vrot.lane.b32.xlu0 %v384_v12, %s3030_s14  ;;  %440 = vrot.lane.b32.xlu2 %v368_v14, %s3030_s14  ;;  %360 = vst.msk [vmem:[#allocation2 + $0x1f8] sm:$0x3] %vm310_vm0, %v3031_v21 }
  0x30   : > { %488 = vrot.lane.b32.xlu1 %v392_v13, %s3030_s14  ;;  %361 = vst.msk [vmem:[#allocation2 + $0x218] sm:$0x3] %vm310_vm0, %v3031_v21 }
  0x31   : > { %362 = vst.msk [vmem:[#allocation2 + $0x238] sm:$0x3] %vm310_vm0, %v3031_v21 }
  0x32   : > { %363 = vst.msk [vmem:[#allocation2 + $0x258] sm:$0x3] %vm310_vm0, %v3031_v21 }
  0x33   : > { %364 = vst.msk [vmem:[#allocation2 + $0x278] sm:$0x3] %vm310_vm0, %v3031_v21 }
  0x34   : > { %307 = vst.msk [vmem:[#allocation2] sm:$0xff] %vm306_vm2, %v3031_v21 }
  0x35   : > { %308 = vst.msk [vmem:[#allocation2 + $0x8] sm:$0xff] %vm306_vm2, %v3031_v21 }
  0x36   : > { %309 = vst.msk [vmem:[#allocation2 + $0x10] sm:$0xff] %vm306_vm2, %v3031_v21 }
  0x37   : > { %456 = vrot.lane.b32.xlu0 %v376_v15, %s3030_s14  ;;  %490 = vrot.lane.b32.xlu2 %v393_v17, %s3030_s14  ;;  %312 = vst.msk [vmem:[#allocation2 + $0x20] sm:$0xff] %vm306_vm2, %v3031_v21 }
  0x38   : > { %474 = vrot.lane.b32.xlu1 %v385_v16, %s3030_s14  ;;  %313 = vst.msk [vmem:[#allocation2 + $0x28] sm:$0xff] %vm306_vm2, %v3031_v21 }
  0x39   : > { %314 = vst.msk [vmem:[#allocation2 + $0x30] sm:$0xff] %vm306_vm2, %v3031_v21 }
  0x3a   : > { %317 = vst.msk [vmem:[#allocation2 + $0x240] sm:$0xff] %vm306_vm2, %v3031_v21 }
  0x3b   : > { %318 = vst.msk [vmem:[#allocation2 + $0x248] sm:$0xff] %vm306_vm2, %v3031_v21 }
  0x3c   : > { %319 = vst.msk [vmem:[#allocation2 + $0x250] sm:$0xff] %vm306_vm2, %v3031_v21 }
  0x3d   : > { %321 = vst.msk [vmem:[#allocation2 + $0x260] sm:$0xff] %vm306_vm2, %v3031_v21 }
  0x3e   : > { %322 = vst.msk [vmem:[#allocation2 + $0x268] sm:$0xff] %vm306_vm2, %v3031_v21 }
  0x3f   : > { %442 = vrot.lane.b32.xlu0 %v369_v18, %s3030_s14  ;;  %476 = vrot.lane.b32.xlu2 %v386_v20, %s3030_s14  ;;  %323 = vst.msk [vmem:[#allocation2 + $0x270] sm:$0xff] %vm306_vm2, %v3031_v21 }
  0x40   : > { %458 = vrot.lane.b32.xlu1 %v377_v19, %s3030_s14  ;;  %325 = vst.msk [vmem:[#allocation2 + $0x6] sm:$0x3] %vm310_vm0, %v3031_v21 }
  0x41   : > { %326 = vst.msk [vmem:[#allocation2 + $0x26] sm:$0x3] %vm310_vm0, %v3031_v21 }
  0x42   : > { %343 = vst.msk [vmem:[#allocation2 + $0x246] sm:$0x3] %vm310_vm0, %v3031_v21 }
  0x43   : > { %344 = vst.msk [vmem:[#allocation2 + $0x266] sm:$0x3] %vm310_vm0, %v3031_v21 }
  0x47   : > { %492 = vrot.lane.b32.xlu0 %v394_v22, %s3030_s14  ;;  %460 = vrot.lane.b32.xlu2 %v378_v24, %s3030_s14 }
  0x48   : > { %444 = vrot.lane.b32.xlu1 %v370_v23, %s3030_s14 }
  0x4f   : > { %478 = vrot.lane.b32.xlu0 %v387_v26, %s3030_s14  ;;  %446 = vrot.lane.b32.xlu2 %v371_v28, %s3030_s14 }
  0x50   : > { %494 = vrot.lane.b32.xlu1 %v395_v27, %s3030_s14 }
  0x57   : > { %462 = vrot.lane.b32.xlu0 %v379_v29, %s3030_s14  ;;  %496 = vrot.lane.b32.xlu2 %v396_v31, %s3030_s14 }
  0x58   : > { %480 = vrot.lane.b32.xlu1 %v388_v30, %s3030_s14 }
  0x5f   : > { %448 = vrot.lane.b32.xlu0 %v372_v32, %s3030_s14 }
  0x60   : > { %464 = vrot.lane.b32.xlu1 %v380_v33, %s3030_s14 }
  0x69   : > { %v469_v34 = vpop.permute.xlu2 %468 }
  0x71   : > { %v485_v35 = vpop.permute.xlu2 %484 }
  0x79   : > { %v471_v38 = vpop.permute.xlu2 %470 }
  0x81   : > { %v467_v36 = vpop.permute.xlu0 %466  ;;  %v455_v41 = vpop.permute.xlu2 %454 }
  0x82   : > { %v435_v37 = vpop.permute.xlu1 %434  ;;  %2523 = vmatmul.msk.f32.vlgmr.msra.gmra.mxu2 %vm306_vm2, %v467_v36 }
  0x83   : > { %2507 = vmatmul.msk.f32.vlgmr.msra.gmra.mxu0 %vm306_vm2, %v435_v37 }
  0x89   : > { %v483_v39 = vpop.permute.xlu0 %482  ;;  %v441_v44 = vpop.permute.xlu2 %440 }
  0x8a   : > { %v451_v40 = vpop.permute.xlu1 %450  ;;  %2524 = vmatmul.msk.f32.gmra.mxu2 %vm306_vm2, %v469_v34  ;;  %2531 = vmatmul.msk.f32.vlgmr.msra.gmra.mxu3 %vm306_vm2, %v483_v39 }
  0x8b   : > { %2515 = vmatmul.msk.f32.vlgmr.msra.gmra.mxu1 %vm306_vm2, %v451_v40 }
  0x91   : > { %v437_v42 = vpop.permute.xlu0 %436  ;;  %v491_v47 = vpop.permute.xlu2 %490 }
  0x92   : > { %v453_v43 = vpop.permute.xlu1 %452  ;;  %2508 = vmatmul.msk.f32.gmra.mxu0 %vm306_vm2, %v437_v42  ;;  %2532 = vmatmul.msk.f32.gmra.mxu3 %vm306_vm2, %v485_v35 }
  0x93   : > { %2516 = vmatmul.msk.f32.gmra.mxu1 %vm306_vm2, %v453_v43  ;;  %2525 = vmatmul.msk.f32.gmra.mxu2 %vm306_vm2, %v471_v38 }
  0x99   : > { %v487_v45 = vpop.permute.xlu0 %486  ;;  %v477_v52 = vpop.permute.xlu2 %476 }
  0x9a   : > { %v439_v46 = vpop.permute.xlu1 %438  ;;  %2533 = vmatmul.msk.f32.gmra.mxu3 %vm306_vm2, %v487_v45 }
  0x9b   : > { %2509 = vmatmul.msk.f32.gmra.mxu0 %vm306_vm2, %v439_v46  ;;  %2517 = vmatmul.msk.f32.gmra.mxu1 %vm306_vm2, %v455_v41 }
  0xa1   : > { %v473_v48 = vpop.permute.xlu0 %472  ;;  %v461_v55 = vpop.permute.xlu2 %460 }
  0xa2   : > { %v489_v49 = vpop.permute.xlu1 %488  ;;  %2526 = vmatmul.msk.f32.gmra.mxu2 %vm306_vm2, %v473_v48 }
  0xa3   : > { %2510 = vmatmul.msk.f32.gmra.mxu0 %vm306_vm2, %v441_v44  ;;  %2534 = vmatmul.msk.f32.gmra.mxu3 %vm306_vm2, %v489_v49 }
  0xa9   : > { %v457_v50 = vpop.permute.xlu0 %456  ;;  %v447_v58 = vpop.permute.xlu2 %446 }
  0xaa   : > { %v475_v51 = vpop.permute.xlu1 %474  ;;  %2518 = vmatmul.msk.f32.gmra.mxu1 %vm306_vm2, %v457_v50 }
  0xab   : > { %2527 = vmatmul.msk.f32.gmra.mxu2 %vm306_vm2, %v475_v51  ;;  %2535 = vmatmul.msk.f32.gmra.mxu3 %vm306_vm2, %v491_v47 }
  0xb1   : > { %v443_v53 = vpop.permute.xlu0 %442  ;;  %v497_v61 = vpop.permute.xlu2 %496 }
  0xb2   : > { %v459_v54 = vpop.permute.xlu1 %458  ;;  %2511 = vmatmul.msk.f32.gmra.mxu0 %vm306_vm2, %v443_v53 }
  0xb3   : > { %2519 = vmatmul.msk.f32.gmra.mxu1 %vm306_vm2, %v459_v54  ;;  %2528 = vmatmul.msk.f32.gmra.mxu2 %vm306_vm2, %v477_v52 }
  0xb9   : > { %v493_v56 = vpop.permute.xlu0 %492 }
  0xba   : > { %v445_v57 = vpop.permute.xlu1 %444  ;;  %2536 = vmatmul.msk.f32.gmra.mxu3 %vm306_vm2, %v493_v56 }
  0xbb   : > { %2512 = vmatmul.msk.f32.gmra.mxu0 %vm306_vm2, %v445_v57  ;;  %2520 = vmatmul.msk.f32.gmra.mxu1 %vm306_vm2, %v461_v55 }
  0xc1   : > { %v479_v59 = vpop.permute.xlu0 %478 }
  0xc2   : > { %v495_v60 = vpop.permute.xlu1 %494  ;;  %2529 = vmatmul.msk.f32.gmra.mxu2 %vm306_vm2, %v479_v59 }
  0xc3   : > { %2537 = vmatmul.msk.f32.gmra.mxu3 %vm306_vm2, %v495_v60  ;;  %2513 = vmatmul.msk.f32.gmra.mxu0 %vm306_vm2, %v447_v58 }
  0xc9   : > { %v463_v62 = vpop.permute.xlu0 %462 }
  0xca   : > { %v481_v63 = vpop.permute.xlu1 %480  ;;  %2521 = vmatmul.msk.f32.gmra.mxu1 %vm306_vm2, %v463_v62 }
  0xcb   : > { %2530 = vmatmul.msk.f32.gmra.mxu2 %vm306_vm2, %v481_v63  ;;  %2538 = vmatmul.msk.f32.gmra.mxu3 %vm306_vm2, %v497_v61 }
  0xd1   : > { %v449_v0 = vpop.permute.xlu0 %448 }
  0xd2   : > { %v465_v1 = vpop.permute.xlu1 %464  ;;  %2514 = vmatmul.msk.f32.gmra.mxu0 %vm306_vm2, %v449_v0 }
  0xd3   : > { %2522 = vmatmul.msk.f32.gmra.mxu1 %vm306_vm2, %v465_v1 }
 0x100   : > { %v583_v3 = vpop.f32.mrf.mxu0 }
 0x101   : > { %v584_v4 = vadd.f32 %v3313_v2, %v583_v3 }
 0x103   : > { %v679_v5 = vmax.f32 %v584_v4, 0.0 }
 0x105   : > { %712 = vst.msk [vmem:[#allocation2 + $0x48] sm:$0xff] %vm306_vm2, %v679_v5  ;;  %v631_v6 = vpop.f32.mrf.mxu2 }
 0x106   : > { %v632_v7 = vadd.f32 %v3313_v2, %v631_v6 }
 0x108   : > { %v607_v8 = vpop.f32.mrf.mxu1  ;;  %v695_v9 = vmax.f32 %v632_v7, 0.0 }
 0x109   : > { %v608_v10 = vadd.f32 %v3313_v2, %v607_v8 }
 0x10a   : > { %728 = vst.msk [vmem:[#allocation2 + $0x148] sm:$0xff] %vm306_vm2, %v695_v9 }
 0x10b   : > { %v687_v11 = vmax.f32 %v608_v10, 0.0 }
 0x10d   : > { %720 = vst.msk [vmem:[#allocation2 + $0xc8] sm:$0xff] %vm306_vm2, %v687_v11  ;;  %v634_v12 = vpop.f32.mrf.mxu2  ;;  %v655_v14 = vpop.f32.mrf.mxu3 }
 0x10e   : > { %v635_v13 = vadd.f32 %v3313_v2, %v634_v12  ;;  %v656_v15 = vadd.f32 %v3313_v2, %v655_v14 }
 0x10f   : > { %v586_v16 = vpop.f32.mrf.mxu0 }
 0x110   : > { %v610_v17 = vpop.f32.mrf.mxu1  ;;  %v696_v18 = vmax.f32 %v635_v13, 0.0  ;;  %v587_v19 = vadd.f32 %v3313_v2, %v586_v16  ;;  %v703_v21 = vmax.f32 %v656_v15, 0.0 }
 0x111   : > { %v611_v20 = vadd.f32 %v3313_v2, %v610_v17 }
 0x112   : > { %729 = vst.msk [vmem:[#allocation2 + $0x150] sm:$0xff] %vm306_vm2, %v696_v18  ;;  %v680_v22 = vmax.f32 %v587_v19, 0.0 }
 0x113   : > { %v688_v23 = vmax.f32 %v611_v20, 0.0  ;;  %736 = vst.msk [vmem:[#allocation2 + $0x1c8] sm:$0xff] %vm306_vm2, %v703_v21 }
 0x114   : > { %713 = vst.msk [vmem:[#allocation2 + $0x50] sm:$0xff] %vm306_vm2, %v680_v22 }
 0x115   : > { %721 = vst.msk [vmem:[#allocation2 + $0xd0] sm:$0xff] %vm306_vm2, %v688_v23  ;;  %v658_v24 = vpop.f32.mrf.mxu3 }
 0x116   : > { %v637_v25 = vpop.f32.mrf.mxu2  ;;  %v659_v26 = vadd.f32 %v3313_v2, %v658_v24 }
 0x117   : > { %v638_v28 = vadd.f32 %v3313_v2, %v637_v25 }
 0x118   : > { %v589_v27 = vpop.f32.mrf.mxu0  ;;  %v613_v29 = vpop.f32.mrf.mxu1  ;;  %v704_v32 = vmax.f32 %v659_v26, 0.0 }
 0x119   : > { %v590_v30 = vadd.f32 %v3313_v2, %v589_v27  ;;  %v614_v31 = vadd.f32 %v3313_v2, %v613_v29  ;;  %v697_v33 = vmax.f32 %v638_v28, 0.0 }
 0x11a   : > { %737 = vst.msk [vmem:[#allocation2 + $0x1d0] sm:$0xff] %vm306_vm2, %v704_v32 }
 0x11b   : > { %v681_v34 = vmax.f32 %v590_v30, 0.0  ;;  %v689_v35 = vmax.f32 %v614_v31, 0.0  ;;  %730 = vst.msk [vmem:[#allocation2 + $0x168] sm:$0xff] %vm306_vm2, %v697_v33 }
 0x11d   : > { %714 = vst.msk [vmem:[#allocation2 + $0x68] sm:$0xff] %vm306_vm2, %v681_v34  ;;  %v661_v36 = vpop.f32.mrf.mxu3 }
 0x11e   : > { %722 = vst.msk [vmem:[#allocation2 + $0xe8] sm:$0xff] %vm306_vm2, %v689_v35  ;;  %v662_v37 = vadd.f32 %v3313_v2, %v661_v36 }
 0x120   : > { %v592_v38 = vpop.f32.mrf.mxu0  ;;  %v705_v40 = vmax.f32 %v662_v37, 0.0 }
 0x121   : > { %v593_v39 = vadd.f32 %v3313_v2, %v592_v38 }
 0x122   : > { %738 = vst.msk [vmem:[#allocation2 + $0x1e8] sm:$0xff] %vm306_vm2, %v705_v40 }
 0x123   : > { %v682_v41 = vmax.f32 %v593_v39, 0.0 }
 0x125   : > { %715 = vst.msk [vmem:[#allocation2 + $0x70] sm:$0xff] %vm306_vm2, %v682_v41  ;;  %v640_v42 = vpop.f32.mrf.mxu2 }
 0x126   : > { %v641_v43 = vadd.f32 %v3313_v2, %v640_v42  ;;  %v664_v44 = vpop.f32.mrf.mxu3 }
 0x127   : > { %v665_v45 = vadd.f32 %v3313_v2, %v664_v44  ;;  %v616_v46 = vpop.f32.mrf.mxu1 }
 0x128   : > { %v698_v47 = vmax.f32 %v641_v43, 0.0  ;;  %v617_v48 = vadd.f32 %v3313_v2, %v616_v46 }
 0x129   : > { %v706_v49 = vmax.f32 %v665_v45, 0.0 }
 0x12a   : > { %731 = vst.msk [vmem:[#allocation2 + $0x170] sm:$0xff] %vm306_vm2, %v698_v47  ;;  %v690_v50 = vmax.f32 %v617_v48, 0.0 }
 0x12b   : > { %739 = vst.msk [vmem:[#allocation2 + $0x1f0] sm:$0xff] %vm306_vm2, %v706_v49 }
 0x12c   : > { %723 = vst.msk [vmem:[#allocation2 + $0xf0] sm:$0xff] %vm306_vm2, %v690_v50 }
 0x12e   : > { %v643_v51 = vpop.f32.mrf.mxu2  ;;  %v667_v53 = vpop.f32.mrf.mxu3 }
 0x12f   : > { %v644_v52 = vadd.f32 %v3313_v2, %v643_v51  ;;  %v595_v54 = vpop.f32.mrf.mxu0  ;;  %v668_v56 = vadd.f32 %v3313_v2, %v667_v53 }
 0x130   : > { %v619_v55 = vpop.f32.mrf.mxu1  ;;  %v596_v58 = vadd.f32 %v3313_v2, %v595_v54 }
 0x131   : > { %v699_v57 = vmax.f32 %v644_v52, 0.0  ;;  %v620_v59 = vadd.f32 %v3313_v2, %v619_v55  ;;  %v707_v60 = vmax.f32 %v668_v56, 0.0 }
 0x132   : > { %v683_v61 = vmax.f32 %v596_v58, 0.0 }
 0x133   : > { %732 = vst.msk [vmem:[#allocation2 + $0x188] sm:$0xff] %vm306_vm2, %v699_v57  ;;  %v691_v62 = vmax.f32 %v620_v59, 0.0 }
 0x134   : > { %740 = vst.msk [vmem:[#allocation2 + $0x208] sm:$0xff] %vm306_vm2, %v707_v60 }
 0x135   : > { %716 = vst.msk [vmem:[#allocation2 + $0x88] sm:$0xff] %vm306_vm2, %v683_v61 }
 0x136   : > { %724 = vst.msk [vmem:[#allocation2 + $0x108] sm:$0xff] %vm306_vm2, %v691_v62  ;;  %v646_v63 = vpop.f32.mrf.mxu2 }
 0x137   : > { %v647_v1 = vadd.f32 %v3313_v2, %v646_v63 }
 0x138   : > { %v598_v0 = vpop.f32.mrf.mxu0  ;;  %v622_v4 = vpop.f32.mrf.mxu1 }
 0x139   : > { %v599_v3 = vadd.f32 %v3313_v2, %v598_v0  ;;  %v700_v5 = vmax.f32 %v647_v1, 0.0  ;;  %v623_v6 = vadd.f32 %v3313_v2, %v622_v4 }
 0x13b   : > { %v684_v7 = vmax.f32 %v599_v3, 0.0  ;;  %733 = vst.msk [vmem:[#allocation2 + $0x190] sm:$0xff] %vm306_vm2, %v700_v5  ;;  %v692_v8 = vmax.f32 %v623_v6, 0.0 }
 0x13d   : > { %717 = vst.msk [vmem:[#allocation2 + $0x90] sm:$0xff] %vm306_vm2, %v684_v7  ;;  %v670_v9 = vpop.f32.mrf.mxu3 }
 0x13e   : > { %725 = vst.msk [vmem:[#allocation2 + $0x110] sm:$0xff] %vm306_vm2, %v692_v8  ;;  %v671_v10 = vadd.f32 %v3313_v2, %v670_v9 }
 0x140   : > { %v708_v11 = vmax.f32 %v671_v10, 0.0  ;;  %v601_v12 = vpop.f32.mrf.mxu0 }
 0x141   : > { %v602_v13 = vadd.f32 %v3313_v2, %v601_v12 }
 0x142   : > { %741 = vst.msk [vmem:[#allocation2 + $0x210] sm:$0xff] %vm306_vm2, %v708_v11 }
 0x143   : > { %v685_v14 = vmax.f32 %v602_v13, 0.0 }
 0x145   : > { %718 = vst.msk [vmem:[#allocation2 + $0xa8] sm:$0xff] %vm306_vm2, %v685_v14  ;;  %v649_v15 = vpop.f32.mrf.mxu2 }
 0x146   : > { %v673_v16 = vpop.f32.mrf.mxu3  ;;  %v650_v17 = vadd.f32 %v3313_v2, %v649_v15 }
 0x147   : > { %v674_v18 = vadd.f32 %v3313_v2, %v673_v16  ;;  %v625_v19 = vpop.f32.mrf.mxu1 }
 0x148   : > { %v701_v20 = vmax.f32 %v650_v17, 0.0  ;;  %v626_v22 = vadd.f32 %v3313_v2, %v625_v19 }
 0x149   : > { %v709_v21 = vmax.f32 %v674_v18, 0.0 }
 0x14a   : > { %734 = vst.msk [vmem:[#allocation2 + $0x1a8] sm:$0xff] %vm306_vm2, %v701_v20  ;;  %v693_v23 = vmax.f32 %v626_v22, 0.0 }
 0x14b   : > { %742 = vst.msk [vmem:[#allocation2 + $0x228] sm:$0xff] %vm306_vm2, %v709_v21 }
 0x14c   : > { %726 = vst.msk [vmem:[#allocation2 + $0x128] sm:$0xff] %vm306_vm2, %v693_v23 }
 0x14e   : > { %v652_v24 = vpop.f32.mrf.mxu2  ;;  %v676_v26 = vpop.f32.mrf.mxu3 }
 0x14f   : > { %v653_v25 = vadd.f32 %v3313_v2, %v652_v24  ;;  %v604_v27 = vpop.f32.mrf.mxu0  ;;  %v677_v29 = vadd.f32 %v3313_v2, %v676_v26 }
 0x150   : > { %v628_v28 = vpop.f32.mrf.mxu1  ;;  %v605_v31 = vadd.f32 %v3313_v2, %v604_v27 }
 0x151   : > { %v702_v30 = vmax.f32 %v653_v25, 0.0  ;;  %v629_v32 = vadd.f32 %v3313_v2, %v628_v28  ;;  %v710_v33 = vmax.f32 %v677_v29, 0.0 }
 0x152   : > { %v686_v34 = vmax.f32 %v605_v31, 0.0 }
 0x153   : > { %735 = vst.msk [vmem:[#allocation2 + $0x1b0] sm:$0xff] %vm306_vm2, %v702_v30  ;;  %v694_v35 = vmax.f32 %v629_v32, 0.0 }
 0x154   : > { %743 = vst.msk [vmem:[#allocation2 + $0x230] sm:$0xff] %vm306_vm2, %v710_v33 }
 0x155   : > { %719 = vst.msk [vmem:[#allocation2 + $0xb0] sm:$0xff] %vm306_vm2, %v686_v34 }
 0x156   : > { %727 = vst.msk [vmem:[#allocation2 + $0x130] sm:$0xff] %vm306_vm2, %v694_v35 }
 0x157 LB: >> { %v2109_v2 = vld [vmem:[%s5174_s5] sm:$0x3]  ;;  %s2932_s26 = sshll.u32 %s3028_s19, 8  ;;  %v3403_v38 = vld [vmem:[%s5172_s3 + $0x2] ss:$0 sm:$0xff]  ;;  %s2910_s14 = sshll.u32 %s3028_s19, 7  ;;  %s3028_s19 = sphi %s3379_s19, %s749_s19  }
 0x158   : >> { %v3390_v36 = vld [vmem:[%s5172_s3] ss:$0 sm:$0xff]  ;;  %2940 = vmatpush.msk.msra.mxu2 %vm562_vm1, %v2109_v2  ;;  %v3396_v37 = vld [vmem:[%s5172_s3 + $0x1] ss:$0 sm:$0xff]  ;;  %2893 = vmatpush.msk.msra.mxu0 %vm562_vm1, %v2109_v2  ;;  %v3408_v39 = vld [vmem:[%s5172_s3 + $0x3] ss:$0 sm:$0xff]  ;;  %s3540_s17 = scalar_lea.vmem %s3088_s10, %s2910_s14 }
 0x159   : >> { %s3410_s11 = scalar_lea.vmem [#allocation2], %s2932_s26  ;;  %v3433_v47 = vld [vmem:[%s5172_s3 + $0x4] ss:$0 sm:$0xff]  ;;  %v3443_v51 = vld [vmem:[%s5172_s3 + $0x5] ss:$0 sm:$0xff]  ;;  %vm2398_vm3 = vcmask 31744  }
 0x15a   : >> { %v3453_v55 = vld [vmem:[%s5172_s3 + $0x6] ss:$0 sm:$0xff]  ;;  %v3463_v59 = vld [vmem:[%s5172_s3 + $0x7] ss:$0 sm:$0xff]  ;;  %v3473_v63 = vld [vmem:[%s5172_s3 + $0x8] ss:$0 sm:$0xff] }
 0x15b   : >> { %5356 = vst [vmem:[#allocation11_spill] sm:$0xff] %v3473_v63  ;;  %v3483_v4 = vld [vmem:[%s5172_s3 + $0x9] ss:$0 sm:$0xff]  ;;  %v3497_v10 = vld [vmem:[%s5172_s3 + $0xa] ss:$0 sm:$0xff]  ;;  %s749_s19 = sadd.s32 1, %s3028_s19  }
 0x15c   : >> { %v3507_v16 = vld [vmem:[%s5172_s3 + $0xb] ss:$0 sm:$0xff]  ;;  %v3516_v20 = vld [vmem:[%s5172_s3 + $0xc] ss:$0 sm:$0xff]  ;;  %v3529_v26 = vld [vmem:[%s5172_s3 + $0xd] ss:$0 sm:$0xff] }
 0x15d   : >> { %v3413_v40 = vld [vmem:[%s3410_s11 + $0x86] sm:$0xff]  ;;  %v3547_v31 = vld [vmem:[%s5172_s3 + $0xe] ss:$0 sm:$0xff]  ;;  %v3552_v32 = vld [vmem:[%s5172_s3 + $0xf] ss:$0 sm:$0xff]  ;;  %p746_p4 = scmp.ge.s32.totalorder %s749_s19, 2  }
 0x15e   : >> { %5348 = vst [vmem:[#allocation3_spill] sm:$0xff] %v3413_v40  ;;  %v3416_v41 = vld [vmem:[%s3410_s11 + $0x87] sm:$0xff]  ;;  %v781_v43 = vmul.f32 %v3390_v36, %v3413_v40  ;;  %v3560_v34 = vld [vmem:[%s5172_s3 + $0x10] ss:$0 sm:$0xff]  ;;  %v3565_v35 = vld [vmem:[%s5172_s3 + $0x11] ss:$0 sm:$0xff] }
 0x15f   : >> { %5349 = vst [vmem:[#allocation4_spill] sm:$0xff] %v3416_v41  ;;  %v3419_v42 = vld [vmem:[%s3410_s11 + $0x88] sm:$0xff]  ;;  %v834_v44 = vmul.f32 %v3396_v37, %v3416_v41  ;;  %v2264_v2 = vld [vmem:[%s5176_s7] sm:$0x3] }
 0x160   : >> { %5350 = vst [vmem:[#allocation5_spill] sm:$0xff] %v3419_v42  ;;  %v887_v45 = vmul.f32 %v3403_v38, %v3419_v42  ;;  %v3428_v46 = vld [vmem:[%s3410_s11 + $0x89] sm:$0xff]  ;;  %2941 = vmatpush.msk.msra.mxu3 %vm562_vm1, %v2264_v2  ;;  %2911 = vmatpush.msk.msra.mxu1 %vm562_vm1, %v2264_v2 }
 0x161   : >> { %5351 = vst [vmem:[#allocation6_spill] sm:$0xff] %v3428_v46  ;;  %v3436_v48 = vld [vmem:[%s3410_s11 + $0x8a] sm:$0xff]  ;;  %v850_v49 = vadd.f32 %v834_v44, %v781_v43  ;;  %v940_v50 = vmul.f32 %v3408_v39, %v3428_v46 }
 0x162   : >> { %5352 = vst [vmem:[#allocation7_spill] sm:$0xff] %v3436_v48  ;;  %v3446_v52 = vld [vmem:[%s3410_s11 + $0xa6] sm:$0xff]  ;;  %v993_v54 = vmul.f32 %v3433_v47, %v3436_v48 }
 0x163   : >> { %5353 = vst [vmem:[#allocation8_spill] sm:$0xff] %v3446_v52  ;;  %v903_v53 = vadd.f32 %v887_v45, %v850_v49  ;;  %v3456_v56 = vld [vmem:[%s3410_s11 + $0xa7] sm:$0xff]  ;;  %v1049_v58 = vmul.f32 %v3443_v51, %v3446_v52  ;;  %v783_v6 = vmul.f32 %v3390_v36, %v3446_v52 }
 0x164   : >> { %5354 = vst [vmem:[#allocation9_spill] sm:$0xff] %v3456_v56  ;;  %v3466_v60 = vld [vmem:[%s3410_s11 + $0xa8] sm:$0xff]  ;;  %v1102_v62 = vmul.f32 %v3453_v55, %v3456_v56  ;;  %v836_v7 = vmul.f32 %v3396_v37, %v3456_v56 }
 0x165   : >> { %v956_v57 = vadd.f32 %v940_v50, %v903_v53  ;;  %5355 = vst [vmem:[#allocation10_spill] sm:$0xff] %v3466_v60  ;;  %v3476_v0 = vld [vmem:[%s3410_s11 + $0xa9] sm:$0xff]  ;;  %v1155_v3 = vmul.f32 %v3463_v59, %v3466_v60  ;;  %v889_v13 = vmul.f32 %v3403_v38, %v3466_v60 }
 0x166   : >> { %5357 = vst [vmem:[#allocation12_spill] sm:$0xff] %v3476_v0  ;;  %v3486_v5 = vld [vmem:[%s3410_s11 + $0xaa] sm:$0xff]  ;;  %v1208_v9 = vmul.f32 %v3473_v63, %v3476_v0  ;;  %v852_v12 = vadd.f32 %v836_v7, %v783_v6  ;;  %v942_v23 = vmul.f32 %v3408_v39, %v3476_v0 }
 0x167   : >> { %v1009_v61 = vadd.f32 %v993_v54, %v956_v57  ;;  %5358 = vst [vmem:[#allocation13_spill] sm:$0xff] %v3486_v5  ;;  %v2642_v11 = vld [vmem:[%s3410_s11 + $0xc6] sm:$0xff]  ;;  %v1261_v15 = vmul.f32 %v3483_v4, %v3486_v5  ;;  %v995_v44 = vmul.f32 %v3433_v47, %v3486_v5  ;;  %v3675_v5 = vld [vmem:[%s3410_s11 + $0x8e] sm:$0xff] }
 0x168   : >> { %v3510_v17 = vld [vmem:[%s3410_s11 + $0xc7] sm:$0xff]  ;;  %v1317_v19 = vmul.f32 %v3497_v10, %v2642_v11  ;;  %v905_v22 = vadd.f32 %v889_v13, %v852_v12  ;;  %v3605_v12 = vld [vmem:[%s5172_s3 + $0x14] ss:$0 sm:$0xff]  ;;  %5374 = vst [vmem:[#allocation29_spill] sm:$0xff] %v3675_v5 }
 0x169   : >> { %v1065_v1 = vadd.f32 %v1049_v58, %v1009_v61  ;;  %v3520_v21 = vld [vmem:[%s3410_s11 + $0xc8] sm:$0xff]  ;;  %v1370_v25 = vmul.f32 %v3507_v16, %v3510_v17  ;;  %v2256_v54 = vld [vmem:[%s3540_s17 + $0x40] sm:$0xff]  ;;  %v3588_v61 = vld [vmem:[%s5172_s3 + $0x12] ss:$0 sm:$0xff]  ;;  %v1104_v52 = vmul.f32 %v3453_v55, %v3510_v17 }
 0x16a   : >> { %v3532_v27 = vld [vmem:[%s3410_s11 + $0xc9] sm:$0xff]  ;;  %v1423_v30 = vmul.f32 %v3516_v20, %v3520_v21  ;;  %v958_v43 = vadd.f32 %v942_v23, %v905_v22  ;;  %2920 = vmatmul.msk.f32.vlgmr.msra.gmra.mxu3 %vm306_vm2, %v2256_v54 }
 0x16b   : >> { %v1118_v8 = vadd.f32 %v1102_v62, %v1065_v1  ;;  %5359 = vst [vmem:[#allocation14_spill] sm:$0xff] %v3532_v27  ;;  %v3535_v28 = vld [vmem:[%s3410_s11 + $0xca] sm:$0xff]  ;;  %v1476_v49 = vmul.f32 %v3529_v26, %v3532_v27 }
 0x16c   : >> { %5360 = vst [vmem:[#allocation15_spill] sm:$0xff] %v3535_v28  ;;  %v3555_v33 = vld [vmem:[%s3410_s11 + $0xe6] sm:$0xff]  ;;  %v3678_v0 = vld [vmem:[%s3410_s11 + $0x8f] sm:$0xff] }
 0x16d   : >> { %v1171_v14 = vadd.f32 %v1155_v3, %v1118_v8  ;;  %5361 = vst [vmem:[#allocation16_spill] sm:$0xff] %v3555_v33  ;;  %v3575_v50 = vld [vmem:[%s3410_s11 + $0xe7] sm:$0xff]  ;;  %v1529_v8 = vmul.f32 %v3547_v31, %v3535_v28  ;;  %v3681_v60 = vld [vmem:[%s3410_s11 + $0x90] sm:$0xff] }
 0x16e   : >> { %5362 = vst [vmem:[#allocation17_spill] sm:$0xff] %v3575_v50  ;;  %v3578_v53 = vld [vmem:[%s3410_s11 + $0xe8] sm:$0xff] }
 0x16f   : >> { %v1224_v18 = vadd.f32 %v1208_v9, %v1171_v14  ;;  %5363 = vst [vmem:[#allocation18_spill] sm:$0xff] %v3578_v53  ;;  %v753_v57 = vld [vmem:[%s3410_s11 + $0x6] sm:$0xff]  ;;  %v3600_v9 = vld [vmem:[%s5172_s3 + $0x13] ss:$0 sm:$0xff] }
 0x170   : >> { %v805_v58 = vld [vmem:[%s3410_s11 + $0x7] sm:$0xff]  ;;  %v773_v62 = vmul.f32 %v3390_v36, %v753_v57  ;;  %v1638_v57 = vmul.f32 %v3560_v34, %v3575_v50  ;;  %5375 = vst [vmem:[#allocation30_spill] sm:$0xff] %v3678_v0 }
 0x171   : >> { %v1277_v24 = vadd.f32 %v1261_v15, %v1224_v18  ;;  %v826_v1 = vmul.f32 %v3396_v37, %v805_v58  ;;  %v858_v3 = vld [vmem:[%s3410_s11 + $0x8] sm:$0xff]  ;;  %5376 = vst [vmem:[#allocation31_spill] sm:$0xff] %v3681_v60 }
 0x172   : >> { %v911_v6 = vld [vmem:[%s3410_s11 + $0x9] sm:$0xff]  ;;  %v879_v13 = vmul.f32 %v3403_v38, %v858_v3 }
 0x173   : >> { %v1333_v29 = vadd.f32 %v1317_v19, %v1277_v24  ;;  %v964_v14 = vld [vmem:[%s3410_s11 + $0xa] sm:$0xff]  ;;  %v842_v22 = vadd.f32 %v826_v1, %v773_v62  ;;  %v932_v23 = vmul.f32 %v3408_v39, %v911_v6  ;;  %v1011_v24 = vadd.f32 %v995_v44, %v958_v43  ;;  %v3643_v44 = vld [vmem:[%s5172_s3 + $0x16] ss:$0 sm:$0xff] }
 0x174   : >> { %v3610_v15 = vld [vmem:[%s3410_s11 + $0xe9] sm:$0xff]  ;;  %v985_v62 = vmul.f32 %v3433_v47, %v964_v14 }
 0x175   : >> { %v1386_v45 = vadd.f32 %v1370_v25, %v1333_v29  ;;  %5364 = vst [vmem:[#allocation19_spill] sm:$0xff] %v3610_v15  ;;  %v3613_v18 = vld [vmem:[%s3410_s11 + $0xea] sm:$0xff]  ;;  %v1051_v25 = vmul.f32 %v3443_v51, %v2642_v11  ;;  %v1691_v11 = vmul.f32 %v3565_v35, %v3578_v53  ;;  %v895_v58 = vadd.f32 %v879_v13, %v842_v22  ;;  %v3662_v13 = vld [vmem:[%s5172_s3 + $0x17] ss:$0 sm:$0xff] }
 0x176   : >> { %5365 = vst [vmem:[#allocation20_spill] sm:$0xff] %v3613_v18  ;;  %v3616_v19 = vld [vmem:[%s3410_s11 + $0x106] sm:$0xff]  ;;  %v1744_v3 = vmul.f32 %v3588_v61, %v3610_v15  ;;  %v3653_v6 = vmul.f32 %v3600_v9, %v3613_v18  ;;  %v3738_v50 = vld [vmem:[%s3410_s11 + $0xae] sm:$0xff] }
 0x177   : >> { %v1439_v7 = vadd.f32 %v1423_v30, %v1386_v45  ;;  %5366 = vst [vmem:[#allocation21_spill] sm:$0xff] %v3616_v19  ;;  %v1585_v30 = vmul.f32 %v3552_v32, %v3555_v33  ;;  %v3623_v2 = vld [vmem:[%s3410_s11 + $0x107] sm:$0xff]  ;;  %v3628_v45 = vld [vmem:[%s5172_s3 + $0x15] ss:$0 sm:$0xff]  ;;  %v948_v22 = vadd.f32 %v932_v23, %v895_v58  ;;  %v1067_v56 = vadd.f32 %v1051_v25, %v1011_v24 }
 0x178   : >> { %5367 = vst [vmem:[#allocation22_spill] sm:$0xff] %v3623_v2  ;;  %v3631_v54 = vld [vmem:[%s3410_s11 + $0x26] sm:$0xff]  ;;  %v3687_v23 = vmul.f32 %v3628_v45, %v3623_v2  ;;  %v835_v24 = vmul.f32 %v3396_v37, %v3678_v0  ;;  %v3700_v25 = vld [vmem:[%s3410_s11 + $0x91] sm:$0xff]  ;;  %v888_v2 = vmul.f32 %v3403_v38, %v3681_v60 }
 0x179   : >> { %v1492_v29 = vadd.f32 %v1476_v49, %v1439_v7  ;;  %5368 = vst [vmem:[#allocation23_spill] sm:$0xff] %v3631_v54  ;;  %v3638_v43 = vld [vmem:[%s3410_s11 + $0x108] sm:$0xff]  ;;  %v3657_v7 = vmul.f32 %v3605_v12, %v3616_v19  ;;  %v941_v60 = vmul.f32 %v3408_v39, %v3700_v25  ;;  %v3740_v33 = vadd.f32 %v1104_v52, %v1067_v56 }
 0x17a   : >> { %5369 = vst [vmem:[#allocation24_spill] sm:$0xff] %v3638_v43  ;;  %v3646_v49 = vld [vmem:[%s3410_s11 + $0x109] sm:$0xff]  ;;  %v3704_v17 = vmul.f32 %v3643_v44, %v3638_v43 }
 0x17b   : >> { %5370 = vst [vmem:[#allocation25_spill] sm:$0xff] %v3646_v49  ;;  %v1545_v1 = vadd.f32 %v1529_v8, %v1492_v29  ;;  %v3667_v8 = vld [vmem:[%s5172_s3 + $0x18] ss:$0 sm:$0xff]  ;;  %v3670_v14 = vld [vmem:[%s3410_s11 + $0x27] sm:$0xff]  ;;  %v1041_v29 = vmul.f32 %v3443_v51, %v3631_v54  ;;  %v782_v54 = vmul.f32 %v3390_v36, %v3675_v5  ;;  %v3715_v15 = vmul.f32 %v3662_v13, %v3646_v49 }
 0x17c   : >> { %5371 = vst [vmem:[#allocation26_spill] sm:$0xff] %v3662_v13  ;;  %v3690_v58 = vld [vmem:[%s3410_s11 + $0x10a] sm:$0xff]  ;;  %v3711_v5 = vld [vmem:[%s3410_s11 + $0x92] sm:$0xff] }
 0x17d   : >> { %5372 = vst [vmem:[#allocation27_spill] sm:$0xff] %v3667_v8  ;;  %v1601_v19 = vadd.f32 %v1585_v30, %v1545_v1  ;;  %v3693_v18 = vld [vmem:[%s3410_s11 + $0x28] sm:$0xff]  ;;  %v1001_v30 = vadd.f32 %v985_v62, %v948_v22  ;;  %v1094_v1 = vmul.f32 %v3453_v55, %v3670_v14  ;;  %v851_v22 = vadd.f32 %v835_v24, %v782_v54 }
 0x17e   : >> { %5373 = vst [vmem:[#allocation28_spill] sm:$0xff] %v3670_v14  ;;  %v3718_v43 = vld [vmem:[%s3410_s11 + $0x29] sm:$0xff]  ;;  %v3730_v14 = vmul.f32 %v3667_v8, %v3690_v58 }
 0x17f   : >> { %5377 = vst [vmem:[#allocation32_spill] sm:$0xff] %v3690_v58  ;;  %v1654_v0 = vadd.f32 %v1638_v57, %v1601_v19  ;;  %v3721_v53 = vld [vmem:[%s3410_s11 + $0x2a] sm:$0xff]  ;;  %v1057_v19 = vadd.f32 %v1041_v29, %v1001_v30  ;;  %v1147_v57 = vmul.f32 %v3463_v59, %v3693_v18  ;;  %v904_v30 = vadd.f32 %v888_v2, %v851_v22 }
 0x180   : >> { %5378 = vst [vmem:[#allocation33_spill] sm:$0xff] %v3693_v18  ;;  %v3724_v62 = vld [vmem:[%s3410_s11 + $0x46] sm:$0xff]  ;;  %v994_v58 = vmul.f32 %v3433_v47, %v3711_v5  ;;  %v3755_v18 = vmul.f32 %v3463_v59, %v3520_v21  ;;  %v1200_v56 = vmul.f32 %v3473_v63, %v3718_v43  ;;  %v3767_v22 = vld [vmem:[%s3410_s11 + $0xaf] sm:$0xff] }
 0x181   : >> { %5379 = vst [vmem:[#allocation34_spill] sm:$0xff] %v3700_v25  ;;  %v3735_v49 = vld [vmem:[%s3410_s11 + $0x47] sm:$0xff]  ;;  %v1707_v54 = vadd.f32 %v1691_v11, %v1654_v0  ;;  %v1110_v52 = vadd.f32 %v1094_v1, %v1057_v19  ;;  %v1253_v0 = vmul.f32 %v3483_v4, %v3721_v53  ;;  %v1309_v11 = vmul.f32 %v3497_v10, %v3724_v62 }
 0x182   : >> { %5380 = vst [vmem:[#allocation35_spill] sm:$0xff] %v3711_v5  ;;  %v3743_v24 = vld [vmem:[%s3410_s11 + $0x48] sm:$0xff]  ;;  %v1362_v21 = vmul.f32 %v3507_v16, %v3735_v49 }
 0x183   : >> { %5381 = vst [vmem:[#allocation36_spill] sm:$0xff] %v3718_v43  ;;  %v3746_v25 = vld [vmem:[%s3410_s11 + $0x49] sm:$0xff]  ;;  %v1760_v5 = vadd.f32 %v1744_v3, %v1707_v54  ;;  %v957_v43 = vadd.f32 %v941_v60, %v904_v30  ;;  %v1163_v28 = vadd.f32 %v1147_v57, %v1110_v52  ;;  %v1415_v3 = vmul.f32 %v3516_v20, %v3743_v24 }
 0x184   : >> { %5382 = vst [vmem:[#allocation37_spill] sm:$0xff] %v3721_v53  ;;  %v3749_v29 = vld [vmem:[%s3410_s11 + $0x4a] sm:$0xff]  ;;  %v3786_v54 = vmul.f32 %v3529_v26, %v3746_v25  ;;  %v1103_v52 = vmul.f32 %v3453_v55, %v3767_v22 }
 0x185   : >> { %5383 = vst [vmem:[#allocation38_spill] sm:$0xff] %v3724_v62  ;;  %v3764_v2 = vld [vmem:[%s3410_s11 + $0x66] sm:$0xff]  ;;  %v1050_v62 = vmul.f32 %v3443_v51, %v3738_v50  ;;  %v1813_v60 = vadd.f32 %v3653_v6, %v1760_v5  ;;  %v1010_v30 = vadd.f32 %v994_v58, %v957_v43  ;;  %v3821_v43 = vld [vmem:[%s3410_s11 + $0xb1] sm:$0xff] }
 0x186   : >> { %5384 = vst [vmem:[#allocation39_spill] sm:$0xff] %v3735_v49  ;;  %v3772_v1 = vld [vmem:[%s3410_s11 + $0x67] sm:$0xff]  ;;  %v3790_v49 = vmul.f32 %v3547_v31, %v3749_v29  ;;  %v3801_v57 = vmul.f32 %v3552_v32, %v3764_v2 }
 0x187   : >> { %5385 = vst [vmem:[#allocation40_spill] sm:$0xff] %v3738_v50  ;;  %v3775_v19 = vld [vmem:[%s3410_s11 + $0x68] sm:$0xff]  ;;  %v1869_v58 = vadd.f32 %v3657_v7, %v1813_v60 }
 0x188   : >> { %5386 = vst [vmem:[#allocation41_spill] sm:$0xff] %v3740_v33  ;;  %v3778_v53 = vld [vmem:[%s3410_s11 + $0x69] sm:$0xff]  ;;  %v3810_v33 = vmul.f32 %v3560_v34, %v3772_v1  ;;  %v3814_v5 = vmul.f32 %v3565_v35, %v3775_v19 }
 0x189   : >> { %5387 = vst [vmem:[#allocation42_spill] sm:$0xff] %v3743_v24  ;;  %v3793_v27 = vld [vmem:[%s3410_s11 + $0x6a] sm:$0xff]  ;;  %v1216_v24 = vadd.f32 %v1200_v56, %v1163_v28  ;;  %v3818_v6 = vmul.f32 %v3588_v61, %v3778_v53  ;;  %v1066_v56 = vadd.f32 %v1050_v62, %v1010_v30  ;;  %v1922_v60 = vadd.f32 %v3687_v23, %v1869_v58 }
 0x18a   : >> { %5388 = vst [vmem:[#allocation43_spill] sm:$0xff] %v3746_v25  ;;  %v754_v50 = vld [vmem:[%s3410_s11 + $0xe] sm:$0xff]  ;;  %v3826_v28 = vmul.f32 %v3600_v9, %v3793_v27  ;;  %v3840_v62 = vmul.f32 %v3605_v12, %v3413_v40 }
 0x18b   : >> { %5389 = vst [vmem:[#allocation44_spill] sm:$0xff] %v3749_v29  ;;  %v806_v25 = vld [vmem:[%s3410_s11 + $0xf] sm:$0xff]  ;;  %v1119_v30 = vadd.f32 %v1103_v52, %v1066_v56  ;;  %v1975_v40 = vadd.f32 %v3704_v17, %v1922_v60  ;;  %v3859_v52 = vmul.f32 %v3643_v44, %v3419_v42  ;;  %v3871_v17 = vmul.f32 %v3662_v13, %v3428_v46 }
 0x18c   : >> { %5390 = vst [vmem:[#allocation45_spill] sm:$0xff] %v3755_v18  ;;  %v3796_v18 = vld [vmem:[%s3410_s11 + $0xb0] sm:$0xff] }
 0x18d   : >> { %5391 = vst [vmem:[#allocation46_spill] sm:$0xff] %v3764_v2  ;;  %v859_v29 = vld [vmem:[%s3410_s11 + $0x10] sm:$0xff]  ;;  %v1269_v2 = vadd.f32 %v1253_v0, %v1216_v24  ;;  %v1209_v24 = vmul.f32 %v3473_v63, %v3821_v43 }
 0x18e   : >> { %5392 = vst [vmem:[#allocation47_spill] sm:$0xff] %v3767_v22  ;;  %v3832_v22 = vld [vmem:[%s3410_s11 + $0xb2] sm:$0xff]  ;;  %v880_v7 = vmul.f32 %v3403_v38, %v859_v29 }
 0x18f   : >> { %5393 = vst [vmem:[#allocation48_spill] sm:$0xff] %v3772_v1  ;;  %v912_v1 = vld [vmem:[%s3410_s11 + $0x11] sm:$0xff] }
 0x190   : >> { %5394 = vst [vmem:[#allocation49_spill] sm:$0xff] %v3775_v19  ;;  %v1156_v19 = vmul.f32 %v3463_v59, %v3796_v18  ;;  %v965_v0 = vld [vmem:[%s3410_s11 + $0x12] sm:$0xff]  ;;  %v933_v58 = vmul.f32 %v3408_v39, %v912_v1 }
 0x191   : >> { %5395 = vst [vmem:[#allocation50_spill] sm:$0xff] %v3778_v53  ;;  %v774_v53 = vmul.f32 %v3390_v36, %v754_v50  ;;  %v3847_v50 = vmul.f32 %v3628_v45, %v3416_v41  ;;  %v3853_v29 = vld [vmem:[%s3410_s11 + $0xcf] sm:$0xff]  ;;  %v986_v60 = vmul.f32 %v3433_v47, %v965_v0 }
 0x192   : >> { %5396 = vst [vmem:[#allocation51_spill] sm:$0xff] %v3793_v27  ;;  %v1325_v27 = vadd.f32 %v1309_v11, %v1269_v2  ;;  %v1172_v11 = vadd.f32 %v1156_v19, %v1119_v30  ;;  %v1262_v2 = vmul.f32 %v3483_v4, %v3832_v22  ;;  %v3864_v56 = vld [vmem:[%s3410_s11 + $0xd0] sm:$0xff]  ;;  %v2028_v19 = vadd.f32 %v3715_v15, %v1975_v40  ;;  %v3881_v30 = vld [vmem:[%s5173_s4] ss:$0 sm:$0xff] }
 0x193   : >> { %5397 = vst [vmem:[#allocation52_spill] sm:$0xff] %v3796_v18  ;;  %v3867_v41 = vld [vmem:[%s3410_s11 + $0x2e] sm:$0xff]  ;;  %v1424_v15 = vmul.f32 %v3516_v20, %v3864_v56 }
 0x194   : >> { %5398 = vst [vmem:[#allocation53_spill] sm:$0xff] %v3818_v6  ;;  %v827_v6 = vmul.f32 %v3396_v37, %v806_v25  ;;  %v3850_v25 = vld [vmem:[%s3410_s11 + $0xce] sm:$0xff]  ;;  %v1225_v42 = vadd.f32 %v1209_v24, %v1172_v11  ;;  %v1042_v11 = vmul.f32 %v3443_v51, %v3867_v41 }
 0x195   : >> { %5399 = vst [vmem:[#allocation54_spill] sm:$0xff] %v3821_v43  ;;  %v3874_v1 = vld [vmem:[%s3410_s11 + $0xd1] sm:$0xff] }
 0x196   : >> { %5400 = vst [vmem:[#allocation55_spill] sm:$0xff] %v3832_v22  ;;  %v843_v23 = vadd.f32 %v827_v6, %v774_v53  ;;  %v1378_v53 = vadd.f32 %v1362_v21, %v1325_v27  ;;  %v1318_v27 = vmul.f32 %v3497_v10, %v3850_v25  ;;  %v1371_v21 = vmul.f32 %v3507_v16, %v3853_v29  ;;  %v3888_v46 = vld [vmem:[%s3410_s11 + $0xd2] sm:$0xff] }
 0x197   : >> { %5401 = vst [vmem:[#allocation56_spill] sm:$0xff] %v3850_v25  ;;  %v3896_v0 = vld [vmem:[%s3410_s11 + $0xee] sm:$0xff]  ;;  %v3906_v25 = vmul.f32 %v3667_v8, %v3436_v48 }
 0x198   : >> { %5402 = vst [vmem:[#allocation57_spill] sm:$0xff] %v3853_v29  ;;  %v896_v6 = vadd.f32 %v880_v7, %v843_v23  ;;  %v3891_v7 = vld [vmem:[%s3410_s11 + $0x2f] sm:$0xff]  ;;  %v1431_v40 = vadd.f32 %v1415_v3, %v1378_v53  ;;  %v2081_v29 = vadd.f32 %v3730_v14, %v2028_v19  ;;  %v1278_v3 = vadd.f32 %v1262_v2, %v1225_v42 }
 0x199   : >> { %5403 = vst [vmem:[#allocation58_spill] sm:$0xff] %v3864_v56  ;;  %v3899_v24 = vld [vmem:[%s3410_s11 + $0xef] sm:$0xff]  ;;  %v1477_v53 = vmul.f32 %v3529_v26, %v3874_v1  ;;  %v1095_v42 = vmul.f32 %v3453_v55, %v3891_v7  ;;  %v1586_v22 = vmul.f32 %v3552_v32, %v3896_v0 }
 0x19a   : >> { %5404 = vst [vmem:[#allocation59_spill] sm:$0xff] %v3867_v41  ;;  %v949_v23 = vadd.f32 %v933_v58, %v896_v6  ;;  %v3911_v56 = vld [vmem:[%s3410_s11 + $0x30] sm:$0xff]  ;;  %v1484_v58 = vadd.f32 %v3786_v54, %v1431_v40  ;;  %v1530_v6 = vmul.f32 %v3547_v31, %v3888_v46  ;;  %v2101_v2 = vadd.f32 %v3881_v30, %v2081_v29  ;;  %v2248_v40 = vld [vmem:[%s3540_s17] sm:$0xff] }
 0x19b   : >> { %5405 = vst [vmem:[#allocation60_spill] sm:$0xff] %v3874_v1  ;;  %v3917_v14 = vld [vmem:[%s3410_s11 + $0xf0] sm:$0xff]  ;;  %v1334_v1 = vadd.f32 %v1318_v27, %v1278_v3  ;;  %v3932_v54 = vmul.f32 %v3560_v34, %v3899_v24  ;;  %2912 = vmatmul.msk.f32.vlgmr.msra.gmra.mxu1 %vm306_vm2, %v2248_v40  ;;  %v1148_v27 = vmul.f32 %v3463_v59, %v3911_v56 }
 0x19c   : >> { %5406 = vst [vmem:[#allocation61_spill] sm:$0xff] %v3888_v46  ;;  %v3920_v19 = vld [vmem:[%s3410_s11 + $0xf1] sm:$0xff]  ;;  %v1002_v41 = vadd.f32 %v986_v60, %v949_v23  ;;  %v2257_v46 = vld [vmem:[%s3540_s17 + $0x48] sm:$0xff]  ;;  %v1537_v60 = vadd.f32 %v3790_v49, %v1484_v58  ;;  %2902 = vmatmul.msk.f32.vlgmr.msra.gmra.mxu2 %vm306_vm2, %v2101_v2 }
 0x19d   : >> { %5407 = vst [vmem:[#allocation62_spill] sm:$0xff] %v3891_v7  ;;  %v3923_v48 = vld [vmem:[%s3410_s11 + $0xf2] sm:$0xff]  ;;  %2921 = vmatmul.msk.f32.gmra.mxu3 %vm306_vm2, %v2257_v46  ;;  %v1387_v3 = vadd.f32 %v1371_v21, %v1334_v1  ;;  %v3952_v49 = vmul.f32 %v3588_v61, %v3920_v19 }
 0x19e   : >> { %5408 = vst [vmem:[#allocation63_spill] sm:$0xff] %v3896_v0  ;;  %v3937_v43 = vld [vmem:[%s3410_s11 + $0x31] sm:$0xff]  ;;  %v1058_v29 = vadd.f32 %v1042_v11, %v1002_v41  ;;  %v3956_v58 = vmul.f32 %v3600_v9, %v3923_v48  ;;  %v1593_v11 = vadd.f32 %v3801_v57, %v1537_v60  ;;  %v5424_v60 = vld [vmem:[#allocation15_spill] sm:$0xff] }
 0x19f   : >> { %5409 = vst [vmem:[#allocation64_spill] sm:$0xff] %v3899_v24  ;;  %v3941_v23 = vld [vmem:[%s3410_s11 + $0x10e] sm:$0xff]  ;;  %v1692_v24 = vmul.f32 %v3565_v35, %v3917_v14  ;;  %v1201_v21 = vmul.f32 %v3473_v63, %v3937_v43  ;;  %v5423_v57 = vld [vmem:[#allocation14_spill] sm:$0xff] }
 0x1a0   : >> { %5410 = vst [vmem:[#allocation65_spill] sm:$0xff] %v3911_v56  ;;  %v3959_v41 = vld [vmem:[%s3410_s11 + $0x10f] sm:$0xff]  ;;  %v1111_v1 = vadd.f32 %v1095_v42, %v1058_v29  ;;  %v3974_v0 = vmul.f32 %v3605_v12, %v3941_v23  ;;  %v1210_v42 = vmul.f32 %v3473_v63, %v5423_v57  ;;  %v1263_v29 = vmul.f32 %v3483_v4, %v5424_v60 }
 0x1a1   : >> { %5411 = vst [vmem:[#allocation66_spill] sm:$0xff] %v3917_v14  ;;  %v3962_v46 = vld [vmem:[%s3410_s11 + $0x32] sm:$0xff] }
 0x1a2   : >> { %5412 = vst [vmem:[#allocation67_spill] sm:$0xff] %v3920_v19  ;;  %v3966_v2 = vld [vmem:[%s3410_s11 + $0x110] sm:$0xff] }
 0x1a3   : >> { %5413 = vst [vmem:[#allocation68_spill] sm:$0xff] %v3923_v48  ;;  %v5419_v40 = vld [vmem:[#allocation41_spill] sm:$0xff]  ;;  %v1440_v48 = vadd.f32 %v1424_v15, %v1387_v3  ;;  %v3989_v15 = vmul.f32 %v3628_v45, %v3959_v41  ;;  %v1164_v3 = vadd.f32 %v1148_v27, %v1111_v1  ;;  %v3998_v57 = vmul.f32 %v3643_v44, %v3966_v2 }
 0x1a4   : >> { %5414 = vst [vmem:[#allocation69_spill] sm:$0xff] %v3937_v43  ;;  %v5420_v19 = vld [vmem:[#allocation45_spill] sm:$0xff]  ;;  %v1646_v43 = vadd.f32 %v3810_v33, %v1593_v11 }
 0x1a5   : >> { %5415 = vst [vmem:[#allocation70_spill] sm:$0xff] %v3941_v23  ;;  %v1173_v14 = vadd.f32 %v5420_v19, %v5419_v40  ;;  %v3977_v56 = vld [vmem:[%s3410_s11 + $0x111] sm:$0xff]  ;;  %v1254_v40 = vmul.f32 %v3483_v4, %v3962_v46  ;;  %v1493_v23 = vadd.f32 %v1477_v53, %v1440_v48  ;;  %v1217_v1 = vadd.f32 %v1201_v21, %v1164_v3 }
 0x1a6   : >> { %5416 = vst [vmem:[#allocation71_spill] sm:$0xff] %v3959_v41  ;;  %v3980_v7 = vld [vmem:[%s3410_s11 + $0x4e] sm:$0xff]  ;;  %v1699_v63 = vadd.f32 %v3814_v5, %v1646_v43  ;;  %v4011_v27 = vmul.f32 %v3662_v13, %v3977_v56  ;;  %v5431_v13 = vld [vmem:[#allocation18_spill] sm:$0xff] }
 0x1a7   : >> { %5417 = vst [vmem:[#allocation72_spill] sm:$0xff] %v3962_v46  ;;  %v3992_v19 = vld [vmem:[%s3410_s11 + $0x112] sm:$0xff]  ;;  %v1226_v11 = vadd.f32 %v1210_v42, %v1173_v14  ;;  %v5426_v41 = vld [vmem:[#allocation16_spill] sm:$0xff]  ;;  %v1310_v48 = vmul.f32 %v3497_v10, %v3980_v7 }
 0x1a8   : >> { %5418 = vst [vmem:[#allocation73_spill] sm:$0xff] %v3966_v2  ;;  %v4001_v60 = vld [vmem:[%s3410_s11 + $0x4f] sm:$0xff]  ;;  %v1319_v18 = vmul.f32 %v3497_v10, %v5426_v41  ;;  %v1546_v2 = vadd.f32 %v1530_v6, %v1493_v23  ;;  %v4020_v46 = vmul.f32 %v3667_v8, %v3992_v19 }
 0x1a9   : >> { %5421 = vst [vmem:[#allocation41_spill] sm:$0xff] %v3977_v56  ;;  %v4004_v33 = vld [vmem:[%s3410_s11 + $0x50] sm:$0xff]  ;;  %v1279_v5 = vadd.f32 %v1263_v29, %v1226_v11  ;;  %v1270_v56 = vadd.f32 %v1254_v40, %v1217_v1  ;;  %v1363_v6 = vmul.f32 %v3507_v16, %v4001_v60  ;;  %v1425_v29 = vmul.f32 %v3516_v20, %v5431_v13  ;;  %v2249_v1 = vld [vmem:[%s3540_s17 + $0x8] sm:$0xff] }
 0x1aa   : >> { %5422 = vst [vmem:[#allocation45_spill] sm:$0xff] %v3980_v7  ;;  %v4016_v53 = vld [vmem:[%s3410_s11 + $0x51] sm:$0xff]  ;;  %v1416_v23 = vmul.f32 %v3516_v20, %v4004_v33  ;;  %2913 = vmatmul.msk.f32.gmra.mxu1 %vm306_vm2, %v2249_v1 }
 0x1ab   : >> { %5425 = vst [vmem:[#allocation14_spill] sm:$0xff] %v3992_v19  ;;  %v4023_v14 = vld [vmem:[%s3410_s11 + $0x52] sm:$0xff]  ;;  %v1602_v19 = vadd.f32 %v1586_v22, %v1546_v2  ;;  %v1469_v7 = vmul.f32 %v3529_v26, %v4016_v53  ;;  %v1335_v8 = vadd.f32 %v1319_v18, %v1279_v5 }
 0x1ac   : >> { %5427 = vst [vmem:[#allocation15_spill] sm:$0xff] %v4016_v53  ;;  %v4026_v41 = vld [vmem:[%s3410_s11 + $0x6e] sm:$0xff]  ;;  %v5432_v53 = vld [vmem:[#allocation19_spill] sm:$0xff] }
 0x1ad   : >> { %5428 = vst [vmem:[#allocation16_spill] sm:$0xff] %v4026_v41  ;;  %v5429_v43 = vld [vmem:[#allocation17_spill] sm:$0xff]  ;;  %v1578_v40 = vmul.f32 %v3552_v32, %v4026_v41  ;;  %v1655_v22 = vadd.f32 %v3932_v54, %v1602_v19  ;;  %v1478_v18 = vmul.f32 %v3529_v26, %v5432_v53  ;;  %v5437_v41 = vld [vmem:[#allocation36_spill] sm:$0xff] }
 0x1ae   : >> { %v1372_v21 = vmul.f32 %v3507_v16, %v5429_v43  ;;  %v5430_v42 = vld [vmem:[#allocation53_spill] sm:$0xff]  ;;  %v1326_v43 = vadd.f32 %v1310_v48, %v1270_v56  ;;  %v5433_v48 = vld [vmem:[#allocation23_spill] sm:$0xff] }
 0x1af   : >> { %v1752_v3 = vadd.f32 %v5430_v42, %v1699_v63  ;;  %v1522_v63 = vmul.f32 %v3547_v31, %v4023_v14  ;;  %v2258_v42 = vld [vmem:[%s3540_s17 + $0x50] sm:$0xff]  ;;  %v775_v5 = vmul.f32 %v3390_v36, %v5433_v48  ;;  %v934_v48 = vmul.f32 %v3408_v39, %v5437_v41 }
 0x1b0   : >> { %v1388_v2 = vadd.f32 %v1372_v21, %v1335_v8  ;;  %2922 = vmatmul.msk.f32.gmra.mxu3 %vm306_vm2, %v2258_v42  ;;  %v4053_v56 = vld [vmem:[%s3410_s11 + $0x6f] sm:$0xff]  ;;  %v1708_v8 = vadd.f32 %v1692_v24, %v1655_v22 }
 0x1b1   : >> { %v1805_v11 = vadd.f32 %v3826_v28, %v1752_v3  ;;  %v1379_v28 = vadd.f32 %v1363_v6, %v1326_v43  ;;  %v5434_v3 = vld [vmem:[#allocation28_spill] sm:$0xff]  ;;  %v5436_v1 = vld [vmem:[#allocation33_spill] sm:$0xff]  ;;  %v1631_v24 = vmul.f32 %v3560_v34, %v4053_v56 }
 0x1b2   : >> { %v828_v54 = vmul.f32 %v3396_v37, %v5434_v3  ;;  %v1441_v19 = vadd.f32 %v1425_v29, %v1388_v2  ;;  %v5435_v21 = vld [vmem:[#allocation20_spill] sm:$0xff]  ;;  %v881_v42 = vmul.f32 %v3403_v38, %v5436_v1  ;;  %v1761_v3 = vadd.f32 %v3952_v49, %v1708_v8  ;;  %v5438_v22 = vld [vmem:[#allocation21_spill] sm:$0xff]  ;;  %v5440_v8 = vld [vmem:[#allocation22_spill] sm:$0xff] }
 0x1b3   : >> { %v1861_v13 = vadd.f32 %v3840_v62, %v1805_v11  ;;  %v1531_v53 = vmul.f32 %v3547_v31, %v5435_v21  ;;  %v1432_v6 = vadd.f32 %v1416_v23, %v1379_v28  ;;  %v4065_v11 = vld [vmem:[%s3410_s11 + $0x70] sm:$0xff]  ;;  %v1587_v2 = vmul.f32 %v3552_v32, %v5438_v22  ;;  %v5443_v22 = vld [vmem:[#allocation39_spill] sm:$0xff] }
 0x1b4   : >> { %v844_v43 = vadd.f32 %v828_v54, %v775_v5  ;;  %v1494_v29 = vadd.f32 %v1478_v18, %v1441_v19  ;;  %v4076_v23 = vld [vmem:[%s3410_s11 + $0x71] sm:$0xff]  ;;  %v1814_v41 = vadd.f32 %v3956_v58, %v1761_v3  ;;  %v1684_v49 = vmul.f32 %v3565_v35, %v4065_v11 }
 0x1b5   : >> { %v1914_v62 = vadd.f32 %v3847_v50, %v1861_v13  ;;  %v1485_v50 = vadd.f32 %v1469_v7, %v1432_v6  ;;  %v5439_v28 = vld [vmem:[#allocation37_spill] sm:$0xff]  ;;  %v1640_v18 = vmul.f32 %v3560_v34, %v5440_v8  ;;  %v1737_v6 = vmul.f32 %v3588_v61, %v4076_v23 }
 0x1b6   : >> { %v897_v13 = vadd.f32 %v881_v42, %v844_v43  ;;  %v987_v5 = vmul.f32 %v3433_v47, %v5439_v28  ;;  %v1547_v54 = vadd.f32 %v1531_v53, %v1494_v29  ;;  %v1870_v58 = vadd.f32 %v3974_v0, %v1814_v41  ;;  %v5442_v43 = vld [vmem:[#allocation24_spill] sm:$0xff] }
 0x1b7   : >> { %v1967_v21 = vadd.f32 %v3859_v52, %v1914_v62  ;;  %v1538_v1 = vadd.f32 %v1522_v63, %v1485_v50  ;;  %v4087_v52 = vld [vmem:[%s3410_s11 + $0x72] sm:$0xff]  ;;  %v1693_v3 = vmul.f32 %v3565_v35, %v5442_v43 }
 0x1b8   : >> { %v950_v7 = vadd.f32 %v934_v48, %v897_v13  ;;  %v5441_v62 = vld [vmem:[#allocation38_spill] sm:$0xff]  ;;  %v1603_v53 = vadd.f32 %v1587_v2, %v1547_v54  ;;  %v1096_v48 = vmul.f32 %v3453_v55, %v5443_v22  ;;  %v1790_v0 = vmul.f32 %v3600_v9, %v4087_v52  ;;  %v5444_v13 = vld [vmem:[#allocation25_spill] sm:$0xff]  ;;  %v4106_v54 = vld [vmem:[%s3410_s11 + $0x126] sm:$0xff] }
 0x1b9   : >> { %v2020_v19 = vadd.f32 %v3871_v17, %v1967_v21  ;;  %v1043_v42 = vmul.f32 %v3443_v51, %v5441_v62  ;;  %v1594_v63 = vadd.f32 %v1578_v40, %v1538_v1  ;;  %v1923_v21 = vadd.f32 %v3989_v15, %v1870_v58  ;;  %5445 = vst [vmem:[#allocation17_spill] sm:$0xff] %v4106_v54  ;;  %v4119_v58 = vld [vmem:[%s3410_s11 + $0x128] sm:$0xff] }
 0x1ba   : >> { %v1003_v29 = vadd.f32 %v987_v5, %v950_v7  ;;  %v1656_v50 = vadd.f32 %v1640_v18, %v1603_v53  ;;  %v1746_v2 = vmul.f32 %v3588_v61, %v5444_v13  ;;  %v5447_v5 = vld [vmem:[#allocation42_spill] sm:$0xff]  ;;  %v5449_v7 = vld [vmem:[#allocation32_spill] sm:$0xff]  ;;  %5450 = vst [vmem:[#allocation18_spill] sm:$0xff] %v4119_v58 }
 0x1bb   : >> { %v2073_v17 = vadd.f32 %v3906_v25, %v2020_v19  ;;  %v1647_v41 = vadd.f32 %v1631_v24, %v1594_v63  ;;  %v4109_v25 = vld [vmem:[%s3410_s11 + $0x127] sm:$0xff]  ;;  %v1149_v8 = vmul.f32 %v3463_v59, %v5447_v5  ;;  %v1976_v15 = vadd.f32 %v3998_v57, %v1923_v21  ;;  %v5448_v19 = vld [vmem:[#allocation29_spill] sm:$0xff]  ;;  %v5451_v53 = vld [vmem:[#allocation30_spill] sm:$0xff] }
 0x1bc   : >> { %5446 = vst [vmem:[#allocation53_spill] sm:$0xff] %v4109_v25  ;;  %v1059_v40 = vadd.f32 %v1043_v42, %v1003_v29  ;;  %v1846_v1 = vmul.f32 %v3605_v12, %v5448_v19  ;;  %v1709_v18 = vadd.f32 %v1693_v3, %v1656_v50  ;;  %v1799_v62 = vmul.f32 %v3600_v9, %v5449_v7  ;;  %v5453_v63 = vld [vmem:[#allocation11_spill] sm:$0xff]  ;;  %v4141_v7 = vld [vmem:[%s3410_s11 + $0x129] sm:$0xff] }
 0x1bd   : >> { %v2093_v28 = vadd.f32 %v3881_v30, %v2073_v17  ;;  %v1700_v24 = vadd.f32 %v1684_v49, %v1647_v41  ;;  %v1899_v42 = vmul.f32 %v3628_v45, %v5451_v53  ;;  %v5452_v17 = vld [vmem:[#allocation43_spill] sm:$0xff]  ;;  %v2029_v29 = vadd.f32 %v4011_v27, %v1976_v15  ;;  %v5455_v27 = vld [vmem:[#allocation40_spill] sm:$0xff]  ;;  %5457 = vst [vmem:[#allocation19_spill] sm:$0xff] %v4141_v7 }
 0x1be   : >> { %v1112_v43 = vadd.f32 %v1096_v48, %v1059_v40  ;;  %v1202_v57 = vmul.f32 %v5453_v63, %v5452_v17  ;;  %v1762_v22 = vadd.f32 %v1746_v2, %v1709_v18  ;;  %v1855_v3 = vmul.f32 %v3605_v12, %v4106_v54  ;;  %v5456_v5 = vld [vmem:[#allocation47_spill] sm:$0xff] }
 0x1bf   : >> { %2894 = vmatmul.msk.f32.vlgmr.msra.gmra.mxu0 %vm306_vm2, %v2093_v28  ;;  %v1908_v21 = vmul.f32 %v3628_v45, %v4109_v25  ;;  %v1753_v50 = vadd.f32 %v1737_v6, %v1700_v24  ;;  %v1961_v49 = vmul.f32 %v3643_v44, %v4119_v58  ;;  %v5454_v28 = vld [vmem:[#allocation44_spill] sm:$0xff]  ;;  %v2082_v41 = vadd.f32 %v4020_v46, %v2029_v29  ;;  %v5458_v24 = vld [vmem:[#allocation46_spill] sm:$0xff]  ;;  %v5461_v25 = vld [vmem:[#allocation31_spill] sm:$0xff] }
 0x1c0   : >> { %v1165_v13 = vadd.f32 %v1149_v8, %v1112_v43  ;;  %v1255_v48 = vmul.f32 %v3483_v4, %v5454_v28  ;;  %v1815_v40 = vadd.f32 %v1799_v62, %v1762_v22  ;;  %v784_v2 = vmul.f32 %v3390_v36, %v5455_v27  ;;  %v5459_v43 = vld [vmem:[#allocation52_spill] sm:$0xff]  ;;  %v5460_v29 = vld [vmem:[#allocation54_spill] sm:$0xff] }
 0x1c1   : >> { %v837_v15 = vmul.f32 %v3396_v37, %v5456_v5  ;;  %v1806_v18 = vadd.f32 %v1790_v0, %v1753_v50  ;;  %v1311_v8 = vmul.f32 %v3497_v10, %v5458_v24  ;;  %v890_v17 = vmul.f32 %v3403_v38, %v5459_v43  ;;  %v4153_v50 = vld [vmem:[%s3410_s11 + $0x12a] sm:$0xff] }
 0x1c2   : >> { %v1218_v6 = vadd.f32 %v1202_v57, %v1165_v13  ;;  %v2102_v28 = vadd.f32 %v3881_v30, %v2082_v41  ;;  %v1871_v46 = vadd.f32 %v1855_v3, %v1815_v40  ;;  %v943_v22 = vmul.f32 %v3408_v39, %v5460_v29  ;;  %5462 = vst [vmem:[#allocation23_spill] sm:$0xff] %v4153_v50  ;;  %v5463_v13 = vld [vmem:[#allocation48_spill] sm:$0xff]  ;;  %v5464_v41 = vld [vmem:[#allocation26_spill] sm:$0xff]  ;;  %v5467_v5 = vld [vmem:[#allocation49_spill] sm:$0xff] }
 0x1c3   : >> { %v853_v62 = vadd.f32 %v837_v15, %v784_v2  ;;  %v1862_v58 = vadd.f32 %v1846_v1, %v1806_v18  ;;  %v1952_v0 = vmul.f32 %v3643_v44, %v5461_v25  ;;  %v1364_v24 = vmul.f32 %v3507_v16, %v5463_v13  ;;  %v5465_v2 = vld [vmem:[#allocation55_spill] sm:$0xff]  ;;  %v5466_v18 = vld [vmem:[#allocation34_spill] sm:$0xff] }
 0x1c4   : >> { %v1271_v57 = vadd.f32 %v1255_v48, %v1218_v6  ;;  %2903 = vmatmul.msk.f32.gmra.mxu2 %vm306_vm2, %v2102_v28  ;;  %v1924_v54 = vadd.f32 %v1908_v21, %v1871_v46  ;;  %v2014_v3 = vmul.f32 %v5464_v41, %v4141_v7  ;;  %v996_v15 = vmul.f32 %v3433_v47, %v5465_v2  ;;  %v5468_v13 = vld [vmem:[#allocation27_spill] sm:$0xff]  ;;  %v5469_v46 = vld [vmem:[#allocation56_spill] sm:$0xff] }
 0x1c5   : >> { %v906_v40 = vadd.f32 %v890_v17, %v853_v62  ;;  %v1915_v1 = vadd.f32 %v1899_v42, %v1862_v58  ;;  %v2005_v29 = vmul.f32 %v5464_v41, %v5466_v18  ;;  %v1417_v48 = vmul.f32 %v3516_v20, %v5467_v5  ;;  %v5470_v62 = vld [vmem:[#allocation35_spill] sm:$0xff]  ;;  %v5471_v42 = vld [vmem:[#allocation50_spill] sm:$0xff]  ;;  %v5472_v18 = vld [vmem:[#allocation57_spill] sm:$0xff] }
 0x1c6   : >> { %v1327_v43 = vadd.f32 %v1311_v8, %v1271_v57  ;;  %v1977_v6 = vadd.f32 %v1961_v49, %v1924_v54  ;;  %v2067_v28 = vmul.f32 %v5468_v13, %v4153_v50  ;;  %v1052_v7 = vmul.f32 %v3443_v51, %v5469_v46  ;;  %v5473_v50 = vld [vmem:[#allocation51_spill] sm:$0xff] }
 0x1c7   : >> { %v959_v21 = vadd.f32 %v943_v22, %v906_v40  ;;  %v1968_v17 = vadd.f32 %v1952_v0, %v1915_v1  ;;  %v2058_v2 = vmul.f32 %v5468_v13, %v5470_v62  ;;  %v1470_v27 = vmul.f32 %v3529_v26, %v5471_v42  ;;  %v5474_v0 = vld [vmem:[#allocation58_spill] sm:$0xff] }
 0x1c8   : >> { %v1380_v58 = vadd.f32 %v1364_v24, %v1327_v43  ;;  %v2030_v8 = vadd.f32 %v2014_v3, %v1977_v6  ;;  %v1105_v54 = vmul.f32 %v3453_v55, %v5472_v18  ;;  %v1523_v22 = vmul.f32 %v3547_v31, %v5473_v50  ;;  %v5475_v24 = vld [vmem:[#allocation3_spill] sm:$0xff]  ;;  %v5476_v3 = vld [vmem:[#allocation4_spill] sm:$0xff] }
 0x1c9   : >> { %v1012_v57 = vadd.f32 %v996_v15, %v959_v21  ;;  %v2021_v49 = vadd.f32 %v2005_v29, %v1968_v17  ;;  %v1158_v1 = vmul.f32 %v3463_v59, %v5474_v0  ;;  %v1579_v42 = vmul.f32 %v3552_v32, %v5475_v24  ;;  %v5478_v50 = vld [vmem:[#allocation59_spill] sm:$0xff]  ;;  %v5480_v17 = vld [vmem:[#allocation65_spill] sm:$0xff]  ;;  %v5484_v0 = vld [vmem:[#allocation6_spill] sm:$0xff] }
 0x1ca   : >> { %v1433_v5 = vadd.f32 %v1417_v48, %v1380_v58  ;;  %v2083_v40 = vadd.f32 %v2067_v28, %v2030_v8  ;;  %v1632_v15 = vmul.f32 %v3560_v34, %v5476_v3  ;;  %v5477_v48 = vld [vmem:[#allocation60_spill] sm:$0xff]  ;;  %v882_v58 = vmul.f32 %v3403_v38, %v5480_v17 }
 0x1cb   : >> { %v1068_v46 = vadd.f32 %v1052_v7, %v1012_v57  ;;  %v2074_v62 = vadd.f32 %v2058_v2, %v2021_v49  ;;  %v1211_v6 = vmul.f32 %v5453_v63, %v5477_v48  ;;  %v776_v7 = vmul.f32 %v3390_v36, %v5478_v50  ;;  %v5479_v2 = vld [vmem:[#allocation62_spill] sm:$0xff]  ;;  %v5481_v57 = vld [vmem:[#allocation61_spill] sm:$0xff]  ;;  %v5487_v50 = vld [vmem:[#allocation72_spill] sm:$0xff] }
 0x1cc   : >> { %v1486_v43 = vadd.f32 %v1470_v27, %v1433_v5  ;;  %v2103_v18 = vadd.f32 %v3881_v30, %v2083_v40  ;;  %v829_v27 = vmul.f32 %v3396_v37, %v5479_v2  ;;  %v5482_v5 = vld [vmem:[#allocation5_spill] sm:$0xff]  ;;  %v5490_v17 = vld [vmem:[#allocation64_spill] sm:$0xff] }
 0x1cd   : >> { %v1121_v29 = vadd.f32 %v1105_v54, %v1068_v46  ;;  %v2094_v28 = vadd.f32 %v3881_v30, %v2074_v62  ;;  %v1264_v54 = vmul.f32 %v3483_v4, %v5481_v57  ;;  %v1685_v40 = vmul.f32 %v3565_v35, %v5482_v5  ;;  %v5489_v2 = vld [vmem:[#allocation9_spill] sm:$0xff]  ;;  %v5491_v57 = vld [vmem:[#allocation10_spill] sm:$0xff] }
 0x1ce   : >> { %v1539_v21 = vadd.f32 %v1523_v22, %v1486_v43  ;;  %2904 = vmatmul.msk.f32.gmra.mxu2 %vm306_vm2, %v2103_v18  ;;  %v845_v62 = vadd.f32 %v829_v27, %v776_v7  ;;  %v5483_v22 = vld [vmem:[#allocation69_spill] sm:$0xff]  ;;  %v1738_v43 = vmul.f32 %v3588_v61, %v5484_v0  ;;  %v988_v7 = vmul.f32 %v3433_v47, %v5487_v50  ;;  %v4224_v0 = vld [vmem:[%s3410_s11 + $0xc7] sm:$0xff] }
 0x1cf   : >> { %v1174_v8 = vadd.f32 %v1158_v1, %v1121_v29  ;;  %2895 = vmatmul.msk.f32.gmra.mxu0 %vm306_vm2, %v2094_v28  ;;  %v935_v46 = vmul.f32 %v3408_v39, %v5483_v22  ;;  %v5485_v1 = vld [vmem:[#allocation63_spill] sm:$0xff]  ;;  %v5488_v28 = vld [vmem:[#allocation8_spill] sm:$0xff]  ;;  %v5492_v5 = vld [vmem:[#allocation45_spill] sm:$0xff]  ;;  %5494 = vst [vmem:[#allocation20_spill] sm:$0xff] %v4224_v0 }
 0x1d0   : >> { %v1595_v49 = vadd.f32 %v1579_v42, %v1539_v21  ;;  %v1320_v3 = vmul.f32 %v3497_v10, %v5485_v1  ;;  %v5486_v29 = vld [vmem:[#allocation7_spill] sm:$0xff]  ;;  %v898_v48 = vadd.f32 %v882_v58, %v845_v62  ;;  %v1847_v21 = vmul.f32 %v3605_v12, %v5488_v28  ;;  %v5495_v1 = vld [vmem:[#allocation12_spill] sm:$0xff] }
 0x1d1   : >> { %v1227_v24 = vadd.f32 %v1211_v6, %v1174_v8  ;;  %v1791_v42 = vmul.f32 %v3600_v9, %v5486_v29  ;;  %v1900_v6 = vmul.f32 %v3628_v45, %v5489_v2  ;;  %v1953_v58 = vmul.f32 %v3643_v44, %v5491_v57  ;;  %v4221_v22 = vld [vmem:[%s3410_s11 + $0xc6] sm:$0xff] }
 0x1d2   : >> { %v1648_v18 = vadd.f32 %v1632_v15, %v1595_v49  ;;  %v1373_v15 = vmul.f32 %v3507_v16, %v5490_v17  ;;  %v951_v49 = vadd.f32 %v935_v46, %v898_v48  ;;  %v1044_v62 = vmul.f32 %v3443_v51, %v5492_v5  ;;  %5493 = vst [vmem:[#allocation28_spill] sm:$0xff] %v4221_v22  ;;  %v2250_v46 = vld [vmem:[%s3540_s17 + $0x10] sm:$0xff]  ;;  %v2259_v48 = vld [vmem:[%s3540_s17 + $0x58] sm:$0xff]  ;;  %v4237_v28 = vld [vmem:[%s3410_s11 + $0xc8] sm:$0xff] }
 0x1d3   : >> { %v1280_v27 = vadd.f32 %v1264_v54, %v1227_v24  ;;  %v2006_v29 = vmul.f32 %v5464_v41, %v5495_v1  ;;  %v5496_v54 = vld [vmem:[#allocation13_spill] sm:$0xff]  ;;  %5498 = vst [vmem:[#allocation33_spill] sm:$0xff] %v4237_v28  ;;  %2914 = vmatmul.msk.f32.gmra.mxu1 %vm306_vm2, %v2250_v46  ;;  %2923 = vmatmul.msk.f32.gmra.mxu3 %vm306_vm2, %v2259_v48  ;;  %v4268_v46 = vld [vmem:[%s3410_s11 + $0xe6] sm:$0xff] }
 0x1d4   : >> { %v1701_v8 = vadd.f32 %v1685_v40, %v1648_v18  ;;  %v4230_v24 = vmul.f32 %v5468_v13, %v5496_v54  ;;  %v5497_v18 = vld [vmem:[#allocation66_spill] sm:$0xff]  ;;  %v1004_v2 = vadd.f32 %v988_v7, %v951_v49  ;;  %v1097_v17 = vmul.f32 %v3453_v55, %v4001_v60  ;;  %v4244_v57 = vld [vmem:[%s3410_s11 + $0xc9] sm:$0xff]  ;;  %5505 = vst [vmem:[#allocation37_spill] sm:$0xff] %v4268_v46  ;;  %v5506_v48 = vld [vmem:[#allocation71_spill] sm:$0xff] }
 0x1d5   : >> { %v1336_v40 = vadd.f32 %v1320_v3, %v1280_v27  ;;  %v1426_v50 = vmul.f32 %v3516_v20, %v5497_v18  ;;  %5499 = vst [vmem:[#allocation36_spill] sm:$0xff] %v4244_v57  ;;  %v5500_v27 = vld [vmem:[#allocation67_spill] sm:$0xff]  ;;  %v785_v1 = vmul.f32 %v3390_v36, %v4221_v22  ;;  %v1150_v7 = vmul.f32 %v3463_v59, %v4004_v33  ;;  %v4257_v60 = vld [vmem:[%s3410_s11 + $0xca] sm:$0xff] }
 0x1d6   : >> { %v1754_v51 = vadd.f32 %v1738_v43, %v1701_v8  ;;  %v1479_v5 = vmul.f32 %v3529_v26, %v5500_v27  ;;  %v838_v43 = vmul.f32 %v3396_v37, %v4224_v0  ;;  %v1060_v54 = vadd.f32 %v1044_v62, %v1004_v2  ;;  %5501 = vst [vmem:[#allocation21_spill] sm:$0xff] %v4257_v60  ;;  %v5502_v49 = vld [vmem:[#allocation68_spill] sm:$0xff]  ;;  %v5504_v33 = vld [vmem:[#allocation15_spill] sm:$0xff] }
 0x1d7   : >> { %v1389_v3 = vadd.f32 %v1373_v15, %v1336_v40  ;;  %v891_v55 = vmul.f32 %v3403_v38, %v4237_v28  ;;  %v1532_v40 = vmul.f32 %v3547_v31, %v5502_v49  ;;  %v944_v36 = vmul.f32 %v3408_v39, %v4244_v57  ;;  %v4667_v57 = vld [vmem:[%s3410_s11 + $0xf2] sm:$0xff] }
 0x1d8   : >> { %v1807_v8 = vadd.f32 %v1791_v42, %v1754_v51  ;;  %v854_v18 = vadd.f32 %v838_v43, %v785_v1  ;;  %v5503_v42 = vld [vmem:[#allocation70_spill] sm:$0xff]  ;;  %v1113_v59 = vadd.f32 %v1097_v17, %v1060_v54  ;;  %v1203_v38 = vmul.f32 %v5453_v63, %v5504_v33  ;;  %v4277_v17 = vld [vmem:[%s3410_s11 + $0x12e] sm:$0xff]  ;;  %v4316_v33 = vld [vmem:[%s5172_s3 + $0x6] ss:$0 sm:$0xff]  ;;  %5559 = vst [vmem:[#allocation8_spill] sm:$0xff] %v4667_v57 }
 0x1d9   : >> { %v1442_v15 = vadd.f32 %v1426_v50, %v1389_v3  ;;  %v1588_v62 = vmul.f32 %v3552_v32, %v5503_v42  ;;  %v1641_v51 = vmul.f32 %v3560_v34, %v5506_v48  ;;  %v997_v39 = vmul.f32 %v3433_v47, %v4257_v60  ;;  %v5507_v3 = vld [vmem:[#allocation73_spill] sm:$0xff] }
 0x1da   : >> { %v1863_v37 = vadd.f32 %v1847_v21, %v1807_v8  ;;  %v907_v2 = vadd.f32 %v891_v55, %v854_v18  ;;  %v1694_v27 = vmul.f32 %v3565_v35, %v5507_v3  ;;  %v1166_v1 = vadd.f32 %v1150_v7, %v1113_v59  ;;  %v5509_v8 = vld [vmem:[#allocation41_spill] sm:$0xff]  ;;  %v4292_v35 = vld [vmem:[%s5172_s3 + $0x5] ss:$0 sm:$0xff]  ;;  %v4339_v3 = vld [vmem:[%s5172_s3 + $0x7] ss:$0 sm:$0xff] }
 0x1db   : >> { %v1495_v50 = vadd.f32 %v1479_v5, %v1442_v15  ;;  %v1256_v63 = vmul.f32 %v3483_v4, %v4023_v14  ;;  %v4282_v5 = vld [vmem:[%s3410_s11 + $0xe7] sm:$0xff]  ;;  %v1747_v54 = vmul.f32 %v3588_v61, %v5509_v8  ;;  %v4287_v55 = vld [vmem:[%s3410_s11 + $0x12f] sm:$0xff]  ;;  %v5511_v14 = vld [vmem:[#allocation14_spill] sm:$0xff]  ;;  %v4308_v42 = vmul.f32 %v3605_v12, %v4277_v17 }
 0x1dc   : >> { %v1916_v21 = vadd.f32 %v1900_v6, %v1863_v37  ;;  %5508 = vst [vmem:[#allocation22_spill] sm:$0xff] %v4282_v5  ;;  %v960_v47 = vadd.f32 %v944_v36, %v907_v2  ;;  %v1053_v6 = vmul.f32 %v4292_v35, %v4268_v46  ;;  %v1800_v7 = vmul.f32 %v3600_v9, %v5511_v14  ;;  %v4299_v15 = vld [vmem:[%s3410_s11 + $0x130] sm:$0xff]  ;;  %v4304_v36 = vld [vmem:[%s3410_s11 + $0xe8] sm:$0xff] }
 0x1dd   : >> { %v1548_v43 = vadd.f32 %v1532_v40, %v1495_v50  ;;  %5510 = vst [vmem:[#allocation38_spill] sm:$0xff] %v4287_v55  ;;  %v1219_v49 = vadd.f32 %v1203_v38, %v1166_v1  ;;  %v5513_v40 = vld [vmem:[#allocation16_spill] sm:$0xff]  ;;  %v4311_v59 = vld [vmem:[%s3410_s11 + $0x131] sm:$0xff]  ;;  %v1106_v38 = vmul.f32 %v4316_v33, %v4282_v5  ;;  %v1365_v48 = vmul.f32 %v3507_v16, %v4053_v56 }
 0x1de   : >> { %v1969_v4 = vadd.f32 %v1953_v58, %v1916_v21  ;;  %5512 = vst [vmem:[#allocation24_spill] sm:$0xff] %v4299_v15  ;;  %v1312_v18 = vmul.f32 %v3497_v10, %v5513_v40  ;;  %v1013_v58 = vadd.f32 %v997_v39, %v960_v47  ;;  %v4325_v12 = vld [vmem:[%s3410_s11 + $0x132] sm:$0xff]  ;;  %v4330_v2 = vld [vmem:[%s3410_s11 + $0xe9] sm:$0xff]  ;;  %v4334_v21 = vmul.f32 %v3643_v44, %v4299_v15  ;;  %v4376_v40 = vld [vmem:[%s5172_s3] ss:$0 sm:$0xff] }
 0x1df   : >> { %5514 = vst [vmem:[#allocation39_spill] sm:$0xff] %v4304_v36  ;;  %v1604_v37 = vadd.f32 %v1588_v62, %v1548_v43  ;;  %v4322_v62 = vmul.f32 %v3628_v45, %v4287_v55  ;;  %v1272_v50 = vadd.f32 %v1256_v63, %v1219_v49  ;;  %v1159_v1 = vmul.f32 %v4339_v3, %v4304_v36  ;;  %v757_v63 = vld [vmem:[%s3410_s11 + $0x46] sm:$0xff]  ;;  %v4634_v15 = vld [vmem:[%s3410_s11 + $0xf0] sm:$0xff] }
 0x1e0   : >> { %5515 = vst [vmem:[#allocation25_spill] sm:$0xff] %v4311_v59  ;;  %v2022_v10 = vadd.f32 %v2006_v29, %v1969_v4  ;;  %v1069_v29 = vadd.f32 %v1053_v6, %v1013_v58  ;;  %v4347_v56 = vmul.f32 %v5464_v41, %v4311_v59  ;;  %v1418_v43 = vmul.f32 %v3516_v20, %v4065_v11  ;;  %v4352_v8 = vld [vmem:[%s3410_s11 + $0xea] sm:$0xff]  ;;  %v4362_v41 = vld [vmem:[%s5172_s3 + $0x8] ss:$0 sm:$0xff] }
 0x1e1   : >> { %5516 = vst [vmem:[#allocation42_spill] sm:$0xff] %v4325_v12  ;;  %v1657_v39 = vadd.f32 %v1641_v51, %v1604_v37  ;;  %v1328_v51 = vadd.f32 %v1312_v18, %v1272_v50  ;;  %v809_v47 = vld [vmem:[%s3410_s11 + $0x47] sm:$0xff]  ;;  %v4357_v4 = vmul.f32 %v5468_v13, %v4325_v12  ;;  %v1471_v13 = vmul.f32 %v3529_v26, %v4076_v23  ;;  %v4393_v50 = vld [vmem:[%s5172_s3 + $0x1] ss:$0 sm:$0xff] }
 0x1e2   : >> { %5517 = vst [vmem:[#allocation29_spill] sm:$0xff] %v4330_v2  ;;  %v2075_v16 = vadd.f32 %v4230_v24, %v2022_v10  ;;  %v1122_v14 = vadd.f32 %v1106_v38, %v1069_v29  ;;  %v1212_v24 = vmul.f32 %v4362_v41, %v4330_v2  ;;  %v4367_v49 = vld [vmem:[%s3410_s11 + $0x106] sm:$0xff]  ;;  %v777_v18 = vmul.f32 %v4376_v40, %v757_v63  ;;  %v4409_v63 = vld [vmem:[%s5172_s3 + $0x2] ss:$0 sm:$0xff] }
 0x1e3   : >> { %5518 = vst [vmem:[#allocation32_spill] sm:$0xff] %v4352_v8  ;;  %v1710_v6 = vadd.f32 %v1694_v27, %v1657_v39  ;;  %v862_v20 = vld [vmem:[%s3410_s11 + $0x48] sm:$0xff]  ;;  %v1381_v27 = vadd.f32 %v1365_v48, %v1328_v51  ;;  %v830_v48 = vmul.f32 %v4393_v50, %v809_v47  ;;  %v1524_v39 = vmul.f32 %v3547_v31, %v4087_v52 }
 0x1e4   : >> { %5519 = vst [vmem:[#allocation30_spill] sm:$0xff] %v4367_v49  ;;  %v2095_v11 = vadd.f32 %v3881_v30, %v2075_v16  ;;  %v915_v37 = vld [vmem:[%s3410_s11 + $0x49] sm:$0xff]  ;;  %v1175_v38 = vadd.f32 %v1159_v1, %v1122_v14  ;;  %v883_v16 = vmul.f32 %v4409_v63, %v862_v20  ;;  %v1633_v20 = vmul.f32 %v3560_v34, %v5451_v53 }
 0x1e5   : >> { %v1763_v58 = vadd.f32 %v1747_v54, %v1710_v6  ;;  %v4383_v10 = vld [vmem:[%s5172_s3 + $0x9] ss:$0 sm:$0xff]  ;;  %v1434_v54 = vadd.f32 %v1418_v43, %v1381_v27  ;;  %v4402_v29 = vld [vmem:[%s5172_s3 + $0xa] ss:$0 sm:$0xff]  ;;  %v846_v47 = vadd.f32 %v830_v48, %v777_v18  ;;  %v4419_v6 = vld [vmem:[%s5172_s3 + $0x3] ss:$0 sm:$0xff]  ;;  %v1580_v27 = vmul.f32 %v3552_v32, %v5448_v19 }
 0x1e6   : >> { %v1265_v26 = vmul.f32 %v4383_v10, %v4352_v8  ;;  %v4388_v23 = vld [vmem:[%s3410_s11 + $0x107] sm:$0xff]  ;;  %2896 = vmatmul.msk.f32.gmra.mxu0 %vm306_vm2, %v2095_v11  ;;  %v1321_v1 = vmul.f32 %v4402_v29, %v4367_v49  ;;  %v1228_v31 = vadd.f32 %v1212_v24, %v1175_v38  ;;  %v936_v14 = vmul.f32 %v4419_v6, %v915_v37  ;;  %v4443_v19 = vld [vmem:[%s5172_s3 + $0x4] ss:$0 sm:$0xff]  ;;  %v4449_v38 = vld [vmem:[%s5172_s3 + $0x11] ss:$0 sm:$0xff] }
 0x1e7   : >> { %5520 = vst [vmem:[#allocation43_spill] sm:$0xff] %v4388_v23  ;;  %v968_v51 = vld [vmem:[%s3410_s11 + $0x4a] sm:$0xff]  ;;  %v1816_v43 = vadd.f32 %v1800_v7, %v1763_v58  ;;  %v1487_v11 = vadd.f32 %v1471_v13, %v1434_v54  ;;  %v899_v34 = vadd.f32 %v883_v16, %v846_v47  ;;  %v2260_v47 = vld [vmem:[%s3540_s17 + $0x60] sm:$0xff] }
 0x1e8   : >> { %v4414_v52 = vld [vmem:[%s3410_s11 + $0x108] sm:$0xff]  ;;  %v1281_v37 = vadd.f32 %v1265_v26, %v1228_v31  ;;  %v989_v53 = vmul.f32 %v4443_v19, %v968_v51  ;;  %v5524_v26 = vld [vmem:[#allocation34_spill] sm:$0xff]  ;;  %2924 = vmatmul.msk.f32.gmra.mxu3 %vm306_vm2, %v2260_v47  ;;  %5556 = vst [vmem:[#allocation63_spill] sm:$0xff] %v4634_v15 }
 0x1e9   : >> { %5521 = vst [vmem:[#allocation11_spill] sm:$0xff] %v4414_v52  ;;  %v4429_v7 = vld [vmem:[%s5172_s3 + $0xb] ss:$0 sm:$0xff]  ;;  %v1872_v13 = vadd.f32 %v4308_v42, %v1816_v43  ;;  %v1540_v58 = vadd.f32 %v1524_v39, %v1487_v11  ;;  %v1686_v42 = vmul.f32 %v4449_v38, %v5461_v25  ;;  %v1739_v48 = vmul.f32 %v3588_v61, %v5524_v26  ;;  %v4458_v54 = vld [vmem:[%s5172_s3 + $0xc] ss:$0 sm:$0xff]  ;;  %v2251_v25 = vld [vmem:[%s3540_s17 + $0x18] sm:$0xff] }
 0x1ea   : >> { %v1374_v24 = vmul.f32 %v4429_v7, %v4388_v23  ;;  %v4434_v18 = vld [vmem:[%s3410_s11 + $0x66] sm:$0xff]  ;;  %v1427_v39 = vmul.f32 %v4458_v54, %v4414_v52  ;;  %v1337_v43 = vadd.f32 %v1321_v1, %v1281_v37  ;;  %v952_v61 = vadd.f32 %v936_v14, %v899_v34  ;;  %2915 = vmatmul.msk.f32.gmra.mxu1 %vm306_vm2, %v2251_v25  ;;  %v4496_v34 = vld [vmem:[%s5172_s3 + $0x14] ss:$0 sm:$0xff] }
 0x1eb   : >> { %5522 = vst [vmem:[#allocation44_spill] sm:$0xff] %v4434_v18  ;;  %v4438_v32 = vld [vmem:[%s3410_s11 + $0x109] sm:$0xff]  ;;  %v1925_v51 = vadd.f32 %v4322_v62, %v1872_v13  ;;  %v1045_v11 = vmul.f32 %v4292_v35, %v4434_v18  ;;  %v1596_v26 = vadd.f32 %v1580_v27, %v1540_v58  ;;  %v5527_v23 = vld [vmem:[#allocation35_spill] sm:$0xff] }
 0x1ec   : >> { %5523 = vst [vmem:[#allocation46_spill] sm:$0xff] %v4438_v32  ;;  %v4463_v16 = vld [vmem:[%s3410_s11 + $0x67] sm:$0xff]  ;;  %v1792_v12 = vmul.f32 %v3600_v9, %v5527_v23  ;;  %v1390_v27 = vadd.f32 %v1374_v24, %v1337_v43  ;;  %v1005_v9 = vadd.f32 %v989_v53, %v952_v61 }
 0x1ed   : >> { %5525 = vst [vmem:[#allocation31_spill] sm:$0xff] %v4463_v16  ;;  %v4467_v31 = vld [vmem:[%s3410_s11 + $0x10a] sm:$0xff]  ;;  %v1978_v14 = vadd.f32 %v4334_v21, %v1925_v51  ;;  %v1098_v23 = vmul.f32 %v4316_v33, %v4463_v16  ;;  %v1649_v37 = vadd.f32 %v1633_v20, %v1596_v26  ;;  %v5531_v21 = vld [vmem:[#allocation47_spill] sm:$0xff] }
 0x1ee   : >> { %5526 = vst [vmem:[#allocation48_spill] sm:$0xff] %v4467_v31  ;;  %v4478_v52 = vld [vmem:[%s5172_s3 + $0xd] ss:$0 sm:$0xff]  ;;  %v4491_v13 = vld [vmem:[%s3410_s11 + $0xce] sm:$0xff]  ;;  %v1901_v24 = vmul.f32 %v3628_v45, %v5531_v21  ;;  %v1443_v47 = vadd.f32 %v1427_v39, %v1390_v27  ;;  %v1061_v61 = vadd.f32 %v1045_v11, %v1005_v9 }
 0x1ef   : >> { %v1480_v62 = vmul.f32 %v4478_v52, %v4438_v32  ;;  %v4485_v1 = vld [vmem:[%s3410_s11 + $0x68] sm:$0xff]  ;;  %5529 = vst [vmem:[#allocation49_spill] sm:$0xff] %v4491_v13  ;;  %v2031_v43 = vadd.f32 %v4347_v56, %v1978_v14  ;;  %v4519_v45 = vld [vmem:[%s3410_s11 + $0xd0] sm:$0xff]  ;;  %v1702_v21 = vadd.f32 %v1686_v42, %v1649_v37  ;;  %v786_v14 = vmul.f32 %v4376_v40, %v4491_v13 }
 0x1f0   : >> { %5528 = vst [vmem:[#allocation26_spill] sm:$0xff] %v4485_v1  ;;  %v5530_v58 = vld [vmem:[#allocation40_spill] sm:$0xff]  ;;  %v1151_v26 = vmul.f32 %v4339_v3, %v4485_v1  ;;  %v5536_v56 = vld [vmem:[#allocation17_spill] sm:$0xff]  ;;  %v1114_v9 = vadd.f32 %v1098_v23, %v1061_v61 }
 0x1f1   : >> { %v1848_v25 = vmul.f32 %v4496_v34, %v5530_v58  ;;  %v4505_v53 = vld [vmem:[%s5172_s3 + $0xe] ss:$0 sm:$0xff]  ;;  %v4516_v58 = vld [vmem:[%s3410_s11 + $0xcf] sm:$0xff]  ;;  %5534 = vst [vmem:[#allocation50_spill] sm:$0xff] %v4519_v45  ;;  %v2084_v27 = vadd.f32 %v4357_v4, %v2031_v43  ;;  %v1496_v42 = vadd.f32 %v1480_v62, %v1443_v47  ;;  %v1755_v37 = vadd.f32 %v1739_v48, %v1702_v21  ;;  %v4549_v32 = vld [vmem:[%s3410_s11 + $0x86] sm:$0xff] }
 0x1f2   : >> { %v1533_v20 = vmul.f32 %v4505_v53, %v4467_v31  ;;  %v4510_v51 = vld [vmem:[%s3410_s11 + $0x69] sm:$0xff]  ;;  %5533 = vst [vmem:[#allocation56_spill] sm:$0xff] %v4516_v58  ;;  %v839_v4 = vmul.f32 %v4393_v50, %v4516_v58  ;;  %v892_v62 = vmul.f32 %v4409_v63, %v4519_v45  ;;  %v1167_v43 = vadd.f32 %v1151_v26, %v1114_v9  ;;  %v4559_v61 = vld [vmem:[%s3410_s11 + $0xd2] sm:$0xff] }
 0x1f3   : >> { %5532 = vst [vmem:[#allocation27_spill] sm:$0xff] %v4510_v51  ;;  %v5535_v16 = vld [vmem:[#allocation52_spill] sm:$0xff]  ;;  %v5539_v1 = vld [vmem:[#allocation53_spill] sm:$0xff]  ;;  %v2104_v23 = vadd.f32 %v3881_v30, %v2084_v27  ;;  %v5542_v58 = vld [vmem:[#allocation54_spill] sm:$0xff] }
 0x1f4   : >> { %v1954_v18 = vmul.f32 %v3643_v44, %v5535_v16  ;;  %v4526_v31 = vld [vmem:[%s5172_s3 + $0xf] ss:$0 sm:$0xff]  ;;  %v1204_v44 = vmul.f32 %v4362_v41, %v4510_v51  ;;  %v4539_v16 = vld [vmem:[%s3410_s11 + $0xd1] sm:$0xff]  ;;  %5540 = vst [vmem:[#allocation58_spill] sm:$0xff] %v4549_v32  ;;  %v1549_v48 = vadd.f32 %v1533_v20, %v1496_v42  ;;  %v4569_v27 = vld [vmem:[%s3410_s11 + $0x87] sm:$0xff]  ;;  %v855_v20 = vadd.f32 %v839_v4, %v786_v14 }
 0x1f5   : >> { %v1589_v39 = vmul.f32 %v4526_v31, %v5536_v56  ;;  %v4531_v11 = vld [vmem:[%s3410_s11 + $0x6a] sm:$0xff]  ;;  %5538 = vst [vmem:[#allocation51_spill] sm:$0xff] %v4539_v16  ;;  %v4564_v21 = vld [vmem:[%s5172_s3 + $0x17] ss:$0 sm:$0xff]  ;;  %v945_v26 = vmul.f32 %v4419_v6, %v4539_v16  ;;  %2905 = vmatmul.msk.f32.gmra.mxu2 %vm306_vm2, %v2104_v23  ;;  %v4584_v14 = vld [vmem:[%s5172_s3 + $0x18] ss:$0 sm:$0xff] }
 0x1f6   : >> { %5537 = vst [vmem:[#allocation57_spill] sm:$0xff] %v4531_v11  ;;  %v4544_v56 = vld [vmem:[%s5172_s3 + $0x10] ss:$0 sm:$0xff]  ;;  %v1257_v47 = vmul.f32 %v4383_v10, %v4531_v11  ;;  %v2007_v45 = vmul.f32 %v4564_v21, %v5542_v58  ;;  %v1313_v11 = vmul.f32 %v4402_v29, %v4549_v32  ;;  %v5546_v4 = vld [vmem:[#allocation55_spill] sm:$0xff]  ;;  %v4619_v59 = vld [vmem:[%s3410_s11 + $0x148] sm:$0xff] }
 0x1f7   : >> { %v1642_v13 = vmul.f32 %v4544_v56, %v5539_v1  ;;  %5541 = vst [vmem:[#allocation3_spill] sm:$0xff] %v4559_v61  ;;  %v1808_v1 = vadd.f32 %v1792_v12, %v1755_v37  ;;  %v1605_v42 = vadd.f32 %v1589_v39, %v1549_v48  ;;  %v5544_v12 = vld [vmem:[#allocation18_spill] sm:$0xff]  ;;  %v1220_v37 = vadd.f32 %v1204_v44, %v1167_v43  ;;  %v4579_v51 = vld [vmem:[%s3410_s11 + $0xee] sm:$0xff]  ;;  %v4589_v23 = vld [vmem:[%s3410_s11 + $0x146] sm:$0xff] }
 0x1f8   : >> { %5543 = vst [vmem:[#allocation4_spill] sm:$0xff] %v4569_v27  ;;  %v1695_v9 = vmul.f32 %v4449_v38, %v5544_v12  ;;  %v2060_v39 = vmul.f32 %v4584_v14, %v5546_v4  ;;  %v4592_v44 = vld [vmem:[%s3410_s11 + $0x88] sm:$0xff]  ;;  %v908_v48 = vadd.f32 %v892_v62, %v855_v20  ;;  %v998_v43 = vmul.f32 %v4443_v19, %v4559_v61 }
 0x1f9   : >> { %5545 = vst [vmem:[#allocation60_spill] sm:$0xff] %v4579_v51  ;;  %v1864_v58 = vadd.f32 %v1848_v25, %v1808_v1  ;;  %v1658_v12 = vadd.f32 %v1642_v13, %v1605_v42  ;;  %v4599_v25 = vld [vmem:[%s5172_s3 + $0x12] ss:$0 sm:$0xff]  ;;  %v5549_v1 = vld [vmem:[#allocation19_spill] sm:$0xff]  ;;  %v1273_v32 = vadd.f32 %v1257_v47, %v1220_v37  ;;  %v1366_v62 = vmul.f32 %v4429_v7, %v4569_v27  ;;  %v4614_v13 = vld [vmem:[%s5172_s3 + $0x13] ss:$0 sm:$0xff] }
 0x1fa   : >> { %5547 = vst [vmem:[#allocation59_spill] sm:$0xff] %v4589_v23  ;;  %v1748_v16 = vmul.f32 %v4599_v25, %v5549_v1  ;;  %v4604_v4 = vld [vmem:[%s3410_s11 + $0x147] sm:$0xff]  ;;  %v4609_v20 = vld [vmem:[%s3410_s11 + $0xef] sm:$0xff]  ;;  %v961_v47 = vadd.f32 %v945_v26, %v908_v48  ;;  %v1054_v37 = vmul.f32 %v4292_v35, %v4579_v51  ;;  %v1419_v60 = vmul.f32 %v4458_v54, %v4592_v44 }
 0x1fb   : >> { %5548 = vst [vmem:[#allocation62_spill] sm:$0xff] %v4592_v44  ;;  %v1917_v61 = vadd.f32 %v1901_v24, %v1864_v58  ;;  %v5552_v42 = vld [vmem:[#allocation23_spill] sm:$0xff]  ;;  %v4622_v49 = vld [vmem:[%s3410_s11 + $0x89] sm:$0xff]  ;;  %v1711_v27 = vadd.f32 %v1695_v9, %v1658_v12  ;;  %v1857_v24 = vmul.f32 %v4496_v34, %v4589_v23  ;;  %v1329_v58 = vadd.f32 %v1313_v11, %v1273_v32  ;;  %v4639_v26 = vld [vmem:[%s5172_s3 + $0x15] ss:$0 sm:$0xff] }
 0x1fc   : >> { %5550 = vst [vmem:[#allocation65_spill] sm:$0xff] %v4604_v4  ;;  %v1801_v1 = vmul.f32 %v4614_v13, %v5552_v42  ;;  %v4631_v42 = vld [vmem:[%s3410_s11 + $0x8a] sm:$0xff]  ;;  %v1910_v9 = vmul.f32 %v4639_v26, %v4604_v4  ;;  %v1014_v11 = vadd.f32 %v998_v43, %v961_v47  ;;  %v1107_v48 = vmul.f32 %v4316_v33, %v4609_v20 }
 0x1fd   : >> { %5551 = vst [vmem:[#allocation61_spill] sm:$0xff] %v4609_v20  ;;  %v1970_v8 = vadd.f32 %v1954_v18, %v1917_v61  ;;  %v4644_v32 = vld [vmem:[%s3410_s11 + $0xa6] sm:$0xff]  ;;  %v758_v12 = vld [vmem:[%s3410_s11 + $0x4e] sm:$0xff]  ;;  %v1764_v23 = vadd.f32 %v1748_v16, %v1711_v27  ;;  %v4652_v18 = vld [vmem:[%s5172_s3 + $0x16] ss:$0 sm:$0xff]  ;;  %v1382_v4 = vadd.f32 %v1366_v62, %v1329_v58  ;;  %v1472_v51 = vmul.f32 %v4478_v52, %v4622_v49 }
 0x1fe   : >> { %5553 = vst [vmem:[#allocation5_spill] sm:$0xff] %v4619_v59  ;;  %v1963_v61 = vmul.f32 %v4652_v18, %v4619_v59  ;;  %v4659_v43 = vld [vmem:[%s3410_s11 + $0xf1] sm:$0xff]  ;;  %v1525_v16 = vmul.f32 %v4505_v53, %v4631_v42  ;;  %v1070_v27 = vadd.f32 %v1054_v37, %v1014_v11  ;;  %v1160_v44 = vmul.f32 %v4339_v3, %v4634_v15  ;;  %v4675_v37 = vld [vmem:[%s3410_s11 + $0x149] sm:$0xff] }
 0x1ff   : >> { %5554 = vst [vmem:[#allocation69_spill] sm:$0xff] %v4622_v49  ;;  %v810_v47 = vld [vmem:[%s3410_s11 + $0x4f] sm:$0xff]  ;;  %v2023_v20 = vadd.f32 %v2007_v45, %v1970_v8  ;;  %v1817_v58 = vadd.f32 %v1801_v1, %v1764_v23  ;;  %v1435_v59 = vadd.f32 %v1419_v60, %v1382_v4  ;;  %v1581_v49 = vmul.f32 %v4526_v31, %v4644_v32  ;;  %v4678_v11 = vld [vmem:[%s3410_s11 + $0xa7] sm:$0xff] }
 0x200   : >> { %5555 = vst [vmem:[#allocation6_spill] sm:$0xff] %v4631_v42  ;;  %v863_v62 = vld [vmem:[%s3410_s11 + $0x50] sm:$0xff]  ;;  %v778_v8 = vmul.f32 %v4376_v40, %v758_v12  ;;  %v1123_v15 = vadd.f32 %v1107_v48, %v1070_v27  ;;  %v1213_v55 = vmul.f32 %v4362_v41, %v4659_v43  ;;  %v831_v23 = vmul.f32 %v4393_v50, %v810_v47 }
 0x201   : >> { %5557 = vst [vmem:[#allocation7_spill] sm:$0xff] %v4644_v32  ;;  %v916_v45 = vld [vmem:[%s3410_s11 + $0x51] sm:$0xff]  ;;  %v2076_v42 = vadd.f32 %v2060_v39, %v2023_v20  ;;  %v1873_v60 = vadd.f32 %v1857_v24, %v1817_v58  ;;  %v1488_v4 = vadd.f32 %v1472_v51, %v1435_v59  ;;  %v1266_v1 = vmul.f32 %v4383_v10, %v4667_v57  ;;  %v4695_v32 = vld [vmem:[%s3410_s11 + $0xa8] sm:$0xff] }
 0x202   : >> { %5558 = vst [vmem:[#allocation72_spill] sm:$0xff] %v4659_v43  ;;  %v4686_v12 = vld [vmem:[%s3410_s11 + $0x10e] sm:$0xff]  ;;  %v884_v39 = vmul.f32 %v4409_v63, %v863_v62  ;;  %v1176_v47 = vadd.f32 %v1160_v44, %v1123_v15  ;;  %v847_v24 = vadd.f32 %v831_v23, %v778_v8  ;;  %v937_v59 = vmul.f32 %v4419_v6, %v916_v45 }
 0x203   : >> { %5560 = vst [vmem:[#allocation9_spill] sm:$0xff] %v4686_v12  ;;  %v969_v20 = vld [vmem:[%s3410_s11 + $0x52] sm:$0xff]  ;;  %v2096_v48 = vadd.f32 %v3881_v30, %v2076_v42  ;;  %v4692_v27 = vld [vmem:[%s3410_s11 + $0x14a] sm:$0xff]  ;;  %v1926_v51 = vadd.f32 %v1910_v9, %v1873_v60  ;;  %v2016_v58 = vmul.f32 %v4564_v21, %v4675_v37  ;;  %v1541_v57 = vadd.f32 %v1525_v16, %v1488_v4 }
 0x204   : >> { %5561 = vst [vmem:[#allocation64_spill] sm:$0xff] %v4692_v27  ;;  %v1634_v62 = vmul.f32 %v4544_v56, %v4678_v11  ;;  %v4703_v30 = vld [vmem:[%s3410_s11 + $0x10f] sm:$0xff]  ;;  %v1229_v44 = vadd.f32 %v1213_v55, %v1176_v47  ;;  %v1322_v9 = vmul.f32 %v4402_v29, %v4686_v12  ;;  %v900_v8 = vadd.f32 %v884_v39, %v847_v24 }
 0x205   : >> { %5562 = vst [vmem:[#allocation10_spill] sm:$0xff] %v4695_v32  ;;  %v4706_v42 = vld [vmem:[%s3410_s11 + $0x6e] sm:$0xff]  ;;  %2897 = vmatmul.msk.f32.gmra.mxu0 %vm306_vm2, %v2096_v48  ;;  %v990_v16 = vmul.f32 %v4443_v19, %v969_v20  ;;  %v1979_v45 = vadd.f32 %v1963_v61, %v1926_v51  ;;  %v2069_v23 = vmul.f32 %v4584_v14, %v4692_v27 }
 0x206   : >> { %5563 = vst [vmem:[#allocation45_spill] sm:$0xff] %v4706_v42  ;;  %v4710_v15 = vld [vmem:[%s3410_s11 + $0xa9] sm:$0xff]  ;;  %v1597_v60 = vadd.f32 %v1581_v49, %v1541_v57  ;;  %v1687_v4 = vmul.f32 %v4449_v38, %v4695_v32  ;;  %v1282_v39 = vadd.f32 %v1266_v1, %v1229_v44  ;;  %v1375_v20 = vmul.f32 %v4429_v7, %v4703_v30  ;;  %v4735_v32 = vld [vmem:[%s3410_s11 + $0x111] sm:$0xff]  ;;  %v2252_v44 = vld [vmem:[%s3540_s17 + $0x20] sm:$0xff] }
 0x207   : >> { %v4720_v48 = vld [vmem:[%s3410_s11 + $0x110] sm:$0xff]  ;;  %v953_v61 = vadd.f32 %v937_v59, %v900_v8  ;;  %v1046_v57 = vmul.f32 %v4292_v35, %v4706_v42  ;;  %v2032_v49 = vadd.f32 %v2016_v58, %v1979_v45  ;;  %v1740_v51 = vmul.f32 %v4599_v25, %v4710_v15  ;;  %5565 = vst [vmem:[#allocation13_spill] sm:$0xff] %v4735_v32  ;;  %v2261_v59 = vld [vmem:[%s3540_s17 + $0x68] sm:$0xff] }
 0x208   : >> { %v4723_v55 = vld [vmem:[%s3410_s11 + $0x6f] sm:$0xff]  ;;  %v1650_v24 = vadd.f32 %v1634_v62, %v1597_v60  ;;  %v1338_v12 = vadd.f32 %v1322_v9, %v1282_v39  ;;  %v1428_v1 = vmul.f32 %v4458_v54, %v4720_v48  ;;  %2916 = vmatmul.msk.f32.gmra.mxu1 %vm306_vm2, %v2252_v44  ;;  %2925 = vmatmul.msk.f32.gmra.mxu3 %vm306_vm2, %v2261_v59 }
 0x209   : >> { %5564 = vst [vmem:[#allocation12_spill] sm:$0xff] %v4723_v55  ;;  %v4726_v47 = vld [vmem:[%s3410_s11 + $0xaa] sm:$0xff]  ;;  %v1006_v8 = vadd.f32 %v990_v16, %v953_v61  ;;  %v1099_v42 = vmul.f32 %v4316_v33, %v4723_v55  ;;  %v2085_v58 = vadd.f32 %v2069_v23, %v2032_v49  ;;  %v4749_v60 = vld [vmem:[%s3410_s11 + $0x112] sm:$0xff]  ;;  %v1481_v16 = vmul.f32 %v4478_v52, %v4735_v32 }
 0x20a   : >> { %v4738_v27 = vld [vmem:[%s3410_s11 + $0x70] sm:$0xff]  ;;  %v1703_v62 = vadd.f32 %v1687_v4, %v1650_v24  ;;  %v1793_v45 = vmul.f32 %v4614_v13, %v4726_v47  ;;  %5567 = vst [vmem:[#allocation67_spill] sm:$0xff] %v4749_v60  ;;  %v1391_v39 = vadd.f32 %v1375_v20, %v1338_v12  ;;  %v4763_v4 = vld [vmem:[%s5173_s4] ss:$0 sm:$0xff]  ;;  %v1849_v44 = vmul.f32 %v4496_v34, %v4221_v22  ;;  %v2253_v32 = vld [vmem:[%s3540_s17 + $0x28] sm:$0xff] }
 0x20b   : >> { %5566 = vst [vmem:[#allocation66_spill] sm:$0xff] %v4738_v27  ;;  %v4754_v9 = vld [vmem:[%s3410_s11 + $0x71] sm:$0xff]  ;;  %v1062_v61 = vadd.f32 %v1046_v57, %v1006_v8  ;;  %v1152_v23 = vmul.f32 %v4339_v3, %v4738_v27  ;;  %v2105_v49 = vadd.f32 %v4763_v4, %v2085_v58  ;;  %v1902_v12 = vmul.f32 %v4639_v26, %v4224_v0  ;;  %v5599_v22 = vld [vmem:[#allocation27_spill] sm:$0xff] }
 0x20c   : >> { %5568 = vst [vmem:[#allocation68_spill] sm:$0xff] %v4754_v9  ;;  %v1756_v24 = vadd.f32 %v1740_v51, %v1703_v62  ;;  %v4771_v20 = vld [vmem:[%s3410_s11 + $0x72] sm:$0xff]  ;;  %v1444_v57 = vadd.f32 %v1428_v1, %v1391_v39  ;;  %v1534_v59 = vmul.f32 %v4505_v53, %v4749_v60  ;;  %v1205_v27 = vmul.f32 %v4362_v41, %v4754_v9 }
 0x20d   : >> { %5569 = vst [vmem:[#allocation70_spill] sm:$0xff] %v4771_v20  ;;  %v1115_v8 = vadd.f32 %v1099_v42, %v1062_v61  ;;  %2906 = vmatmul.msk.f32.gmra.mxu2 %vm306_vm2, %v2105_v49  ;;  %v1590_v58 = vmul.f32 %v4526_v31, %v4277_v17  ;;  %v4781_v62 = vld [vmem:[%s3410_s11 + $0x8e] sm:$0xff]  ;;  %v787_v0 = vmul.f32 %v4376_v40, %v4268_v46 }
 0x20e   : >> { %v1809_v51 = vadd.f32 %v1793_v45, %v1756_v24  ;;  %5570 = vst [vmem:[#allocation15_spill] sm:$0xff] %v4781_v62  ;;  %v840_v1 = vmul.f32 %v4393_v50, %v4282_v5  ;;  %v1497_v39 = vadd.f32 %v1481_v16, %v1444_v57  ;;  %v1258_v61 = vmul.f32 %v4383_v10, %v4771_v20  ;;  %v4794_v24 = vld [vmem:[%s3410_s11 + $0x8f] sm:$0xff]  ;;  %v5572_v16 = vld [vmem:[#allocation38_spill] sm:$0xff] }
 0x20f   : >> { %v1168_v42 = vadd.f32 %v1152_v23, %v1115_v8  ;;  %v893_v45 = vmul.f32 %v4409_v63, %v4304_v36  ;;  %v1955_v17 = vmul.f32 %v4652_v18, %v4237_v28  ;;  %5571 = vst [vmem:[#allocation71_spill] sm:$0xff] %v4794_v24  ;;  %v946_v46 = vmul.f32 %v4419_v6, %v4330_v2  ;;  %v4805_v28 = vld [vmem:[%s3410_s11 + $0x90] sm:$0xff] }
 0x210   : >> { %v1865_v49 = vadd.f32 %v1849_v44, %v1809_v51  ;;  %v856_v60 = vadd.f32 %v840_v1, %v787_v0  ;;  %v1550_v5 = vadd.f32 %v1534_v59, %v1497_v39  ;;  %v1643_v23 = vmul.f32 %v4544_v56, %v5572_v16  ;;  %v5573_v51 = vld [vmem:[#allocation36_spill] sm:$0xff]  ;;  %5574 = vst [vmem:[#allocation73_spill] sm:$0xff] %v4805_v28  ;;  %v4833_v9 = vld [vmem:[%s3410_s11 + $0x92] sm:$0xff] }
 0x211   : >> { %v1221_v57 = vadd.f32 %v1205_v27, %v1168_v42  ;;  %v1314_v8 = vmul.f32 %v4402_v29, %v4781_v62  ;;  %v2008_v36 = vmul.f32 %v4564_v21, %v5573_v51  ;;  %v5575_v1 = vld [vmem:[#allocation32_spill] sm:$0xff]  ;;  %5584 = vst [vmem:[#allocation34_spill] sm:$0xff] %v4833_v9  ;;  %v2262_v55 = vld [vmem:[%s3540_s17 + $0x70] sm:$0xff]  ;;  %2917 = vmatmul.msk.f32.gmra.mxu1 %vm306_vm2, %v2253_v32 }
 0x212   : >> { %v1918_v44 = vadd.f32 %v1902_v12, %v1865_v49  ;;  %v909_v0 = vadd.f32 %v893_v45, %v856_v60  ;;  %v999_v2 = vmul.f32 %v4443_v19, %v5575_v1  ;;  %v1606_v59 = vadd.f32 %v1590_v58, %v1550_v5  ;;  %v5576_v39 = vld [vmem:[#allocation24_spill] sm:$0xff]  ;;  %v5577_v49 = vld [vmem:[#allocation21_spill] sm:$0xff]  ;;  %v5580_v1 = vld [vmem:[#allocation30_spill] sm:$0xff]  ;;  %2926 = vmatmul.msk.f32.gmra.mxu3 %vm306_vm2, %v2262_v55 }
 0x213   : >> { %v1696_v20 = vmul.f32 %v4449_v38, %v5576_v39  ;;  %v1274_v27 = vadd.f32 %v1258_v61, %v1221_v57  ;;  %v1367_v12 = vmul.f32 %v4429_v7, %v4794_v24  ;;  %v2061_v16 = vmul.f32 %v4584_v14, %v5577_v49  ;;  %v4816_v51 = vld [vmem:[%s3410_s11 + $0x14e] sm:$0xff]  ;;  %v5583_v49 = vld [vmem:[#allocation42_spill] sm:$0xff] }
 0x214   : >> { %v1971_v42 = vadd.f32 %v1955_v17, %v1918_v44  ;;  %5578 = vst [vmem:[#allocation41_spill] sm:$0xff] %v4816_v51  ;;  %v4819_v60 = vld [vmem:[%s3410_s11 + $0x91] sm:$0xff]  ;;  %v962_v45 = vadd.f32 %v946_v46, %v909_v0  ;;  %v1055_v5 = vmul.f32 %v4292_v35, %v5580_v1  ;;  %v1659_v58 = vadd.f32 %v1643_v23, %v1606_v59  ;;  %v5586_v0 = vld [vmem:[#allocation43_spill] sm:$0xff]  ;;  %v5606_v55 = vld [vmem:[#allocation60_spill] sm:$0xff] }
 0x215   : >> { %5579 = vst [vmem:[#allocation14_spill] sm:$0xff] %v4819_v60  ;;  %v5581_v39 = vld [vmem:[#allocation25_spill] sm:$0xff]  ;;  %v1330_v62 = vadd.f32 %v1314_v8, %v1274_v27  ;;  %v1420_v17 = vmul.f32 %v4458_v54, %v4805_v28  ;;  %v1802_v24 = vmul.f32 %v4614_v13, %v5583_v49  ;;  %v1108_v1 = vmul.f32 %v4316_v33, %v5586_v0  ;;  %v5587_v28 = vld [vmem:[#allocation11_spill] sm:$0xff] }
 0x216   : >> { %v1749_v61 = vmul.f32 %v4599_v25, %v5581_v39  ;;  %v4826_v57 = vld [vmem:[%s3410_s11 + $0x14f] sm:$0xff]  ;;  %v2024_v44 = vadd.f32 %v2008_v36, %v1971_v42  ;;  %v1015_v23 = vadd.f32 %v999_v2, %v962_v45  ;;  %v1712_v59 = vadd.f32 %v1696_v20, %v1659_v58 }
 0x217   : >> { %5582 = vst [vmem:[#allocation16_spill] sm:$0xff] %v4826_v57  ;;  %v4836_v46 = vld [vmem:[%s3410_s11 + $0xae] sm:$0xff]  ;;  %v1858_v8 = vmul.f32 %v4496_v34, %v4816_v51  ;;  %v1383_v27 = vadd.f32 %v1367_v12, %v1330_v62  ;;  %v1473_v36 = vmul.f32 %v4478_v52, %v4819_v60  ;;  %v1911_v49 = vmul.f32 %v4639_v26, %v4826_v57  ;;  %v5594_v51 = vld [vmem:[#allocation31_spill] sm:$0xff] }
 0x218   : >> { %5585 = vst [vmem:[#allocation35_spill] sm:$0xff] %v4836_v46  ;;  %v2077_v42 = vadd.f32 %v2061_v16, %v2024_v44  ;;  %v1071_v39 = vadd.f32 %v1055_v5, %v1015_v23  ;;  %v1161_v2 = vmul.f32 %v4339_v3, %v5587_v28  ;;  %v1765_v45 = vadd.f32 %v1749_v61, %v1712_v59  ;;  %v4849_v20 = vld [vmem:[%s3410_s11 + $0x150] sm:$0xff]  ;;  %v5590_v5 = vld [vmem:[#allocation46_spill] sm:$0xff]  ;;  %v5591_v28 = vld [vmem:[#allocation44_spill] sm:$0xff] }
 0x219   : >> { %5588 = vst [vmem:[#allocation40_spill] sm:$0xff] %v4849_v20  ;;  %v1436_v58 = vadd.f32 %v1420_v17, %v1383_v27  ;;  %v1526_v62 = vmul.f32 %v4505_v53, %v4833_v9  ;;  %v1582_v12 = vmul.f32 %v4526_v31, %v4836_v46  ;;  %v4856_v16 = vld [vmem:[%s3410_s11 + $0xaf] sm:$0xff]  ;;  %v1214_v23 = vmul.f32 %v4362_v41, %v5590_v5  ;;  %v2648_v46 = vld [vmem:[%s3410_s11 + $0x126] sm:$0xff] }
 0x21a   : >> { %5589 = vst [vmem:[#allocation47_spill] sm:$0xff] %v4856_v16  ;;  %v2097_v44 = vadd.f32 %v4763_v4, %v2077_v42  ;;  %v1124_v0 = vadd.f32 %v1108_v1, %v1071_v39  ;;  %v779_v61 = vmul.f32 %v4376_v40, %v5591_v28  ;;  %v1818_v17 = vadd.f32 %v1802_v24, %v1765_v45  ;;  %v4864_v59 = vld [vmem:[%s3410_s11 + $0x151] sm:$0xff] }
 0x21b   : >> { %5592 = vst [vmem:[#allocation52_spill] sm:$0xff] %v4864_v59  ;;  %v1489_v27 = vadd.f32 %v1473_v36, %v1436_v58  ;;  %v4867_v57 = vld [vmem:[%s3410_s11 + $0xb0] sm:$0xff]  ;;  %v832_v42 = vmul.f32 %v4393_v50, %v5594_v51  ;;  %v5595_v1 = vld [vmem:[#allocation26_spill] sm:$0xff]  ;;  %v1964_v5 = vmul.f32 %v4652_v18, %v4849_v20  ;;  %v1635_v24 = vmul.f32 %v4544_v56, %v4856_v16  ;;  %v5596_v36 = vld [vmem:[#allocation48_spill] sm:$0xff] }
 0x21c   : >> { %5593 = vst [vmem:[#allocation17_spill] sm:$0xff] %v4867_v57  ;;  %v885_v39 = vmul.f32 %v4409_v63, %v5595_v1  ;;  %2898 = vmatmul.msk.f32.gmra.mxu0 %vm306_vm2, %v2097_v44  ;;  %v1177_v45 = vadd.f32 %v1161_v2, %v1124_v0  ;;  %v1267_v58 = vmul.f32 %v4383_v10, %v5596_v36  ;;  %v4882_v9 = vld [vmem:[%s3410_s11 + $0x152] sm:$0xff]  ;;  %v2665_v1 = vld [vmem:[%s3410_s11 + $0x127] sm:$0xff] }
 0x21d   : >> { %v1874_v28 = vadd.f32 %v1858_v8, %v1818_v17  ;;  %5597 = vst [vmem:[#allocation53_spill] sm:$0xff] %v4882_v9  ;;  %v1542_v51 = vadd.f32 %v1526_v62, %v1489_v27  ;;  %v4885_v60 = vld [vmem:[%s3410_s11 + $0xb1] sm:$0xff]  ;;  %v848_v44 = vadd.f32 %v832_v42, %v779_v61  ;;  %v938_v20 = vmul.f32 %v4419_v6, %v5599_v22  ;;  %v2682_v27 = vld [vmem:[%s3410_s11 + $0x128] sm:$0xff] }
 0x21e   : >> { %5598 = vst [vmem:[#allocation54_spill] sm:$0xff] %v4885_v60  ;;  %v2017_v16 = vmul.f32 %v4564_v21, %v4864_v59  ;;  %v1688_v2 = vmul.f32 %v4449_v38, %v4867_v57  ;;  %v1230_v0 = vadd.f32 %v1214_v23, %v1177_v45  ;;  %v1323_v8 = vmul.f32 %v4402_v29, %v2648_v46  ;;  %v4896_v62 = vld [vmem:[%s3410_s11 + $0xb2] sm:$0xff]  ;;  %v2699_v45 = vld [vmem:[%s3410_s11 + $0x129] sm:$0xff] }
 0x21f   : >> { %v1927_v17 = vadd.f32 %v1911_v49, %v1874_v28  ;;  %v1598_v36 = vadd.f32 %v1582_v12, %v1542_v51  ;;  %v901_v61 = vadd.f32 %v885_v39, %v848_v44  ;;  %v5600_v42 = vld [vmem:[#allocation57_spill] sm:$0xff]  ;;  %v2070_v59 = vmul.f32 %v4584_v14, %v4882_v9  ;;  %v5601_v51 = vld [vmem:[#allocation58_spill] sm:$0xff] }
 0x220   : >> { %v991_v22 = vmul.f32 %v4443_v19, %v5600_v42  ;;  %v1741_v57 = vmul.f32 %v4599_v25, %v4885_v60  ;;  %v1283_v23 = vadd.f32 %v1267_v58, %v1230_v0  ;;  %v1376_v46 = vmul.f32 %v4429_v7, %v2665_v1  ;;  %v5602_v60 = vld [vmem:[#allocation4_spill] sm:$0xff] }
 0x221   : >> { %v1980_v49 = vadd.f32 %v1964_v5, %v1927_v17  ;;  %v1651_v12 = vadd.f32 %v1635_v24, %v1598_v36  ;;  %v954_v28 = vadd.f32 %v938_v20, %v901_v61  ;;  %v1047_v39 = vmul.f32 %v4292_v35, %v5601_v51  ;;  %v2716_v5 = vld [vmem:[%s3410_s11 + $0x12a] sm:$0xff]  ;;  %v5604_v51 = vld [vmem:[#allocation62_spill] sm:$0xff] }
 0x222   : >> { %v1794_v44 = vmul.f32 %v4614_v13, %v4896_v62  ;;  %v1339_v42 = vadd.f32 %v1323_v8, %v1283_v23  ;;  %v1429_v9 = vmul.f32 %v4458_v54, %v2682_v27  ;;  %v1100_v58 = vmul.f32 %v4316_v33, %v5602_v60  ;;  %v5603_v24 = vld [vmem:[#allocation49_spill] sm:$0xff] }
 0x223   : >> { %v2033_v0 = vadd.f32 %v2017_v16, %v1980_v49  ;;  %v1704_v1 = vadd.f32 %v1688_v2, %v1651_v12  ;;  %v1007_v20 = vadd.f32 %v991_v22, %v954_v28  ;;  %v1850_v17 = vmul.f32 %v4496_v34, %v5603_v24  ;;  %v5605_v16 = vld [vmem:[#allocation56_spill] sm:$0xff] }
 0x224   : >> { %v1392_v36 = vadd.f32 %v1376_v46, %v1339_v42  ;;  %v1482_v8 = vmul.f32 %v4478_v52, %v2699_v45  ;;  %v1153_v60 = vmul.f32 %v4339_v3, %v5604_v51  ;;  %v1903_v2 = vmul.f32 %v4639_v26, %v5605_v16  ;;  %v5607_v45 = vld [vmem:[#allocation69_spill] sm:$0xff] }
 0x225   : >> { %v2086_v27 = vadd.f32 %v2070_v59, %v2033_v0  ;;  %v1757_v61 = vadd.f32 %v1741_v57, %v1704_v1  ;;  %v1063_v23 = vadd.f32 %v1047_v39, %v1007_v20  ;;  %v1535_v32 = vmul.f32 %v4505_v53, %v2716_v5  ;;  %v5608_v39 = vld [vmem:[#allocation59_spill] sm:$0xff]  ;;  %v5609_v0 = vld [vmem:[#allocation61_spill] sm:$0xff] }
 0x226   : >> { %v1445_v49 = vadd.f32 %v1429_v9, %v1392_v36  ;;  %v788_v22 = vmul.f32 %v4376_v40, %v5606_v55  ;;  %v1206_v57 = vmul.f32 %v4362_v41, %v5607_v45  ;;  %v1591_v42 = vmul.f32 %v4526_v31, %v5608_v39  ;;  %v5610_v9 = vld [vmem:[#allocation63_spill] sm:$0xff]  ;;  %v5611_v36 = vld [vmem:[#allocation50_spill] sm:$0xff] }
 0x227   : >> { %v2106_v12 = vadd.f32 %v4763_v4, %v2086_v27  ;;  %v1810_v46 = vadd.f32 %v1794_v44, %v1757_v61  ;;  %v1116_v28 = vadd.f32 %v1100_v58, %v1063_v23  ;;  %v841_v1 = vmul.f32 %v4393_v50, %v5609_v0  ;;  %v5612_v27 = vld [vmem:[#allocation6_spill] sm:$0xff]  ;;  %v5613_v23 = vld [vmem:[#allocation65_spill] sm:$0xff] }
 0x228   : >> { %v1498_v59 = vadd.f32 %v1482_v8, %v1445_v49  ;;  %v894_v5 = vmul.f32 %v4409_v63, %v5610_v9  ;;  %v1956_v44 = vmul.f32 %v4652_v18, %v5611_v36  ;;  %v1259_v8 = vmul.f32 %v4383_v10, %v5612_v27  ;;  %v5615_v9 = vld [vmem:[#allocation7_spill] sm:$0xff]  ;;  %v5616_v0 = vld [vmem:[#allocation5_spill] sm:$0xff]  ;;  %v5617_v27 = vld [vmem:[#allocation8_spill] sm:$0xff] }
 0x229   : >> { %2907 = vmatmul.msk.f32.gmra.mxu2 %vm306_vm2, %v2106_v12  ;;  %v1866_v20 = vadd.f32 %v1850_v17, %v1810_v46  ;;  %v1169_v58 = vadd.f32 %v1153_v60, %v1116_v28  ;;  %v1644_v51 = vmul.f32 %v4544_v56, %v5613_v23  ;;  %v857_v49 = vadd.f32 %v841_v1, %v788_v22  ;;  %v5614_v12 = vld [vmem:[#allocation51_spill] sm:$0xff]  ;;  %v5621_v55 = vld [vmem:[#allocation10_spill] sm:$0xff] }
 0x22a   : >> { %v1551_v61 = vadd.f32 %v1535_v32, %v1498_v59  ;;  %v947_v45 = vmul.f32 %v4419_v6, %v4659_v43  ;;  %v2009_v17 = vmul.f32 %v4564_v21, %v5614_v12  ;;  %v1315_v60 = vmul.f32 %v4402_v29, %v5615_v9  ;;  %v5618_v23 = vld [vmem:[#allocation3_spill] sm:$0xff] }
 0x22b   : >> { %v1919_v39 = vadd.f32 %v1903_v2, %v1866_v20  ;;  %v1222_v46 = vadd.f32 %v1206_v57, %v1169_v58  ;;  %v1697_v32 = vmul.f32 %v4449_v38, %v5616_v0  ;;  %v910_v59 = vadd.f32 %v894_v5, %v857_v49  ;;  %v2822_v2 = vld [vmem:[%s3410_s11 + $0x166] sm:$0xff]  ;;  %v5619_v0 = vld [vmem:[#allocation9_spill] sm:$0xff] }
 0x22c   : >> { %v1607_v28 = vadd.f32 %v1591_v42, %v1551_v61  ;;  %v1000_v22 = vmul.f32 %v4443_v19, %v5617_v27  ;;  %v2062_v43 = vmul.f32 %v4584_v14, %v5618_v23  ;;  %v1368_v57 = vmul.f32 %v4429_v7, %v4678_v11  ;;  %v2839_v9 = vld [vmem:[%s3410_s11 + $0x167] sm:$0xff] }
 0x22d   : >> { %v1972_v1 = vadd.f32 %v1956_v44, %v1919_v39  ;;  %v1275_v20 = vadd.f32 %v1259_v8, %v1222_v46  ;;  %v1750_v42 = vmul.f32 %v4599_v25, %v4675_v37  ;;  %v963_v61 = vadd.f32 %v947_v45, %v910_v59  ;;  %v5620_v27 = vld [vmem:[#allocation64_spill] sm:$0xff] }
 0x22e   : >> { %v1660_v58 = vadd.f32 %v1644_v51, %v1607_v28  ;;  %v1056_v5 = vmul.f32 %v4292_v35, %v5619_v0  ;;  %v1803_v44 = vmul.f32 %v4614_v13, %v5620_v27  ;;  %v1421_v8 = vmul.f32 %v4458_v54, %v5621_v55 }
 0x22f   : >> { %v2025_v49 = vadd.f32 %v2009_v17, %v1972_v1  ;;  %v1331_v39 = vadd.f32 %v1315_v60, %v1275_v20  ;;  %v1859_v11 = vmul.f32 %v4496_v34, %v2822_v2  ;;  %v1016_v51 = vadd.f32 %v1000_v22, %v963_v61  ;;  %v5622_v1 = vld [vmem:[#allocation45_spill] sm:$0xff]  ;;  %v5623_v20 = vld [vmem:[#allocation12_spill] sm:$0xff] }
 0x230   : >> { %v1713_v46 = vadd.f32 %v1697_v32, %v1660_v58  ;;  %v1109_v37 = vmul.f32 %v4316_v33, %v4703_v30  ;;  %v1912_v28 = vmul.f32 %v4639_v26, %v2839_v9  ;;  %v1474_v17 = vmul.f32 %v4478_v52, %v4710_v15  ;;  %v2856_v30 = vld [vmem:[%s3410_s11 + $0x168] sm:$0xff]  ;;  %v5625_v9 = vld [vmem:[#allocation66_spill] sm:$0xff] }
 0x231   : >> { %v2078_v45 = vadd.f32 %v2062_v43, %v2025_v49  ;;  %v1384_v59 = vadd.f32 %v1368_v57, %v1331_v39  ;;  %v1527_v60 = vmul.f32 %v4505_v53, %v4726_v47  ;;  %v1072_v55 = vadd.f32 %v1056_v5, %v1016_v51  ;;  %v2873_v61 = vld [vmem:[%s3410_s11 + $0x169] sm:$0xff] }
 0x232   : >> { %v1766_v27 = vadd.f32 %v1750_v42, %v1713_v46  ;;  %v1162_v32 = vmul.f32 %v4339_v3, %v4720_v48  ;;  %v780_v2 = vmul.f32 %v4376_v40, %v5622_v1  ;;  %v833_v57 = vmul.f32 %v4393_v50, %v5623_v20  ;;  %v5624_v42 = vld [vmem:[#allocation13_spill] sm:$0xff]  ;;  %v5626_v5 = vld [vmem:[#allocation28_spill] sm:$0xff] }
 0x233   : >> { %v2098_v22 = vadd.f32 %v4763_v4, %v2078_v45  ;;  %v1437_v43 = vadd.f32 %v1421_v8, %v1384_v59  ;;  %v1125_v58 = vadd.f32 %v1109_v37, %v1072_v55  ;;  %v1215_v47 = vmul.f32 %v4362_v41, %v5624_v42  ;;  %v2649_v49 = vld [vmem:[%s3410_s11 + $0x12e] sm:$0xff]  ;;  %v5628_v37 = vld [vmem:[#allocation67_spill] sm:$0xff] }
 0x234   : >> { %v1819_v15 = vadd.f32 %v1803_v44, %v1766_v27  ;;  %v886_v48 = vmul.f32 %v4409_v63, %v5625_v9  ;;  %v1583_v40 = vmul.f32 %v4526_v31, %v5626_v5  ;;  %v849_v39 = vadd.f32 %v833_v57, %v780_v2  ;;  %v5627_v50 = vld [vmem:[#allocation68_spill] sm:$0xff]  ;;  %v5631_v20 = vld [vmem:[#allocation33_spill] sm:$0xff] }
 0x235   : >> { %2899 = vmatmul.msk.f32.gmra.mxu0 %vm306_vm2, %v2098_v22  ;;  %v1490_v0 = vadd.f32 %v1474_v17, %v1437_v43  ;;  %v939_v44 = vmul.f32 %v4419_v6, %v5627_v50  ;;  %v1965_v46 = vmul.f32 %v4652_v18, %v2856_v30  ;;  %v1178_v51 = vadd.f32 %v1162_v32, %v1125_v58  ;;  %v2890_v45 = vld [vmem:[%s3410_s11 + $0x16a] sm:$0xff]  ;;  %v5630_v43 = vld [vmem:[#allocation70_spill] sm:$0xff]  ;;  %v5632_v58 = vld [vmem:[#allocation15_spill] sm:$0xff] }
 0x236   : >> { %v1875_v8 = vadd.f32 %v1859_v11, %v1819_v15  ;;  %v1268_v63 = vmul.f32 %v4383_v10, %v5628_v37  ;;  %v5629_v27 = vld [vmem:[#allocation20_spill] sm:$0xff]  ;;  %v902_v22 = vadd.f32 %v886_v48, %v849_v39  ;;  %v992_v1 = vmul.f32 %v4443_v19, %v5630_v43  ;;  %v2700_v5 = vld [vmem:[%s3410_s11 + $0x131] sm:$0xff] }
 0x237   : >> { %v1543_v59 = vadd.f32 %v1527_v60, %v1490_v0  ;;  %v1636_v17 = vmul.f32 %v4544_v56, %v5629_v27  ;;  %v2666_v55 = vld [vmem:[%s3410_s11 + $0x12f] sm:$0xff]  ;;  %v2018_v11 = vmul.f32 %v4564_v21, %v2873_v61  ;;  %v1231_v2 = vadd.f32 %v1215_v47, %v1178_v51  ;;  %v2263_v37 = vld [vmem:[%s3540_s17 + $0x78] sm:$0xff] }
 0x238   : >> { %v1928_v6 = vadd.f32 %v1912_v28, %v1875_v8  ;;  %v1324_v32 = vmul.f32 %v4402_v29, %v2649_v49  ;;  %v1689_v57 = vmul.f32 %v4449_v38, %v5631_v20  ;;  %v2683_v60 = vld [vmem:[%s3410_s11 + $0x130] sm:$0xff]  ;;  %v955_v15 = vadd.f32 %v939_v44, %v902_v22  ;;  %v5633_v61 = vld [vmem:[#allocation36_spill] sm:$0xff]  ;;  %v5634_v49 = vld [vmem:[#allocation71_spill] sm:$0xff]  ;;  %2927 = vmatmul.msk.f32.gmra.mxu3 %vm306_vm2, %v2263_v37 }
 0x239   : >> { %v1599_v30 = vadd.f32 %v1583_v40, %v1543_v59  ;;  %v1048_v42 = vmul.f32 %v4292_v35, %v5632_v58  ;;  %v2071_v19 = vmul.f32 %v4584_v14, %v2890_v45  ;;  %v1284_v28 = vadd.f32 %v1268_v63, %v1231_v2  ;;  %v5635_v44 = vld [vmem:[#allocation21_spill] sm:$0xff]  ;;  %v5638_v2 = vld [vmem:[#allocation14_spill] sm:$0xff] }
 0x23a   : >> { %v1981_v9 = vadd.f32 %v1965_v46, %v1928_v6  ;;  %v1377_v47 = vmul.f32 %v4429_v7, %v2666_v55  ;;  %v1742_v0 = vmul.f32 %v4599_v25, %v5633_v61  ;;  %v1008_v40 = vadd.f32 %v992_v1, %v955_v15  ;;  %v2254_v51 = vld [vmem:[%s3540_s17 + $0x30] sm:$0xff]  ;;  %v5639_v15 = vld [vmem:[#allocation22_spill] sm:$0xff] }
 0x23b   : >> { %v1652_v48 = vadd.f32 %v1636_v17, %v1599_v30  ;;  %v1101_v39 = vmul.f32 %v4316_v33, %v5634_v49  ;;  %v1795_v35 = vmul.f32 %v4614_v13, %v5635_v44  ;;  %v1340_v8 = vadd.f32 %v1324_v32, %v1284_v28  ;;  %v2717_v45 = vld [vmem:[%s3410_s11 + $0x132] sm:$0xff]  ;;  %2918 = vmatmul.msk.f32.gmra.mxu1 %vm306_vm2, %v2254_v51 }
 0x23c   : >> { %v2034_v50 = vadd.f32 %v2018_v11, %v1981_v9  ;;  %v1430_v46 = vmul.f32 %v4458_v54, %v2683_v60  ;;  %v1064_v59 = vadd.f32 %v1048_v42, %v1008_v40  ;;  %v5636_v27 = vld [vmem:[#allocation73_spill] sm:$0xff]  ;;  %v1483_v22 = vmul.f32 %v4478_v52, %v2700_v5  ;;  %v5640_v42 = vld [vmem:[#allocation34_spill] sm:$0xff]  ;;  %v5643_v5 = vld [vmem:[#allocation35_spill] sm:$0xff] }
 0x23d   : >> { %v1705_v63 = vadd.f32 %v1689_v57, %v1652_v48  ;;  %v1154_v17 = vmul.f32 %v4339_v3, %v5636_v27  ;;  %v1393_v55 = vadd.f32 %v1377_v47, %v1340_v8  ;;  %v5637_v1 = vld [vmem:[#allocation37_spill] sm:$0xff]  ;;  %v1207_v32 = vmul.f32 %v4362_v41, %v5638_v2  ;;  %v5642_v48 = vld [vmem:[#allocation39_spill] sm:$0xff]  ;;  %v5648_v27 = vld [vmem:[#allocation32_spill] sm:$0xff] }
 0x23e   : >> { %v2087_v33 = vadd.f32 %v2071_v19, %v2034_v50  ;;  %v1851_v6 = vmul.f32 %v4496_v34, %v5637_v1  ;;  %v1117_v11 = vadd.f32 %v1101_v39, %v1064_v59  ;;  %v1536_v57 = vmul.f32 %v4505_v53, %v2717_v45  ;;  %v5641_v28 = vld [vmem:[#allocation41_spill] sm:$0xff]  ;;  %v5644_v39 = vld [vmem:[#allocation16_spill] sm:$0xff]  ;;  %v2206_v1 = vpop.f32.mrf.mxu2 }
 0x23f   : >> { %v1758_v43 = vadd.f32 %v1742_v0, %v1705_v63  ;;  %v1446_v20 = vadd.f32 %v1430_v46, %v1393_v55  ;;  %v1904_v3 = vmul.f32 %v4639_v26, %v5639_v15  ;;  %v1260_v9 = vmul.f32 %v4383_v10, %v5640_v42  ;;  %v5645_v44 = vld [vmem:[#allocation29_spill] sm:$0xff]  ;;  %v5646_v46 = vld [vmem:[#allocation47_spill] sm:$0xff]  ;;  %v5647_v63 = vld [vmem:[#allocation40_spill] sm:$0xff] }
 0x240   : >> { %v2107_v30 = vadd.f32 %v4763_v4, %v2087_v33  ;;  %v1170_v58 = vadd.f32 %v1154_v17, %v1117_v11  ;;  %v1592_v47 = vmul.f32 %v4526_v31, %v5641_v28  ;;  %v1957_v61 = vmul.f32 %v4652_v18, %v5642_v48  ;;  %v5649_v33 = vld [vmem:[#allocation17_spill] sm:$0xff]  ;;  %v5650_v11 = vld [vmem:[#allocation52_spill] sm:$0xff] }
 0x241   : >> { %v1811_v60 = vadd.f32 %v1795_v35, %v1758_v43  ;;  %v1499_v19 = vadd.f32 %v1483_v22, %v1446_v20  ;;  %v1316_v40 = vmul.f32 %v4402_v29, %v5643_v5  ;;  %v1645_v50 = vmul.f32 %v4544_v56, %v5644_v39  ;;  %v2255_v22 = vld [vmem:[%s3540_s17 + $0x38] sm:$0xff]  ;;  %v5063_v43 = vld [vmem:[%s5175_s6] ss:$0 sm:$0xff]  ;;  %v2357_v20 = vpop.f32.mrf.mxu3  ;;  %s5081_s17 = scalar_lea.vmem %s3093_s13, %s2910_s14 }
 0x242   : >> { %2908 = vmatmul.msk.f32.gmra.mxu2 %vm306_vm2, %v2107_v30  ;;  %v1223_v0 = vadd.f32 %v1207_v32, %v1170_v58  ;;  %v2010_v35 = vmul.f32 %v4564_v21, %v5645_v44  ;;  %v1369_v51 = vmul.f32 %v4429_v7, %v5646_v46  ;;  %v1698_v45 = vmul.f32 %v4449_v38, %v5647_v63  ;;  %v2182_v7 = vpop.f32.mrf.mxu0  ;;  %v5651_v32 = vld [vmem:[#allocation54_spill] sm:$0xff] }
 0x243   : >> { %v1867_v41 = vadd.f32 %v1851_v6, %v1811_v60  ;;  %v1552_v49 = vadd.f32 %v1536_v57, %v1499_v19  ;;  %v2063_v29 = vmul.f32 %v4584_v14, %v5648_v27  ;;  %v1422_v55 = vmul.f32 %v4458_v54, %v5649_v33  ;;  %2919 = vmatmul.msk.f32.gmra.mxu1 %vm306_vm2, %v2255_v22  ;;  %v2333_v54 = vpop.f32.mrf.mxu1  ;;  %v2823_v60 = vld [vmem:[%s3410_s11 + $0x16e] sm:$0xff] }
 0x244   : >> { %v1276_v8 = vadd.f32 %v1260_v9, %v1223_v0  ;;  %v1751_v2 = vmul.f32 %v4599_v25, %v5650_v11  ;;  %v1475_v30 = vmul.f32 %v4478_v52, %v5651_v32  ;;  %v2207_v58 = vadd.f32 %v5063_v43, %v2206_v1  ;;  %v5652_v9 = vld [vmem:[#allocation53_spill] sm:$0xff] }
 0x245   : >> { %v1920_v10 = vadd.f32 %v1904_v3, %v1867_v41  ;;  %v1608_v37 = vadd.f32 %v1592_v47, %v1552_v49  ;;  %v2183_v3 = vadd.f32 %v5063_v43, %v2182_v7  ;;  %v1804_v19 = vmul.f32 %v4614_v13, %v5652_v9  ;;  %v2840_v47 = vld [vmem:[%s3410_s11 + $0x16f] sm:$0xff] }
 0x246   : >> { %v1332_v17 = vadd.f32 %v1316_v40, %v1276_v8  ;;  %v1528_v52 = vmul.f32 %v4505_v53, %v4896_v62  ;;  %v1860_v5 = vmul.f32 %v4496_v34, %v2823_v60  ;;  %v1584_v40 = vmul.f32 %v4526_v31, %v5603_v24  ;;  %v2857_v62 = vld [vmem:[%s3410_s11 + $0x170] sm:$0xff] }
 0x247   : >> { %v1973_v59 = vadd.f32 %v1957_v61, %v1920_v10  ;;  %v1661_v6 = vadd.f32 %v1645_v50, %v1608_v37  ;;  %v2230_v48 = vmax.f32 %v2183_v3, 0.0  ;;  %v2238_v61 = vmax.f32 %v2207_v58, 0.0  ;;  %v2209_v31 = vpop.f32.mrf.mxu2  ;;  %v5654_v3 = vld [vmem:[#allocation61_spill] sm:$0xff] }
 0x248   : >> { %v1385_v15 = vadd.f32 %v1369_v51, %v1332_v17  ;;  %v1913_v44 = vmul.f32 %v4639_v26, %v2840_v47  ;;  %v1637_v46 = vmul.f32 %v4544_v56, %v5605_v16  ;;  %v1966_v51 = vmul.f32 %v4652_v18, %v2857_v62  ;;  %v5656_v47 = vld [vmem:[#allocation72_spill] sm:$0xff] }
 0x249   : >> { %v2026_v57 = vadd.f32 %v2010_v35, %v1973_v59  ;;  %v1714_v42 = vadd.f32 %v1698_v45, %v1661_v6  ;;  %v2381_v39 = vadd.f32 %v2333_v54, %v2230_v48  ;;  %v2389_v50 = vadd.f32 %v2357_v20, %v2238_v61  ;;  %v2874_v35 = vld [vmem:[%s3410_s11 + $0x171] sm:$0xff]  ;;  %v2360_v56 = vpop.f32.mrf.mxu3  ;;  %v5653_v20 = vld [vmem:[#allocation60_spill] sm:$0xff] }
 0x24a   : >> { %v1438_v41 = vadd.f32 %v1422_v55, %v1385_v15  ;;  %v2210_v63 = vadd.f32 %v5063_v43, %v2209_v31  ;;  %v2891_v45 = vld [vmem:[%s3410_s11 + $0x172] sm:$0xff]  ;;  %v1690_v27 = vmul.f32 %v4449_v38, %v5611_v36  ;;  %v2019_v17 = vmul.f32 %v4564_v21, %v2874_v35 }
 0x24b   : >> { %v2079_v28 = vadd.f32 %v2063_v29, %v2026_v57  ;;  %v1767_v0 = vadd.f32 %v1751_v2, %v1714_v42  ;;  %2399 = vst.msk [vmem:[%s5081_s17] sm:$0xff] %vm2398_vm3, %v2381_v39  ;;  %v2336_v55 = vpop.f32.mrf.mxu1  ;;  %v1743_v7 = vmul.f32 %v4599_v25, %v5614_v12  ;;  %v2072_v11 = vmul.f32 %v4584_v14, %v2891_v45 }
 0x24c   : >> { %v1491_v49 = vadd.f32 %v1475_v30, %v1438_v41  ;;  %2407 = vst.msk [vmem:[%s5081_s17 + $0x40] sm:$0xff] %vm2398_vm3, %v2389_v50  ;;  %v2185_v37 = vpop.f32.mrf.mxu0  ;;  %v2239_v33 = vmax.f32 %v2210_v63, 0.0  ;;  %v1796_v36 = vmul.f32 %v4614_v13, %v5618_v23  ;;  %v1852_v57 = vmul.f32 %v4496_v34, %v5653_v20 }
 0x24d   : >> { %v2099_v53 = vadd.f32 %v4763_v4, %v2079_v28  ;;  %v1820_v10 = vadd.f32 %v1804_v19, %v1767_v0  ;;  %v2186_v29 = vadd.f32 %v5063_v43, %v2185_v37  ;;  %v1905_v58 = vmul.f32 %v4639_v26, %v5654_v3  ;;  %v5655_v19 = vld [vmem:[#allocation63_spill] sm:$0xff]  ;;  %v5657_v26 = vld [vmem:[#allocation8_spill] sm:$0xff] }
 0x24e   : >> { %v1544_v8 = vadd.f32 %v1528_v52, %v1491_v49  ;;  %v2390_v2 = vadd.f32 %v2360_v56, %v2239_v33  ;;  %v1958_v52 = vmul.f32 %v4652_v18, %v5655_v19  ;;  %v2011_v41 = vmul.f32 %v4564_v21, %v5656_v47 }
 0x24f   : >> { %2900 = vmatmul.msk.f32.gmra.mxu0 %vm306_vm2, %v2099_v53  ;;  %v1876_v24 = vadd.f32 %v1860_v5, %v1820_v10  ;;  %v2231_v1 = vmax.f32 %v2186_v29, 0.0  ;;  %v2064_v61 = vmul.f32 %v4584_v14, %v5657_v26 }
 0x250   : >> { %v1600_v59 = vadd.f32 %v1584_v40, %v1544_v8  ;;  %2408 = vst.msk [vmem:[%s5081_s17 + $0x48] sm:$0xff] %vm2398_vm3, %v2390_v2 }
 0x251   : >> { %v1929_v16 = vadd.f32 %v1913_v44, %v1876_v24  ;;  %v2382_v32 = vadd.f32 %v2336_v55, %v2231_v1  ;;  %v2212_v25 = vpop.f32.mrf.mxu2  ;;  %v2363_v13 = vpop.f32.mrf.mxu3 }
 0x252   : >> { %v1653_v22 = vadd.f32 %v1637_v46, %v1600_v59  ;;  %v2213_v60 = vadd.f32 %v5063_v43, %v2212_v25 }
 0x253   : >> { %v1982_v6 = vadd.f32 %v1966_v51, %v1929_v16  ;;  %2400 = vst.msk [vmem:[%s5081_s17 + $0x8] sm:$0xff] %vm2398_vm3, %v2382_v32  ;;  %v2339_v62 = vpop.f32.mrf.mxu1 }
 0x254   : >> { %v1706_v38 = vadd.f32 %v1690_v27, %v1653_v22  ;;  %v2240_v42 = vmax.f32 %v2213_v60, 0.0 }
 0x255   : >> { %v2035_v30 = vadd.f32 %v2019_v17, %v1982_v6 }
 0x256   : >> { %v1759_v54 = vadd.f32 %v1743_v7, %v1706_v38  ;;  %v2391_v34 = vadd.f32 %v2363_v13, %v2240_v42 }
 0x257   : >> { %v2088_v12 = vadd.f32 %v2072_v11, %v2035_v30 }
 0x258   : >> { %v1812_v15 = vadd.f32 %v1796_v36, %v1759_v54  ;;  %2409 = vst.msk [vmem:[%s5081_s17 + $0x50] sm:$0xff] %vm2398_vm3, %v2391_v34 }
 0x259   : >> { %v2108_v23 = vadd.f32 %v4763_v4, %v2088_v12  ;;  %v2366_v14 = vpop.f32.mrf.mxu3 }
 0x25a   : >> { %v1868_v9 = vadd.f32 %v1852_v57, %v1812_v15 }
 0x25b   : >> { %2909 = vmatmul.msk.f32.gmra.mxu2 %vm306_vm2, %v2108_v23 }
 0x25c   : >> { %v1921_v28 = vadd.f32 %v1905_v58, %v1868_v9 }
 0x25e   : >> { %v1974_v48 = vadd.f32 %v1958_v52, %v1921_v28 }
 0x260   : >> { %v2027_v0 = vadd.f32 %v2011_v41, %v1974_v48 }
 0x262   : >> { %v2080_v5 = vadd.f32 %v2064_v61, %v2027_v0 }
 0x263   : >> { %v2188_v18 = vpop.f32.mrf.mxu0 }
 0x264   : >> { %v2100_v40 = vadd.f32 %v4763_v4, %v2080_v5  ;;  %v2189_v53 = vadd.f32 %v5063_v43, %v2188_v18 }
 0x266   : >> { %2901 = vmatmul.msk.f32.gmra.mxu0 %vm306_vm2, %v2100_v40  ;;  %v2232_v49 = vmax.f32 %v2189_v53, 0.0 }
 0x267   : >> { %v2342_v8 = vpop.f32.mrf.mxu1 }
 0x268   : >> { %v2383_v21 = vadd.f32 %v2339_v62, %v2232_v49 }
 0x26a   : >> { %2401 = vst.msk [vmem:[%s5081_s17 + $0x10] sm:$0xff] %vm2398_vm3, %v2383_v21 }
 0x26b   : >> { %v2369_v37 = vpop.f32.mrf.mxu3 }
 0x278   : >> { %v2215_v39 = vpop.f32.mrf.mxu2 }
 0x279   : >> { %v2216_v50 = vadd.f32 %v5063_v43, %v2215_v39 }
 0x27b   : >> { %v2241_v10 = vmax.f32 %v2216_v50, 0.0 }
 0x27d   : >> { %v2392_v44 = vadd.f32 %v2366_v14, %v2241_v10 }
 0x27f   : >> { %2410 = vst.msk [vmem:[%s5081_s17 + $0x58] sm:$0xff] %vm2398_vm3, %v2392_v44 }
 0x282   : >> { %v2191_v35 = vpop.f32.mrf.mxu0 }
 0x283   : >> { %v2192_v4 = vadd.f32 %v5063_v43, %v2191_v35 }
 0x285   : >> { %v2233_v46 = vmax.f32 %v2192_v4, 0.0  ;;  %v2345_v29 = vpop.f32.mrf.mxu1 }
 0x287   : >> { %v2384_v31 = vadd.f32 %v2342_v8, %v2233_v46 }
 0x289   : >> { %2402 = vst.msk [vmem:[%s5081_s17 + $0x18] sm:$0xff] %vm2398_vm3, %v2384_v31 }
 0x28b   : >> { %v2372_v55 = vpop.f32.mrf.mxu3 }
 0x28e   : >> { %v2348_v11 = vpop.f32.mrf.mxu1 }
 0x290   : >> { %v2218_v24 = vpop.f32.mrf.mxu2 }
 0x291   : >> { %v2219_v51 = vadd.f32 %v5063_v43, %v2218_v24 }
 0x293   : >> { %v2242_v63 = vmax.f32 %v2219_v51, 0.0 }
 0x295   : >> { %v2393_v45 = vadd.f32 %v2369_v37, %v2242_v63  ;;  %v2375_v30 = vpop.f32.mrf.mxu3 }
 0x297   : >> { %2411 = vst.msk [vmem:[%s5081_s17 + $0x60] sm:$0xff] %vm2398_vm3, %v2393_v45 }
 0x299   : >> { %v2194_v59 = vpop.f32.mrf.mxu0 }
 0x29a   : >> { %v2195_v27 = vadd.f32 %v5063_v43, %v2194_v59 }
 0x29c   : >> { %v2234_v56 = vmax.f32 %v2195_v27, 0.0 }
 0x29e   : >> { %v2385_v16 = vadd.f32 %v2345_v29, %v2234_v56 }
 0x2a0   : >> { %2403 = vst.msk [vmem:[%s5081_s17 + $0x20] sm:$0xff] %vm2398_vm3, %v2385_v16 }
 0x2ac   : >> { %v2221_v17 = vpop.f32.mrf.mxu2 }
 0x2ad   : >> { %v2222_v33 = vadd.f32 %v5063_v43, %v2221_v17 }
 0x2af   : >> { %v2243_v22 = vmax.f32 %v2222_v33, 0.0 }
 0x2b1   : >> { %v2394_v7 = vadd.f32 %v2372_v55, %v2243_v22 }
 0x2b2   : >> { %v2197_v1 = vpop.f32.mrf.mxu0 }
 0x2b3   : >> { %v2198_v6 = vadd.f32 %v5063_v43, %v2197_v1  ;;  %2412 = vst.msk [vmem:[%s5081_s17 + $0x68] sm:$0xff] %vm2398_vm3, %v2394_v7 }
 0x2b5   : >> { %v2235_v2 = vmax.f32 %v2198_v6, 0.0 }
 0x2b7   : >> { %v2386_v38 = vadd.f32 %v2348_v11, %v2235_v2 }
 0x2b8   : >> { %v2351_v12 = vpop.f32.mrf.mxu1 }
 0x2b9   : >> { %2404 = vst.msk [vmem:[%s5081_s17 + $0x28] sm:$0xff] %vm2398_vm3, %v2386_v38 }
 0x2bb   : >> { %v2378_v13 = vpop.f32.mrf.mxu3 }
 0x2c0   : >> { %v2354_v52 = vpop.f32.mrf.mxu1 }
 0x2c5   : >> { %v2224_v36 = vpop.f32.mrf.mxu2 }
 0x2c6   : >> { %v2225_v32 = vadd.f32 %v5063_v43, %v2224_v36 }
 0x2c8   : >> { %v2244_v54 = vmax.f32 %v2225_v32, 0.0 }
 0x2ca   : >> { %v2395_v20 = vadd.f32 %v2375_v30, %v2244_v54 }
 0x2cc   : >> { %v2200_v57 = vpop.f32.mrf.mxu0  ;;  %2413 = vst.msk [vmem:[%s5081_s17 + $0x70] sm:$0xff] %vm2398_vm3, %v2395_v20 }
 0x2cd   : >> { %v2201_v25 = vadd.f32 %v5063_v43, %v2200_v57 }
 0x2cf   : >> { %v2236_v60 = vmax.f32 %v2201_v25, 0.0 }
 0x2d1   : >> { %v2387_v15 = vadd.f32 %v2351_v12, %v2236_v60 }
 0x2d3   : >> { %2405 = vst.msk [vmem:[%s5081_s17 + $0x30] sm:$0xff] %vm2398_vm3, %v2387_v15 }
 0x2de   : >> { %v2227_v3 = vpop.f32.mrf.mxu2 }
 0x2df   : >> { %v2228_v58 = vadd.f32 %v5063_v43, %v2227_v3 }
 0x2e1   : >> { %v2245_v23 = vmax.f32 %v2228_v58, 0.0 }
 0x2e3   : >> { %v2203_v42 = vpop.f32.mrf.mxu0  ;;  %v2396_v9 = vadd.f32 %v2378_v13, %v2245_v23 }
 0x2e4   : >> { %v2204_v19 = vadd.f32 %v5063_v43, %v2203_v42 }
 0x2e5   : >> { %2414 = vst.msk [vmem:[%s5081_s17 + $0x78] sm:$0xff] %vm2398_vm3, %v2396_v9 }
 0x2e6   : >> { %v2237_v34 = vmax.f32 %v2204_v19, 0.0  ;;  %748 = sbr.rel (!%p746_p4) target bundleno = 343 (0x157), region = 122 }
 0x2e8   : >> { %v2388_v28 = vadd.f32 %v2354_v52, %v2237_v34 }
 0x2ea   : >> { %2406 = vst.msk [vmem:[%s5081_s17 + $0x38] sm:$0xff] %vm2398_vm3, %v2388_v28 }
 0x2eb PF: > { %s18_s27 = sadd.s32 1, %s3024_s27  }
 0x2ec   : > { %p15_p5 = scmp.ge.s32.totalorder %s18_s27, 4  }
 0x2ee   :  { %17 = sbr.rel (!%p15_p5) target bundleno = 1 (0x1), region = 133 }

</bundles_post_ra>
